<compile_context>
chip_gen: v5e
topology: v5e:2x2
jax: 0.10.0
libtpu: 0.0.40
codegen_flags: <defaults>
</compile_context>

<pallas_src>
import functools

import numpy as np
import jax
import jax.numpy as jnp
from jax import lax
from jax.experimental import pallas as pl
from jax.experimental.pallas import tpu as pltpu

D1 = 256   # x1 / model dim
D2 = 768   # x2 dim


def cross_attn_kernel(x1_ref, x2_ref, wq_ref, bq_ref, wkv_ref, bkv_ref, out_ref,
                      kv_ref, *, approx_recip, kv_chunk):
    bb, tq, _ = x1_ref.shape            # (block_b, block_q, 256)
    n2 = x2_ref.shape[1]                # (block_b, N2, 768)
    cdt = wq_ref.dtype                  # matmul compute dtype (bf16 on perf path)
    n_chunks = n2 // kv_chunk

    # --- K/V projection: once per batch block.  q is the innermost "arbitrary"
    # grid axis, so program_id(1)==0 fires exactly when the batch block changes;
    # the projected K|V stays resident in kv_ref across all query tiles.
    @pl.when(pl.program_id(1) == 0)
    def _():
        x2_2d = x2_ref[...].reshape(bb * n2, D2)                  # already cdt
        kv2 = jnp.dot(x2_2d, wkv_ref[...],
                      preferred_element_type=jnp.float32) + bkv_ref[...]
        kv_ref[...] = kv2.reshape(bb, n2, 2 * D1).astype(kv_ref.dtype)

    # --- Q projection: fold batch into M so the MXU sees a tall matmul.
    x1 = x1_ref[...]                                              # f32 (residual)
    q2 = jnp.dot(x1.reshape(bb * tq, D1).astype(cdt), wq_ref[...],
                 preferred_element_type=jnp.float32) + bq_ref[...]
    q = q2.reshape(bb, tq, D1).astype(cdt)

    def score_and_v(kv_c):
        k_c = kv_c[:, :, :D1]                                     # lane-aligned slices
        v_c = kv_c[:, :, D1:]
        # Contraction on the lane dim -> no materialized K^T / XLU transpose.
        s = lax.dot_general(q, k_c, (((2,), (2,)), ((0,), (0,))),
                            preferred_element_type=jnp.float32)   # (bb, tq, tkv)
        return s, v_c

    if n_chunks == 1:
        # Single-chunk path: plain numerically-stable softmax (normalization still
        # folded into the (tq, 256) context below).
        s, v = score_and_v(kv_ref[...])
        m = jnp.max(s, axis=-1, keepdims=True)
        e = jnp.exp(s - m)
        l = jnp.sum(e, axis=-1, keepdims=True)
        acc = lax.dot_general(e.astype(cdt), v, (((2,), (1,)), ((0,), (0,))),
                              preferred_element_type=jnp.float32)
    else:
        # Online (flash) softmax over kv chunks of the cached projection: score
        # temporaries stay O(block_q * kv_chunk) instead of O(block_q * N2).
        def body(c, carry):
            m_p, l_p, acc_p = carry
            off = pl.multiple_of(c * kv_chunk, kv_chunk)
            s, v_c = score_and_v(kv_ref[:, pl.ds(off, kv_chunk), :])
            m_n = jnp.maximum(m_p, jnp.max(s, axis=-1, keepdims=True))
            alpha = jnp.exp(m_p - m_n)
            e = jnp.exp(s - m_n)
            l_n = alpha * l_p + jnp.sum(e, axis=-1, keepdims=True)
            acc_n = alpha * acc_p + lax.dot_general(
                e.astype(cdt), v_c, (((2,), (1,)), ((0,), (0,))),
                preferred_element_type=jnp.float32)
            return m_n, l_n, acc_n

        m0 = jnp.full((bb, tq, 1), -jnp.inf, jnp.float32)
        l0 = jnp.zeros((bb, tq, 1), jnp.float32)
        acc0 = jnp.zeros((bb, tq, D1), jnp.float32)
        _, l, acc = lax.fori_loop(0, n_chunks, body, (m0, l0, acc0),
                                  unroll=n_chunks <= 8)

    # Normalization folded into the (bb, tq, 256) output, not the (bb, tq, N2)
    # probabilities; residual add in f32 (matches PyTorch).
    inv_l = pl.reciprocal(l, approx=approx_recip)
    out_ref[...] = (acc * inv_l + x1.astype(jnp.float32)).astype(out_ref.dtype)


# ---------------------------------------------------------------------------
# Wrapper: tiling heuristics, VMEM budgeting, pallas_call construction.
# ---------------------------------------------------------------------------

def _largest_divisor(n, cap):
    cap = max(1, min(n, cap))
    for d in range(cap, 0, -1):
        if n % d == 0:
            return d
    return 1


def _pick_block(n, cap):
    """Largest tile <= cap dividing n that is a multiple of 8, else n itself."""
    if n <= cap:
        return n
    for d in range(cap, 7, -1):
        if n % d == 0 and d % 8 == 0:
            return d
    return n   # no clean multiple-of-8 divisor; full extent is always legal


def _vmem_capacity_bytes():
    try:
        return int(pltpu.get_tpu_info().vmem_capacity_bytes)
    except Exception:
        return 64 * 1024 * 1024   # v7x per-TensorCore VMEM (the smallest case)


def _estimate_vmem_bytes(block_b, block_q, n2, kv_chunk, in_sz, cdt_sz, out_sz):
    x1_blk = 2 * block_b * block_q * D1 * in_sz            # double-buffered input
    x2_blk = 2 * block_b * n2 * D2 * cdt_sz                # double-buffered input
    out_blk = 2 * block_b * block_q * D1 * out_sz          # double-buffered output
    weights = (D1 * D1 + D2 * 2 * D1) * cdt_sz + 3 * D1 * 4
    kv_cache = block_b * n2 * 2 * D1 * cdt_sz              # scratch
    temps = (block_b * n2 * 2 * D1 * 4                     # f32 KV projection result
             + block_b * block_q * D1 * (4 + cdt_sz)       # Q (f32 + compute dtype)
             + 3 * block_b * block_q * kv_chunk * 4        # scores / exp temporaries
             + block_b * block_q * (D1 + 2) * 4)           # acc / m / l carries
    return x1_blk + x2_blk + out_blk + weights + kv_cache + temps


def _build_call(B, N1, N2, block_b, block_q, kv_chunk, out_dtype, cdt,
                vmem_limit, approx_recip, single_buffer_weights):
    kernel = functools.partial(cross_attn_kernel,
                               approx_recip=approx_recip, kv_chunk=kv_chunk)

    def w_spec(shape):
        # Grid-invariant operands (constant index_map): a single buffer suffices.
        if single_buffer_weights:
            return pl.BlockSpec(shape, lambda b, q: (0, 0),
                                pipeline_mode=pl.Buffered(1))
        return pl.BlockSpec(shape, lambda b, q: (0, 0))

    grid = (B // block_b, N1 // block_q)
    return pl.pallas_call(
        kernel,
        out_shape=jax.ShapeDtypeStruct((B, N1, D1), out_dtype),
        grid_spec=pltpu.PrefetchScalarGridSpec(
            num_scalar_prefetch=0,
            grid=grid,
            in_specs=[
                pl.BlockSpec((block_b, block_q, D1), lambda b, q: (b, q, 0)),  # x1
                pl.BlockSpec((block_b, N2, D2), lambda b, q: (b, 0, 0)),       # x2 (re-DMA only when b changes)
                w_spec((D1, D1)),        # Wq
                w_spec((1, D1)),         # bq
                w_spec((D2, 2 * D1)),    # W[k|v] fused
                w_spec((1, 2 * D1)),     # b[k|v] fused
            ],
            out_specs=pl.BlockSpec((block_b, block_q, D1), lambda b, q: (b, q, 0)),
            scratch_shapes=[pltpu.VMEM((block_b, N2, 2 * D1), cdt)],  # cached K|V
        ),
        compiler_params=pltpu.CompilerParams(
            # q must be "arbitrary": the KV cache persists across q steps.
            dimension_semantics=("parallel", "arbitrary"),
            vmem_limit_bytes=int(vmem_limit),
        ),
    )


def cross_attention_fusion(x1, x2, params, *, compute_dtype=jnp.bfloat16,
                           block_b=None, block_q=None, kv_chunk=None,
                           approx_recip=True):
    """x1: (B, N1, 256); x2: (B, N2, 768) -> (B, N1, 256) (dtype of x1)."""
    B, N1, d1 = x1.shape
    Bx, N2, d2 = x2.shape
    assert d1 == D1 and d2 == D2 and Bx == B
    cdt = np.dtype(compute_dtype)

    # ---- block-size heuristics ---------------------------------------------
    if block_q is None:
        block_q = _pick_block(N1, 512)
    if kv_chunk is None:
        kv_chunk = _pick_block(N2, 512)
    if block_b is None:
        # Fold batch into the projection M dimension (MXU-filling tall matmuls),
        # but keep >= 2 steps on the parallel batch axis for v7x's 2 TensorCores.
        block_b = _largest_divisor(B, max(1, 1024 // max(N1, N2)))
        if B >= 2 and B // block_b < 2:
            block_b = _largest_divisor(B, B // 2)

    assert B % block_b == 0
    assert N1 % block_q == 0 and (block_q == N1 or block_q % 8 == 0)
    assert N2 % kv_chunk == 0 and (kv_chunk == N2 or kv_chunk % 8 == 0)

    # ---- VMEM budget: derive limit from tile sizes, cap below physical ------
    cap = int(0.82 * _vmem_capacity_bytes())      # ~52 MiB on v7x, ~105 MiB on v5e/v6e
    in_sz, out_sz = x1.dtype.itemsize, x1.dtype.itemsize

    def est():
        return _estimate_vmem_bytes(block_b, block_q, N2, kv_chunk,
                                    in_sz, cdt.itemsize, out_sz)

    while est() > cap:
        if block_q % 16 == 0:
            block_q //= 2
        elif kv_chunk % 16 == 0:
            kv_chunk //= 2
        elif block_b > 1:
            block_b = _largest_divisor(B, block_b // 2)
        else:
            break
    vmem_limit = min(cap, max(2 * est(), 32 * 1024 * 1024))
    # TODO(synk): when N2 is so large that even the compute-dtype KV cache
    # (block_b*N2*512*itemsize) exceeds the VMEM cap, stream x2 / projected KV
    # from HBM with manual double-buffered DMAs instead of a resident scratch.

    # ---- operands (cast matmul operands at the call site: smaller DMA) ------
    wq = params["wq"].astype(cdt)
    wkv = jnp.concatenate([params["wk"], params["wv"]], axis=1).astype(cdt)   # (768, 512)
    bq = params["bq"].astype(jnp.float32)
    bkv = jnp.concatenate([params["bk"], params["bv"]], axis=1).astype(jnp.float32)
    x2c = x2.astype(cdt)
    operands = (x1, x2c, wq, bq, wkv, bkv)

    try:
        fn = _build_call(B, N1, N2, block_b, block_q, kv_chunk, x1.dtype, cdt,
                         vmem_limit, approx_recip, single_buffer_weights=True)
        return fn(*operands)
    except Exception:
        # Fallback if pl.Buffered(1) is unsupported by the local jaxlib
        # (only costs ~0.9 MiB of duplicated weight buffers).
        fn = _build_call(B, N1, N2, block_b, block_q, kv_chunk, x1.dtype, cdt,
                         vmem_limit, approx_recip, single_buffer_weights=False)
        return fn(*operands)


# ---------------------------------------------------------------------------
# Parameters and pure-JAX reference.
# ---------------------------------------------------------------------------

def init_params(key):
    """Deterministic synthetic parameters (shapes from nn.Linear in __init__)."""
    ks = jax.random.split(key, 6)
    wq = jax.random.normal(ks[0], (D1, D1), jnp.float32) * (1.0 / jnp.sqrt(D1))
    wk = jax.random.normal(ks[1], (D2, D1), jnp.float32) * (1.0 / jnp.sqrt(D2))
    wv = jax.random.normal(ks[2], (D2, D1), jnp.float32) * (1.0 / jnp.sqrt(D2))
    bq = jax.random.normal(ks[3], (1, D1), jnp.float32) * 0.01
    bk = jax.random.normal(ks[4], (1, D1), jnp.float32) * 0.01
    bv = jax.random.normal(ks[5], (1, D1), jnp.float32) * 0.01
    return dict(wq=wq, bq=bq, wk=wk, bk=bk, wv=wv, bv=bv)


def reference(x1, x2, p, compute_dtype=jnp.float32):
    """Pure-JAX reference with matched matmul compute dtype / f32 accumulation."""
    cdt = compute_dtype
    f32 = jnp.float32
    hp = jax.lax.Precision.HIGHEST
    q = jnp.dot(x1.astype(cdt), p["wq"].astype(cdt),
                preferred_element_type=f32, precision=hp) + p["bq"]
    k = jnp.dot(x2.astype(cdt), p["wk"].astype(cdt),
                preferred_element_type=f32, precision=hp) + p["bk"]
    v = jnp.dot(x2.astype(cdt), p["wv"].astype(cdt),
                preferred_element_type=f32, precision=hp) + p["bv"]
    s = jnp.einsum("bqd,bkd->bqk", q.astype(cdt), k.astype(cdt),
                   preferred_element_type=f32, precision=hp)
    w = jax.nn.softmax(s, axis=-1)
    ctx = jnp.einsum("bqk,bkd->bqd", w.astype(cdt), v.astype(cdt),
                     preferred_element_type=f32, precision=hp)
    return ctx + x1


if __name__ == "__main__":
    key = jax.random.PRNGKey(0)
    k1, k2, kp = jax.random.split(key, 3)

    B, N1, N2 = 4, 8, 8
    x1 = jax.random.normal(k1, (B, N1, D1), jnp.float32)
    x2 = jax.random.normal(k2, (B, N2, D2), jnp.float32)
    params = init_params(kp)

    # Performance path: bf16 MXU operands, f32 accumulation, EUP approx recip.
    out_bf16 = jax.block_until_ready(
        cross_attention_fusion(x1, x2, params, compute_dtype=jnp.bfloat16))
    ref_bf16 = reference(x1, x2, params, compute_dtype=jnp.bfloat16)
    assert out_bf16.shape == (B, N1, D1)
    assert jnp.allclose(out_bf16, ref_bf16, atol=3e-2, rtol=3e-2), \
        "bf16 path mismatch vs matched-precision reference"

    # Exact-semantics path: f32 operands, exact reciprocal.
    out_f32 = jax.block_until_ready(
        cross_attention_fusion(x1, x2, params, compute_dtype=jnp.float32,
                               approx_recip=False))
    ref_f32 = reference(x1, x2, params, compute_dtype=jnp.float32)
    assert jnp.allclose(out_f32, ref_f32, atol=1e-2, rtol=1e-2), \
        "f32 path mismatch vs reference"

    # Exercise the multi-query-tile path (KV cache reused across q steps) and the
    # chunked online-softmax path, still at small shapes.
    xa = jax.random.normal(jax.random.PRNGKey(1), (2, 32, D1), jnp.float32)
    xb = jax.random.normal(jax.random.PRNGKey(2), (2, 32, D2), jnp.float32)
    out2 = jax.block_until_ready(
        cross_attention_fusion(xa, xb, params, compute_dtype=jnp.bfloat16,
                               block_b=1, block_q=16, kv_chunk=16))
    ref2 = reference(xa, xb, params, compute_dtype=jnp.bfloat16)
    assert jnp.allclose(out2, ref2, atol=3e-2, rtol=3e-2), \
        "tiled (KV-cached / flash-softmax) path mismatch vs reference"

    print("KERNEL_OK")
</pallas_src>

<mosaic_0001>
module attributes {stable_mosaic.version = 11 : i64} {
  func.func @cross_attn_kernel(%arg0: i32, %arg1: i32, %arg2: memref<2x8x256xf32, #tpu.memory_space<vmem>>, %arg3: memref<2x8x768xbf16, #tpu.memory_space<vmem>>, %arg4: memref<256x256xbf16, #tpu.memory_space<vmem>>, %arg5: memref<1x256xf32, #tpu.memory_space<vmem>>, %arg6: memref<768x512xbf16, #tpu.memory_space<vmem>>, %arg7: memref<1x512xf32, #tpu.memory_space<vmem>>, %arg8: memref<2x8x256xf32, #tpu.memory_space<vmem>>, %arg9: memref<2x8x512xbf16, #tpu.memory_space<vmem>>) attributes {dimension_semantics = [#tpu.dimension_semantics<parallel>, #tpu.dimension_semantics<arbitrary>], iteration_bounds = array<i64: 2, 1>, scalar_prefetch = 0 : i64, scratch_operands = 1 : i64, tpu.core_type = #tpu.core_type<tc>, window_params = [{transform_indices = @transform_0, window_bounds = array<i64: 2, 8, 256>}, {transform_indices = @transform_1, window_bounds = array<i64: 2, 8, 768>}, {pipeline_mode = #tpu.pipeline_mode<synchronous>, transform_indices = @transform_2, window_bounds = array<i64: 256, 256>}, {pipeline_mode = #tpu.pipeline_mode<synchronous>, transform_indices = @transform_3, window_bounds = array<i64: 1, 256>}, {pipeline_mode = #tpu.pipeline_mode<synchronous>, transform_indices = @transform_4, window_bounds = array<i64: 768, 512>}, {pipeline_mode = #tpu.pipeline_mode<synchronous>, transform_indices = @transform_5, window_bounds = array<i64: 1, 512>}, {transform_indices = @transform_6, window_bounds = array<i64: 2, 8, 256>}]} {
    %c0_i32 = arith.constant 0 : i32
    %0 = arith.cmpi eq, %arg1, %c0_i32 : i32
    %1 = arith.extui %0 : i1 to i32
    %c0_i32_0 = arith.constant 0 : i32
    %2 = arith.cmpi ne, %1, %c0_i32_0 : i32
    scf.if %2 {
      %c0_17 = arith.constant 0 : index
      %c0_18 = arith.constant 0 : index
      %c0_19 = arith.constant 0 : index
      %31 = vector.load %arg3[%c0_17, %c0_18, %c0_19] : memref<2x8x768xbf16, #tpu.memory_space<vmem>>, vector<2x8x768xbf16>
      %32 = vector.shape_cast %31 : vector<2x8x768xbf16> to vector<16x768xbf16>
      %c0_20 = arith.constant 0 : index
      %c0_21 = arith.constant 0 : index
      %33 = vector.load %arg6[%c0_20, %c0_21] : memref<768x512xbf16, #tpu.memory_space<vmem>>, vector<768x512xbf16>
      %cst_22 = arith.constant dense<0.000000e+00> : vector<16x512xf32>
      %34 = tpu.matmul %32, %33, %cst_22 {dimension_numbers = #tpu.dot_dimension_numbers<[1], [0], [0], [1], [0, 0, 1, 1], [], []>} : vector<16x768xbf16>, vector<768x512xbf16>, vector<16x512xf32> -> vector<16x512xf32>
      %c0_23 = arith.constant 0 : index
      %c0_24 = arith.constant 0 : index
      %35 = vector.load %arg7[%c0_23, %c0_24] : memref<1x512xf32, #tpu.memory_space<vmem>>, vector<1x512xf32>
      %36 = vector.broadcast %35 : vector<1x512xf32> to vector<16x512xf32>
      %37 = arith.addf %34, %36 : vector<16x512xf32>
      %38 = vector.shape_cast %37 : vector<16x512xf32> to vector<2x8x512xf32>
      %39 = arith.truncf %38 : vector<2x8x512xf32> to vector<2x8x512xbf16>
      %c0_25 = arith.constant 0 : index
      %c0_26 = arith.constant 0 : index
      %c0_27 = arith.constant 0 : index
      %40 = vector.load %arg9[%c0_25, %c0_26, %c0_27] : memref<2x8x512xbf16, #tpu.memory_space<vmem>>, vector<2x8x512xbf16>
      tpu.vector_store %arg9[%c0_25, %c0_26, %c0_27], %39 {strides = array<i32>} : memref<2x8x512xbf16, #tpu.memory_space<vmem>>, vector<2x8x512xbf16>,
    } else {
    }
    %c0 = arith.constant 0 : index
    %c0_1 = arith.constant 0 : index
    %c0_2 = arith.constant 0 : index
    %3 = vector.load %arg2[%c0, %c0_1, %c0_2] : memref<2x8x256xf32, #tpu.memory_space<vmem>>, vector<2x8x256xf32>
    %4 = vector.shape_cast %3 : vector<2x8x256xf32> to vector<16x256xf32>
    %5 = arith.truncf %4 : vector<16x256xf32> to vector<16x256xbf16>
    %c0_3 = arith.constant 0 : index
    %c0_4 = arith.constant 0 : index
    %6 = vector.load %arg4[%c0_3, %c0_4] : memref<256x256xbf16, #tpu.memory_space<vmem>>, vector<256x256xbf16>
    %cst = arith.constant dense<0.000000e+00> : vector<16x256xf32>
    %7 = tpu.matmul %5, %6, %cst {dimension_numbers = #tpu.dot_dimension_numbers<[1], [0], [0], [1], [0, 0, 1, 1], [], []>} : vector<16x256xbf16>, vector<256x256xbf16>, vector<16x256xf32> -> vector<16x256xf32>
    %c0_5 = arith.constant 0 : index
    %c0_6 = arith.constant 0 : index
    %8 = vector.load %arg5[%c0_5, %c0_6] : memref<1x256xf32, #tpu.memory_space<vmem>>, vector<1x256xf32>
    %9 = vector.broadcast %8 : vector<1x256xf32> to vector<16x256xf32>
    %10 = arith.addf %7, %9 : vector<16x256xf32>
    %11 = vector.shape_cast %10 : vector<16x256xf32> to vector<2x8x256xf32>
    %12 = arith.truncf %11 : vector<2x8x256xf32> to vector<2x8x256xbf16>
    %c0_7 = arith.constant 0 : index
    %c0_8 = arith.constant 0 : index
    %c0_9 = arith.constant 0 : index
    %13 = vector.load %arg9[%c0_7, %c0_8, %c0_9] : memref<2x8x512xbf16, #tpu.memory_space<vmem>>, vector<2x8x512xbf16>
    %14 = vector.extract_strided_slice %13 {offsets = [0, 0, 0], sizes = [2, 8, 256], strides = [1, 1, 1]} : vector<2x8x512xbf16> to vector<2x8x256xbf16>
    %15 = vector.extract_strided_slice %13 {offsets = [0, 0, 256], sizes = [2, 8, 256], strides = [1, 1, 1]} : vector<2x8x512xbf16> to vector<2x8x256xbf16>
    %cst_10 = arith.constant dense<0.000000e+00> : vector<2x8x8xf32>
    %16 = tpu.matmul %12, %14, %cst_10 {dimension_numbers = #tpu.dot_dimension_numbers<[2], [2], [1], [1], [0, 0, 0, 1, 1, 1], [0], [0]>} : vector<2x8x256xbf16>, vector<2x8x256xbf16>, vector<2x8x8xf32> -> vector<2x8x8xf32>
    %cst_11 = arith.constant dense<0xFF800000> : vector<2x8xf32>
    %17 = vector.multi_reduction <maximumf>, %16, %cst_11 [2] : vector<2x8x8xf32> to vector<2x8xf32>
    %18 = vector.shape_cast %17 : vector<2x8xf32> to vector<2x8x1xf32>
    %19 = vector.broadcast %18 : vector<2x8x1xf32> to vector<2x8x8xf32>
    %20 = arith.subf %16, %19 : vector<2x8x8xf32>
    %21 = math.exp %20 : vector<2x8x8xf32>
    %cst_12 = arith.constant dense<0.000000e+00> : vector<2x8xf32>
    %22 = vector.multi_reduction <add>, %21, %cst_12 [2] : vector<2x8x8xf32> to vector<2x8xf32>
    %23 = vector.shape_cast %22 : vector<2x8xf32> to vector<2x8x1xf32>
    %24 = arith.truncf %21 : vector<2x8x8xf32> to vector<2x8x8xbf16>
    %cst_13 = arith.constant dense<0.000000e+00> : vector<2x8x256xf32>
    %25 = tpu.matmul %24, %15, %cst_13 {dimension_numbers = #tpu.dot_dimension_numbers<[2], [1], [1], [2], [0, 0, 0, 1, 1, 2], [0], [0]>} : vector<2x8x8xbf16>, vector<2x8x256xbf16>, vector<2x8x256xf32> -> vector<2x8x256xf32>
    %26 = tpu.reciprocal %23 {approx = true} : vector<2x8x1xf32> -> vector<2x8x1xf32>
    %27 = vector.broadcast %26 : vector<2x8x1xf32> to vector<2x8x256xf32>
    %28 = arith.mulf %25, %27 : vector<2x8x256xf32>
    %29 = arith.addf %28, %3 : vector<2x8x256xf32>
    %c0_14 = arith.constant 0 : index
    %c0_15 = arith.constant 0 : index
    %c0_16 = arith.constant 0 : index
    %30 = vector.load %arg8[%c0_14, %c0_15, %c0_16] : memref<2x8x256xf32, #tpu.memory_space<vmem>>, vector<2x8x256xf32>
    tpu.vector_store %arg8[%c0_14, %c0_15, %c0_16], %29 {strides = array<i32>} : memref<2x8x256xf32, #tpu.memory_space<vmem>>, vector<2x8x256xf32>,
    return
  }
  func.func @transform_0(%arg0: i32, %arg1: i32) -> (i32, i32, i32) {
    %c0_i32 = arith.constant 0 : i32
    %c0_i32_0 = arith.constant 0 : i32
    return %arg0, %arg1, %c0_i32 : i32, i32, i32
  }
  func.func @transform_1(%arg0: i32, %arg1: i32) -> (i32, i32, i32) {
    %c0_i32 = arith.constant 0 : i32
    %c0_i32_0 = arith.constant 0 : i32
    %c0_i32_1 = arith.constant 0 : i32
    return %arg0, %c0_i32, %c0_i32_0 : i32, i32, i32
  }
  func.func @transform_2(%arg0: i32, %arg1: i32) -> (i32, i32) {
    %c0_i32 = arith.constant 0 : i32
    %c0_i32_0 = arith.constant 0 : i32
    %c0_i32_1 = arith.constant 0 : i32
    return %c0_i32, %c0_i32_0 : i32, i32
  }
  func.func @transform_3(%arg0: i32, %arg1: i32) -> (i32, i32) {
    %c0_i32 = arith.constant 0 : i32
    %c0_i32_0 = arith.constant 0 : i32
    %c0_i32_1 = arith.constant 0 : i32
    return %c0_i32, %c0_i32_0 : i32, i32
  }
  func.func @transform_4(%arg0: i32, %arg1: i32) -> (i32, i32) {
    %c0_i32 = arith.constant 0 : i32
    %c0_i32_0 = arith.constant 0 : i32
    %c0_i32_1 = arith.constant 0 : i32
    return %c0_i32, %c0_i32_0 : i32, i32
  }
  func.func @transform_5(%arg0: i32, %arg1: i32) -> (i32, i32) {
    %c0_i32 = arith.constant 0 : i32
    %c0_i32_0 = arith.constant 0 : i32
    %c0_i32_1 = arith.constant 0 : i32
    return %c0_i32, %c0_i32_0 : i32, i32
  }
  func.func @transform_6(%arg0: i32, %arg1: i32) -> (i32, i32, i32) {
    %c0_i32 = arith.constant 0 : i32
    %c0_i32_0 = arith.constant 0 : i32
    return %arg0, %arg1, %c0_i32 : i32, i32, i32
  }
}

module attributes {stable_mosaic.version = 11 : i64} {
  func.func @cross_attn_kernel(%arg0: i32, %arg1: i32, %arg2: memref<2x8x256xf32, #tpu.memory_space<vmem>>, %arg3: memref<2x8x768xbf16, #tpu.memory_space<vmem>>, %arg4: memref<256x256xbf16, #tpu.memory_space<vmem>>, %arg5: memref<1x256xf32, #tpu.memory_space<vmem>>, %arg6: memref<768x512xbf16, #tpu.memory_space<vmem>>, %arg7: memref<1x512xf32, #tpu.memory_space<vmem>>, %arg8: memref<2x8x256xf32, #tpu.memory_space<vmem>>, %arg9: memref<2x8x512xbf16, #tpu.memory_space<vmem>>) attributes {dimension_semantics = [#tpu.dimension_semantics<parallel>, #tpu.dimension_semantics<arbitrary>], iteration_bounds = array<i64: 2, 1>, scalar_prefetch = 0 : i64, scratch_operands = 1 : i64, tpu.core_type = #tpu.core_type<tc>, window_params = [{transform_indices = @transform_0, window_bounds = array<i64: 2, 8, 256>}, {transform_indices = @transform_1, window_bounds = array<i64: 2, 8, 768>}, {pipeline_mode = #tpu.pipeline_mode<synchronous>, transform_indices = @transform_2, window_bounds = array<i64: 256, 256>}, {pipeline_mode = #tpu.pipeline_mode<synchronous>, transform_indices = @transform_3, window_bounds = array<i64: 1, 256>}, {pipeline_mode = #tpu.pipeline_mode<synchronous>, transform_indices = @transform_4, window_bounds = array<i64: 768, 512>}, {pipeline_mode = #tpu.pipeline_mode<synchronous>, transform_indices = @transform_5, window_bounds = array<i64: 1, 512>}, {transform_indices = @transform_6, window_bounds = array<i64: 2, 8, 256>}]} {
    %c0_i32 = arith.constant 0 : i32
    %0 = arith.cmpi eq, %arg1, %c0_i32 : i32
    %1 = arith.extui %0 : i1 to i32
    %c0_i32_0 = arith.constant 0 : i32
    %2 = arith.cmpi ne, %1, %c0_i32_0 : i32
    scf.if %2 {
      %c0_17 = arith.constant 0 : index
      %c0_18 = arith.constant 0 : index
      %c0_19 = arith.constant 0 : index
      %31 = vector.load %arg3[%c0_17, %c0_18, %c0_19] : memref<2x8x768xbf16, #tpu.memory_space<vmem>>, vector<2x8x768xbf16>
      %32 = vector.shape_cast %31 : vector<2x8x768xbf16> to vector<16x768xbf16>
      %c0_20 = arith.constant 0 : index
      %c0_21 = arith.constant 0 : index
      %33 = vector.load %arg6[%c0_20, %c0_21] : memref<768x512xbf16, #tpu.memory_space<vmem>>, vector<768x512xbf16>
      %cst_22 = arith.constant dense<0.000000e+00> : vector<16x512xf32>
      %34 = tpu.matmul %32, %33, %cst_22 {dimension_numbers = #tpu.dot_dimension_numbers<[1], [0], [0], [1], [0, 0, 1, 1], [], []>} : vector<16x768xbf16>, vector<768x512xbf16>, vector<16x512xf32> -> vector<16x512xf32>
      %c0_23 = arith.constant 0 : index
      %c0_24 = arith.constant 0 : index
      %35 = vector.load %arg7[%c0_23, %c0_24] : memref<1x512xf32, #tpu.memory_space<vmem>>, vector<1x512xf32>
      %36 = vector.broadcast %35 : vector<1x512xf32> to vector<16x512xf32>
      %37 = arith.addf %34, %36 : vector<16x512xf32>
      %38 = vector.shape_cast %37 : vector<16x512xf32> to vector<2x8x512xf32>
      %39 = arith.truncf %38 : vector<2x8x512xf32> to vector<2x8x512xbf16>
      %c0_25 = arith.constant 0 : index
      %c0_26 = arith.constant 0 : index
      %c0_27 = arith.constant 0 : index
      %40 = vector.load %arg9[%c0_25, %c0_26, %c0_27] : memref<2x8x512xbf16, #tpu.memory_space<vmem>>, vector<2x8x512xbf16>
      tpu.vector_store %arg9[%c0_25, %c0_26, %c0_27], %39 {strides = array<i32>} : memref<2x8x512xbf16, #tpu.memory_space<vmem>>, vector<2x8x512xbf16>,
    } else {
    }
    %c0 = arith.constant 0 : index
    %c0_1 = arith.constant 0 : index
    %c0_2 = arith.constant 0 : index
    %3 = vector.load %arg2[%c0, %c0_1, %c0_2] : memref<2x8x256xf32, #tpu.memory_space<vmem>>, vector<2x8x256xf32>
    %4 = vector.shape_cast %3 : vector<2x8x256xf32> to vector<16x256xf32>
    %5 = arith.truncf %4 : vector<16x256xf32> to vector<16x256xbf16>
    %c0_3 = arith.constant 0 : index
    %c0_4 = arith.constant 0 : index
    %6 = vector.load %arg4[%c0_3, %c0_4] : memref<256x256xbf16, #tpu.memory_space<vmem>>, vector<256x256xbf16>
    %cst = arith.constant dense<0.000000e+00> : vector<16x256xf32>
    %7 = tpu.matmul %5, %6, %cst {dimension_numbers = #tpu.dot_dimension_numbers<[1], [0], [0], [1], [0, 0, 1, 1], [], []>} : vector<16x256xbf16>, vector<256x256xbf16>, vector<16x256xf32> -> vector<16x256xf32>
    %c0_5 = arith.constant 0 : index
    %c0_6 = arith.constant 0 : index
    %8 = vector.load %arg5[%c0_5, %c0_6] : memref<1x256xf32, #tpu.memory_space<vmem>>, vector<1x256xf32>
    %9 = vector.broadcast %8 : vector<1x256xf32> to vector<16x256xf32>
    %10 = arith.addf %7, %9 : vector<16x256xf32>
    %11 = vector.shape_cast %10 : vector<16x256xf32> to vector<2x8x256xf32>
    %12 = arith.truncf %11 : vector<2x8x256xf32> to vector<2x8x256xbf16>
    %c0_7 = arith.constant 0 : index
    %c0_8 = arith.constant 0 : index
    %c0_9 = arith.constant 0 : index
    %13 = vector.load %arg9[%c0_7, %c0_8, %c0_9] : memref<2x8x512xbf16, #tpu.memory_space<vmem>>, vector<2x8x512xbf16>
    %14 = vector.extract_strided_slice %13 {offsets = [0, 0, 0], sizes = [2, 8, 256], strides = [1, 1, 1]} : vector<2x8x512xbf16> to vector<2x8x256xbf16>
    %15 = vector.extract_strided_slice %13 {offsets = [0, 0, 256], sizes = [2, 8, 256], strides = [1, 1, 1]} : vector<2x8x512xbf16> to vector<2x8x256xbf16>
    %cst_10 = arith.constant dense<0.000000e+00> : vector<2x8x8xf32>
    %16 = tpu.matmul %12, %14, %cst_10 {dimension_numbers = #tpu.dot_dimension_numbers<[2], [2], [1], [1], [0, 0, 0, 1, 1, 1], [0], [0]>} : vector<2x8x256xbf16>, vector<2x8x256xbf16>, vector<2x8x8xf32> -> vector<2x8x8xf32>
    %cst_11 = arith.constant dense<0xFF800000> : vector<2x8xf32>
    %17 = vector.multi_reduction <maximumf>, %16, %cst_11 [2] : vector<2x8x8xf32> to vector<2x8xf32>
    %18 = vector.shape_cast %17 : vector<2x8xf32> to vector<2x8x1xf32>
    %19 = vector.broadcast %18 : vector<2x8x1xf32> to vector<2x8x8xf32>
    %20 = arith.subf %16, %19 : vector<2x8x8xf32>
    %21 = math.exp %20 : vector<2x8x8xf32>
    %cst_12 = arith.constant dense<0.000000e+00> : vector<2x8xf32>
    %22 = vector.multi_reduction <add>, %21, %cst_12 [2] : vector<2x8x8xf32> to vector<2x8xf32>
    %23 = vector.shape_cast %22 : vector<2x8xf32> to vector<2x8x1xf32>
    %24 = arith.truncf %21 : vector<2x8x8xf32> to vector<2x8x8xbf16>
    %cst_13 = arith.constant dense<0.000000e+00> : vector<2x8x256xf32>
    %25 = tpu.matmul %24, %15, %cst_13 {dimension_numbers = #tpu.dot_dimension_numbers<[2], [1], [1], [2], [0, 0, 0, 1, 1, 2], [0], [0]>} : vector<2x8x8xbf16>, vector<2x8x256xbf16>, vector<2x8x256xf32> -> vector<2x8x256xf32>
    %26 = tpu.reciprocal %23 {approx = true} : vector<2x8x1xf32> -> vector<2x8x1xf32>
    %27 = vector.broadcast %26 : vector<2x8x1xf32> to vector<2x8x256xf32>
    %28 = arith.mulf %25, %27 : vector<2x8x256xf32>
    %29 = arith.addf %28, %3 : vector<2x8x256xf32>
    %c0_14 = arith.constant 0 : index
    %c0_15 = arith.constant 0 : index
    %c0_16 = arith.constant 0 : index
    %30 = vector.load %arg8[%c0_14, %c0_15, %c0_16] : memref<2x8x256xf32, #tpu.memory_space<vmem>>, vector<2x8x256xf32>
    tpu.vector_store %arg8[%c0_14, %c0_15, %c0_16], %29 {strides = array<i32>} : memref<2x8x256xf32, #tpu.memory_space<vmem>>, vector<2x8x256xf32>,
    return
  }
  func.func @transform_0(%arg0: i32, %arg1: i32) -> (i32, i32, i32) {
    %c0_i32 = arith.constant 0 : i32
    %c0_i32_0 = arith.constant 0 : i32
    return %arg0, %arg1, %c0_i32 : i32, i32, i32
  }
  func.func @transform_1(%arg0: i32, %arg1: i32) -> (i32, i32, i32) {
    %c0_i32 = arith.constant 0 : i32
    %c0_i32_0 = arith.constant 0 : i32
    %c0_i32_1 = arith.constant 0 : i32
    return %arg0, %c0_i32, %c0_i32_0 : i32, i32, i32
  }
  func.func @transform_2(%arg0: i32, %arg1: i32) -> (i32, i32) {
    %c0_i32 = arith.constant 0 : i32
    %c0_i32_0 = arith.constant 0 : i32
    %c0_i32_1 = arith.constant 0 : i32
    return %c0_i32, %c0_i32_0 : i32, i32
  }
  func.func @transform_3(%arg0: i32, %arg1: i32) -> (i32, i32) {
    %c0_i32 = arith.constant 0 : i32
    %c0_i32_0 = arith.constant 0 : i32
    %c0_i32_1 = arith.constant 0 : i32
    return %c0_i32, %c0_i32_0 : i32, i32
  }
  func.func @transform_4(%arg0: i32, %arg1: i32) -> (i32, i32) {
    %c0_i32 = arith.constant 0 : i32
    %c0_i32_0 = arith.constant 0 : i32
    %c0_i32_1 = arith.constant 0 : i32
    return %c0_i32, %c0_i32_0 : i32, i32
  }
  func.func @transform_5(%arg0: i32, %arg1: i32) -> (i32, i32) {
    %c0_i32 = arith.constant 0 : i32
    %c0_i32_0 = arith.constant 0 : i32
    %c0_i32_1 = arith.constant 0 : i32
    return %c0_i32, %c0_i32_0 : i32, i32
  }
  func.func @transform_6(%arg0: i32, %arg1: i32) -> (i32, i32, i32) {
    %c0_i32 = arith.constant 0 : i32
    %c0_i32_0 = arith.constant 0 : i32
    return %arg0, %arg1, %c0_i32 : i32, i32, i32
  }
}

</mosaic_0001>

<bundles_post_ra>
// kernel: tpu_custom_call.1
= control target key start
LH: loop header
LB: loop body
LE: loop exit
PB: predicated region body
PF: predicated region fallthrough
CT: control target
= control target key end

     0   :  { %s4465_s0 = inlined_call_operand.hbm [shape: f32[4,8,256], index: 0, kind: input, shape index: {}]   ;;  %s4466_s1 = inlined_call_operand.hbm [shape: bf16[4,8,768], index: 1, kind: input, shape index: {}]   ;;  %s4467_s2 = inlined_call_operand.hbm [shape: bf16[256,256], index: 2, kind: input, shape index: {}]   ;;  %s4468_s3 = inlined_call_operand.hbm [shape: f32[1,256], index: 3, kind: input, shape index: {}]   ;;  %s4469_s4 = inlined_call_operand.hbm [shape: bf16[768,512], index: 4, kind: input, shape index: {}]   ;;  %s4470_s5 = inlined_call_operand.vmem [shape: f32[1,512], index: 5, kind: input, shape index: {}]   ;;  %s4471_s6 = inlined_call_operand.hbm [shape: f32[4,8,256], index: 6, kind: output, shape index: {}]  }
   0x1   :  { %4478 = sst [smem:[#allocation22_spill]] %s4465_s0 }
   0x2   :  { %4479 = sst [smem:[#allocation23_spill]] %s4467_s2 }
   0x3   :  { %4480 = sst [smem:[#allocation24_spill]] %s4468_s3 }
   0x4   :  { %4481 = sst [smem:[#allocation25_spill]] %s4469_s4 }
   0x5   :  { %11 = vsyncpa [#allocation4], 0 }
   0x6   :  { %13 = vsyncpa [#allocation4 + $0x1], 0 }
   0x7   :  { %14 = vsyncpa [#allocation7], 0 }
   0x8   :  { %16 = vsyncpa [#allocation7 + $0x1], 0 }
   0x9   :  { %17 = vsyncpa [#allocation10], 0 }
   0xa   :  { %18 = vsyncpa [#allocation5], 0 }
   0xb   :  { %20 = vsyncpa [#allocation5 + $0x1], 0  ;;  %s4143_s21 = smov 0   ;;  %s4145_s22 = smov 0  }
   0xc   :  { %s4147_s23 = smov 0   ;;  %s4149_s24 = smov 0  }
   0xd   :  { %s4151_s25 = smov 0   ;;  %s4153_s26 = smov 0  }
   0xe LB: > { %4482 = sst [smem:[#allocation18_spill]] %s4083_s23  ;;  %s4174_s27 = sadd.s32 4294967295, %s4095_s26   ;;  %s4095_s26 = sphi %s4153_s26, %s26_s26   ;;  %s4091_s25 = sphi %s4151_s25, %s4506_s25   ;;  %s4087_s24 = sphi %s4149_s24, %s4505_s24   ;;  %s4083_s23 = sphi %s4147_s23, %s4501_s23   ;;  %s4079_s22 = sphi %s4145_s22, %s4504_s22   ;;  %s4075_s21 = sphi %s4143_s21, %s4503_s21  }
   0xf   : > { %4483 = sst [smem:[#allocation19_spill]] %s4095_s26  ;;  %s2551_s28 = sadd.s32 4294967294, %s4095_s26  }
  0x10   : > { %p60_p0 = scmp.ne.s32.totalorder %s4079_s22, %s4075_s21  ;;  %p61_p1 = scmp.eq.s32.totalorder %s4174_s27, 0 }
  0x11   : > { %p196_p2 = scmp.eq.s32.totalorder %s4174_s27, 1  ;;  %p202_p3 = scmp.eq.s32.totalorder %s2551_s28, 1 }
  0x12   : > { %p4183_p4 = por %p61_p1, %p60_p0  ;;  %p2552_p5 = scmp.ge.s32.totalorder %s4095_s26, 1 }
  0x13   : > { %p4188_p6 = por %p202_p3, %p60_p0  ;;  %p209_p7 = scmp.lt.s32.totalorder %s4095_s26, 3 }
  0x14   : > { %s4486_s2 = sld [smem:[#allocation23_spill]]  ;;  %s4097_s11 = smov [#allocation8]  }
  0x15   : > { %p4196_p8 = pnand %p2552_p5, %p209_p7  ;;  %s222_s12 = sshll.u32 %s4097_s11, 4  ;;  %s223_s12 = int_to_ptr.vmem [resolvable:$true] %s222_s12 }
  0x16   : > { %p2556_p11 = scmp.ge.s32.totalorder %s4095_s26, 2  ;;  %s4489_s3 = sld [smem:[#allocation24_spill]] }
  0x17   : > { %p3755_p9 = pneg %p4196_p8  ;;  %s4098_s17 = smov 128  }
  0x18   : > { %s4099_s18 = smov 8   ;;  %s4100_s19 = smov [#allocation9]  }
  0x19   : > { %p4204_p10 = pnand %p3755_p9, %p61_p1  ;;  %s237_s20 = sshll.u32 %s4100_s19, 4  ;;  %s238_s20 = int_to_ptr.vmem [resolvable:$true] %s237_s20 }
  0x1a   : > { %s220_s9 = sshll.u32 %s4486_s2, 4  ;;  %s4490_s4 = sld [smem:[#allocation25_spill]]  ;;  %s221_s9 = int_to_ptr.hbm [resolvable:$true] %s220_s9 }
  0x1b   : > { %3758 = dma.hbm_to_vmem [thread:$0]  (!%p4204_p10), %s221_s9, 4096, %s223_s12, [#allocation7], %s4098_s17, %s4098_s17, %s4099_s18  }
  0x1c   : > { %s235_s16 = sshll.u32 %s4489_s3, 4  ;;  %s4101_s11 = smov [#allocation11]   ;;  %s236_s16 = int_to_ptr.hbm [resolvable:$true] %s235_s16 }
  0x1d   : > { %3761 = dma.hbm_to_vmem [thread:$0]  (!%p4204_p10), %s236_s16, 32, %s238_s20, [#allocation10]  }
  0x1e   : > { %s248_s14 = sshll.u32 %s4101_s11, 4  ;;  %s4472_s15 = smov 256   ;;  %s249_s14 = int_to_ptr.vmem [resolvable:$true] %s248_s14 }
  0x1f   : > { %s4473_s9 = smov 16   ;;  %s47_s12 = sadd.s32 1, %s4083_s23 }
  0x20   : > { %s246_s8 = sshll.u32 %s4490_s4, 4  ;;  %s38_s17 = sadd.s32 1, %s4091_s25  ;;  %s247_s8 = int_to_ptr.hbm [resolvable:$true] %s246_s8 }
  0x21   : > { %3764 = dma.hbm_to_vmem [thread:$0]  (!%p4204_p10), %s247_s8, 24576, %s249_s14, [#allocation10], %s4472_s15, %s4472_s15, %s4473_s9  }
  0x22   : > { %p54_p12 = scmp.ne.s32.totalorder %s4083_s23, %s4079_s22  ;;  %p40_p13 = scmp.ge.s32.totalorder %s38_s17, 2 }
  0x23   : > { %p55_p0 = scmp.eq.s32.totalorder %s4095_s26, 0  ;;  %p3779_p5 = scmp.lt.s32.totalorder %s4095_s26, 2 }
  0x24   : > { %p4231_p3 = por %p196_p2, %p54_p12  ;;  %s4508_s17 = smov (%p40_p13, %s38_s17), 0 }
  0x25   : > { %4492 = sst [smem:[#allocation20_spill]] %s4508_s17  ;;  %p4238_p7 = por %p55_p0, %p54_p12 }
  0x26   : > { %s265_s18 = sand.u32 1, %s4083_s23   ;;  %s42_s19 = ssub.s32 %s4091_s25, %s4508_s17 }
  0x27   : > { %p45_p9 = scmp.eq.s32.totalorder %s42_s19, 0  ;;  %s2557_s20 = sshll.u32 %s265_s18, 5 }
  0x28   : > { %s3501_s28 = sshll.u32 %s4091_s25, 5  ;;  %s4495_s0 = sld [smem:[#allocation22_spill]] }
  0x29   : > { %s4247_s7 = scalar_select %p45_p9, %s4083_s23, %s47_s12  }
  0x2a   : > { %s269_s15 = scalar_lea.vmem [#allocation3], %s2557_s20  ;;  %p4256_p2 = pnand %p3779_p5, %p4238_p7 }
  0x2b   : > { %4494 = sst [smem:[#allocation21_spill]] %s4247_s7  ;;  %s280_s9 = sshll.u32 %s269_s15, 4  ;;  %s281_s9 = int_to_ptr.vmem [resolvable:$true] %s280_s9 }
  0x2c   : > { %s290_s19 = sand.u32 1, %s4095_s26   ;;  %s3734_s12 = smul.u32 48, %s265_s18 }
  0x2d   : > { %s266_s4 = scalar_lea.sflag [#allocation4], %s265_s18  ;;  %s4497_s17 = smov 16  }
  0x2e   : > { %s277_s14 = scalar_lea.hbm %s4495_s0, %s3501_s28  ;;  %s4498_s8 = smov 256  }
  0x2f   : > { %s278_s2 = sshll.u32 %s277_s14, 4  ;;  %s3735_s15 = smul.u32 48, %s4091_s25  ;;  %s279_s2 = int_to_ptr.hbm [resolvable:$true] %s278_s2 }
  0x30   : > { %3768 = dma.hbm_to_vmem [thread:$0]  (!%p4256_p2), %s279_s2, 512, %s281_s9, %s266_s4, %s4498_s8, %s4498_s8, %s4497_s17  }
  0x31   : > { %s294_s20 = scalar_lea.vmem [#allocation6], %s3734_s12  ;;  %s300_s14 = scalar_lea.hbm %s4466_s1, %s3735_s15 }
  0x32   : > { %s303_s28 = sshll.u32 %s294_s20, 4  ;;  %s301_s0 = sshll.u32 %s300_s14, 4  ;;  %s304_s28 = int_to_ptr.vmem [resolvable:$true] %s303_s28  ;;  %s302_s0 = int_to_ptr.hbm [resolvable:$true] %s301_s0 }
  0x33   : > { %s291_s7 = scalar_lea.sflag [#allocation7], %s290_s19  ;;  %s4104_s23 = smov 384  }
  0x34   : > { %s4105_s26 = smov 24   ;;  %315 = sbr.rel (%p4196_p8) target bundleno = 855 (0x357), region = 44 }
  0x35   : > { %3771 = dma.hbm_to_vmem [thread:$0]  (!%p4256_p2), %s302_s0, 768, %s304_s28, %s291_s7, %s4104_s23, %s4104_s23, %s4105_s26  }
  0x36   : > { %s4275_s2 = sand.u32 (!%p4196_p8), 1, %s4079_s22  }
  0x37   : > { %s2565_s4 = sshll.u32 (!%p4196_p8), %s4275_s2, 5  ;;  %s318_s9 = scalar_lea.sflag (!%p4196_p8), [#allocation4], %s4275_s2 }
  0x38   : > { %s4281_s17 = scalar_lea.vmem (!%p4196_p8), [#allocation3], %s2565_s4 }
  0x39   : > { %4054 = dma.done.wait (%p4183_p4), %s318_s9, 512  }
  0x3a   : > { %4056 = vsyncadd (%p4183_p4), %s318_s9, 4294966784  ;;  %s327_s0 = sand.u32 1, %s4174_s27   ;;  %s3736_s3 = smul.u32 48, %s4275_s2 }
  0x3b   : > { %s328_s23 = scalar_lea.sflag [#allocation7], %s327_s0 }
  0x3c   : > { %s4289_s26 = scalar_lea.vmem [#allocation6], %s3736_s3 }
  0x3d   : > { %4058 = dma.done.wait (%p4183_p4), %s328_s23, 768  }
  0x3e   : > { %4060 = vsyncadd (%p4183_p4), %s328_s23, 4294966528 }
  0x3f   : > { %4062 = dma.done.wait (%p61_p1), [#allocation7], 4096  }
  0x40   : > { %4064 = vsyncadd (%p61_p1), [#allocation7], 4294963200 }
  0x41   : > { %4066 = dma.done.wait (%p61_p1), [#allocation10], 24608  }
  0x42   : > { %4068 = vsyncadd (%p61_p1), [#allocation10], 4294942688  ;;  %v2708_v0 = vld [vmem:[#allocation11 + $0xe0] sm:$0xf]  ;;  %v3538_v1 = vld [vmem:[#allocation11 + $0xec] sm:$0xf0] }
  0x43   : > { %v2836_v2 = vld [vmem:[#allocation11 + $0x1e0] sm:$0xf]  ;;  %v2709_v3 = vor.u32 %v3538_v1, %v2708_v0  ;;  %v3570_v4 = vld [vmem:[#allocation11 + $0x1ec] sm:$0xf0]  ;;  %vm2306_vm0 = vcmask 1043456   ;;  %vm2277_vm1 = vcmask 64512  }
  0x44   : > { %v2964_v5 = vld [vmem:[#allocation11 + $0x2e0] sm:$0xf]  ;;  %v3602_v6 = vld [vmem:[#allocation11 + $0x2ec] sm:$0xf0]  ;;  %v2837_v7 = vor.u32 %v3570_v4, %v2836_v2  ;;  %s3733_s10 = sshll.u32 %s4087_s24, 5  ;;  %s380_s12 = scalar_lea.vmem [#allocation12], %s2565_s4 }
  0x45   : > { %v2965_v8 = vor.u32 %v3602_v6, %v2964_v5  ;;  %v3092_v9 = vld [vmem:[#allocation11 + $0x3e0] sm:$0xf]  ;;  %v3634_v10 = vld [vmem:[#allocation11 + $0x3ec] sm:$0xf0]  ;;  %1587 = vmatpush.bf16.msra.mxu0 %v2709_v3  ;;  %s2408_s19 = scalar_lea.hbm %s4471_s6, %s3733_s10  ;;  %s2409_s8 = sshll.u32 %s380_s12, 4  ;;  %s4426_s8 = int_to_ptr.vmem [resolvable:$true] %s2409_s8 }
  0x46   : > { %v2692_v11 = vld [vmem:[#allocation11 + $0xc0] sm:$0xf]  ;;  %v3093_v12 = vor.u32 %v3634_v10, %v3092_v9  ;;  %v3534_v13 = vld [vmem:[#allocation11 + $0xcc] sm:$0xf0]  ;;  %1601 = vmatpush.bf16.msra.mxu1 %v2837_v7  ;;  %s2411_s15 = sshll.u32 %s2408_s19, 4  ;;  %s2394_s24 = scalar_lea.sflag [#allocation5], %s4275_s2  ;;  %s2412_s15 = int_to_ptr.hbm [resolvable:$true] %s2411_s15 }
  0x47   : > { %v2820_v14 = vld [vmem:[#allocation11 + $0x1c0] sm:$0xf]  ;;  %v3566_v15 = vld [vmem:[#allocation11 + $0x1cc] sm:$0xf0]  ;;  %1615 = vmatpush.bf16.msra.mxu2 %v2965_v8  ;;  %v2693_v16 = vor.u32 %v3534_v13, %v2692_v11  ;;  %s4015_s20 = sshra.s32 %s2412_s15, 4  ;;  %s4021_s14 = scalar_lea.hbm %s4471_s6, 64  ;;  %s4016_s20 = int_to_ptr.hbm [resolvable:$true] %s4015_s20 }
  0x48   : > { %v2821_v17 = vor.u32 %v3566_v15, %v2820_v14  ;;  %v2948_v18 = vld [vmem:[#allocation11 + $0x2c0] sm:$0xf]  ;;  %v3598_v19 = vld [vmem:[#allocation11 + $0x2cc] sm:$0xf0]  ;;  %1629 = vmatpush.bf16.msra.mxu3 %v3093_v12  ;;  %s4017_s28 = scalar_lea.hbm %s4016_s20, 32  ;;  %p4022_p10 = scmp.lt.s32.totalorder %s4016_s20, %s4471_s6 }
  0x49   : > { %v3076_v20 = vld [vmem:[#allocation11 + $0x3c0] sm:$0xf]  ;;  %v2949_v21 = vor.u32 %v3598_v19, %v2948_v18  ;;  %v3630_v22 = vld [vmem:[#allocation11 + $0x3cc] sm:$0xf0]  ;;  %1588 = vmatpush.bf16.msra.mxu0 %v2693_v16  ;;  %p4018_p1 = scmp.ne.s32.totalorder %s4016_s20, %s4017_s28  ;;  %p4023_p12 = scmp.lt.s32.totalorder %s4021_s14, %s4017_s28 }
  0x4a   : > { %v2676_v23 = vld [vmem:[#allocation11 + $0xa0] sm:$0xf]  ;;  %v3530_v24 = vld [vmem:[#allocation11 + $0xac] sm:$0xf0]  ;;  %v3077_v25 = vor.u32 %v3630_v22, %v3076_v20  ;;  %1602 = vmatpush.bf16.msra.mxu1 %v2821_v17 }
  0x4b   : > { %v2804_v26 = vld [vmem:[#allocation11 + $0x1a0] sm:$0xf]  ;;  %v3562_v27 = vld [vmem:[#allocation11 + $0x1ac] sm:$0xf0]  ;;  %v2677_v29 = vor.u32 %v3530_v24, %v2676_v23  ;;  %1616 = vmatpush.bf16.msra.mxu2 %v2949_v21  ;;  %p4019_p4 = pnand %p4018_p1, %p4231_p3  ;;  %p4024_p13 = por %p4023_p12, %p4022_p10 }
  0x4c   : > { %v2932_v28 = vld [vmem:[#allocation11 + $0x2a0] sm:$0xf]  ;;  %v3594_v30 = vld [vmem:[#allocation11 + $0x2ac] sm:$0xf0]  ;;  %v2805_v33 = vor.u32 %v3562_v27, %v2804_v26  ;;  %1630 = vmatpush.bf16.msra.mxu3 %v3077_v25 }
  0x4d   : > { %v3060_v31 = vld [vmem:[#allocation11 + $0x3a0] sm:$0xf]  ;;  %v3626_v32 = vld [vmem:[#allocation11 + $0x3ac] sm:$0xf0]  ;;  %v2933_v34 = vor.u32 %v3594_v30, %v2932_v28  ;;  %1589 = vmatpush.bf16.msra.mxu0 %v2677_v29  ;;  %p4020_p8 = pneg %p4019_p4 }
  0x4e   : > { %v2660_v35 = vld [vmem:[#allocation11 + $0x80] sm:$0xf]  ;;  %v3526_v36 = vld [vmem:[#allocation11 + $0x8c] sm:$0xf0]  ;;  %v3061_v38 = vor.u32 %v3626_v32, %v3060_v31  ;;  %1603 = vmatpush.bf16.msra.mxu1 %v2805_v33  ;;  %v3536_v33 = vld [vmem:[#allocation11 + $0xe4] sm:$0xf] }
  0x4f   : > { %v2788_v37 = vld [vmem:[#allocation11 + $0x180] sm:$0xf]  ;;  %v3558_v39 = vld [vmem:[#allocation11 + $0x18c] sm:$0xf0]  ;;  %v2661_v44 = vor.u32 %v3526_v36, %v2660_v35  ;;  %1617 = vmatpush.bf16.msra.mxu2 %v2933_v34  ;;  %v2710_v34 = vld [vmem:[#allocation11 + $0xf0] sm:$0xf0]  ;;  %p4025_p0 = pnand %p4024_p13, %p4020_p8 }
  0x50   : > { %v2916_v40 = vld [vmem:[#allocation11 + $0x280] sm:$0xf]  ;;  %v3590_v41 = vld [vmem:[#allocation11 + $0x28c] sm:$0xf0]  ;;  %v2789_v45 = vor.u32 %v3558_v39, %v2788_v37  ;;  %1631 = vmatpush.bf16.msra.mxu3 %v3061_v38  ;;  %v3568_v37 = vld [vmem:[#allocation11 + $0x1e4] sm:$0xf] }
  0x51   : > { %v3044_v42 = vld [vmem:[#allocation11 + $0x380] sm:$0xf]  ;;  %v3622_v43 = vld [vmem:[#allocation11 + $0x38c] sm:$0xf0]  ;;  %v2917_v46 = vor.u32 %v3590_v41, %v2916_v40  ;;  %1590 = vmatpush.bf16.msra.mxu0 %v2661_v44  ;;  %v2838_v38 = vld [vmem:[#allocation11 + $0x1f0] sm:$0xf0] }
  0x52   : > { %v2644_v47 = vld [vmem:[#allocation11 + $0x60] sm:$0xf]  ;;  %v3522_v48 = vld [vmem:[#allocation11 + $0x6c] sm:$0xf0]  ;;  %v3045_v50 = vor.u32 %v3622_v43, %v3044_v42  ;;  %1604 = vmatpush.bf16.msra.mxu1 %v2789_v45  ;;  %v2713_v43 = vor.u32 %v3536_v33, %v2710_v34  ;;  %v2646_v33 = vld [vmem:[#allocation11 + $0x70] sm:$0xf0] }
  0x53   : > { %v2772_v49 = vld [vmem:[#allocation11 + $0x160] sm:$0xf]  ;;  %v3554_v51 = vld [vmem:[#allocation11 + $0x16c] sm:$0xf0]  ;;  %v2645_v56 = vor.u32 %v3522_v48, %v2644_v47  ;;  %1618 = vmatpush.bf16.msra.mxu2 %v2917_v46  ;;  %v2841_v47 = vor.u32 %v3568_v37, %v2838_v38  ;;  %v3532_v48 = vld [vmem:[#allocation11 + $0xc4] sm:$0xf] }
  0x54   : > { %v2900_v52 = vld [vmem:[#allocation11 + $0x260] sm:$0xf]  ;;  %v3586_v53 = vld [vmem:[#allocation11 + $0x26c] sm:$0xf0]  ;;  %v2773_v57 = vor.u32 %v3554_v51, %v2772_v49  ;;  %1632 = vmatpush.bf16.msra.mxu3 %v3045_v50  ;;  %v2694_v49 = vld [vmem:[#allocation11 + $0xd0] sm:$0xf0] }
  0x55   : > { %v3028_v54 = vld [vmem:[#allocation11 + $0x360] sm:$0xf]  ;;  %v3618_v55 = vld [vmem:[#allocation11 + $0x36c] sm:$0xf0]  ;;  %v2901_v58 = vor.u32 %v3586_v53, %v2900_v52  ;;  %1591 = vmatpush.bf16.msra.mxu0 %v2645_v56  ;;  %v3564_v50 = vld [vmem:[#allocation11 + $0x1c4] sm:$0xf] }
  0x56   : > { %v2628_v59 = vld [vmem:[#allocation11 + $0x40] sm:$0xf]  ;;  %v3518_v60 = vld [vmem:[#allocation11 + $0x4c] sm:$0xf0]  ;;  %v3029_v62 = vor.u32 %v3618_v55, %v3028_v54  ;;  %1605 = vmatpush.bf16.msra.mxu1 %v2773_v57  ;;  %v2822_v51 = vld [vmem:[#allocation11 + $0x1d0] sm:$0xf0] }
  0x57   : > { %v2756_v61 = vld [vmem:[#allocation11 + $0x140] sm:$0xf]  ;;  %v3550_v63 = vld [vmem:[#allocation11 + $0x14c] sm:$0xf0]  ;;  %v2629_v4 = vor.u32 %v3518_v60, %v2628_v59  ;;  %1619 = vmatpush.bf16.msra.mxu2 %v2901_v58  ;;  %v3505_v53 = vld [vmem:[%s4289_s26 + $0x14] sm:$0xf0]  ;;  %v2697_v59 = vor.u32 %v3532_v48, %v2694_v49 }
  0x58   : > { %v2884_v0 = vld [vmem:[#allocation11 + $0x240] sm:$0xf]  ;;  %v3582_v1 = vld [vmem:[#allocation11 + $0x24c] sm:$0xf0]  ;;  %v2757_v5 = vor.u32 %v3550_v63, %v2756_v61  ;;  %1633 = vmatpush.bf16.msra.mxu3 %v3029_v62  ;;  %v3528_v62 = vld [vmem:[#allocation11 + $0xa4] sm:$0xf]  ;;  %v2825_v63 = vor.u32 %v3564_v50, %v2822_v51 }
  0x59   : > { %v3012_v2 = vld [vmem:[#allocation11 + $0x340] sm:$0xf]  ;;  %v3614_v3 = vld [vmem:[#allocation11 + $0x34c] sm:$0xf0]  ;;  %v2885_v6 = vor.u32 %v3582_v1, %v2884_v0  ;;  %1592 = vmatpush.bf16.msra.mxu0 %v2629_v4  ;;  %v2678_v0 = vld [vmem:[#allocation11 + $0xb0] sm:$0xf0] }
  0x5a   : > { %v2612_v7 = vld [vmem:[#allocation11 + $0x20] sm:$0xf]  ;;  %v3514_v8 = vld [vmem:[#allocation11 + $0x2c] sm:$0xf0]  ;;  %v3013_v10 = vor.u32 %v3614_v3, %v3012_v2  ;;  %1606 = vmatpush.bf16.msra.mxu1 %v2757_v5  ;;  %v2574_v2 = vld [vmem:[%s4289_s26 + $0x18] sm:$0xf0] }
  0x5b   : > { %v2740_v9 = vld [vmem:[#allocation11 + $0x120] sm:$0xf]  ;;  %v3546_v11 = vld [vmem:[#allocation11 + $0x12c] sm:$0xf0]  ;;  %v2613_v16 = vor.u32 %v3514_v8, %v2612_v7  ;;  %1620 = vmatpush.bf16.msra.mxu2 %v2885_v6  ;;  %v3560_v3 = vld [vmem:[#allocation11 + $0x1a4] sm:$0xf] }
  0x5c   : > { %v2868_v12 = vld [vmem:[#allocation11 + $0x220] sm:$0xf]  ;;  %v3578_v13 = vld [vmem:[#allocation11 + $0x22c] sm:$0xf0]  ;;  %v2741_v19 = vor.u32 %v3546_v11, %v2740_v9  ;;  %1634 = vmatpush.bf16.msra.mxu3 %v3013_v10  ;;  %v2806_v4 = vld [vmem:[#allocation11 + $0x1b0] sm:$0xf0] }
  0x5d   : > { %v2996_v14 = vld [vmem:[#allocation11 + $0x320] sm:$0xf]  ;;  %v3610_v15 = vld [vmem:[#allocation11 + $0x32c] sm:$0xf0]  ;;  %v2869_v20 = vor.u32 %v3578_v13, %v2868_v12  ;;  %1593 = vmatpush.bf16.msra.mxu0 %v2613_v16  ;;  %v2681_v12 = vor.u32 %v3528_v62, %v2678_v0  ;;  %v3524_v13 = vld [vmem:[#allocation11 + $0x84] sm:$0xf]  ;;  %v2809_v16 = vor.u32 %v3560_v3, %v2806_v4 }
  0x5e   : > { %v2596_v17 = vld [vmem:[#allocation11] sm:$0xf]  ;;  %v3510_v18 = vld [vmem:[#allocation11 + $0xc] sm:$0xf0]  ;;  %v2997_v24 = vor.u32 %v3610_v15, %v2996_v14  ;;  %1607 = vmatpush.bf16.msra.mxu1 %v2741_v19  ;;  %v2662_v14 = vld [vmem:[#allocation11 + $0x90] sm:$0xf0] }
  0x5f   : > { %v2724_v21 = vld [vmem:[#allocation11 + $0x100] sm:$0xf]  ;;  %v3542_v22 = vld [vmem:[#allocation11 + $0x10c] sm:$0xf0]  ;;  %v2597_v31 = vor.u32 %v3510_v18, %v2596_v17  ;;  %1621 = vmatpush.bf16.msra.mxu2 %v2869_v20  ;;  %v2580_v15 = vld [vmem:[%s4289_s26 + $0x8] sm:$0xf] }
  0x60   : > { %v2852_v23 = vld [vmem:[#allocation11 + $0x200] sm:$0xf]  ;;  %v3574_v25 = vld [vmem:[#allocation11 + $0x20c] sm:$0xf0]  ;;  %v2725_v35 = vor.u32 %v3542_v22, %v2724_v21  ;;  %1635 = vmatpush.bf16.msra.mxu3 %v2997_v24  ;;  %v3503_v18 = vld [vmem:[%s4289_s26 + $0xc] sm:$0xf] }
  0x61   : > { %v2980_v26 = vld [vmem:[#allocation11 + $0x300] sm:$0xf]  ;;  %v3606_v27 = vld [vmem:[#allocation11 + $0x30c] sm:$0xf0]  ;;  %v2853_v36 = vor.u32 %v3574_v25, %v2852_v23  ;;  %1594 = vmatpush.bf16.msra.mxu0 %v2597_v31  ;;  %v3556_v20 = vld [vmem:[#allocation11 + $0x184] sm:$0xf] }
  0x62   : > { %v3220_v28 = vld [vmem:[#allocation11 + $0x4e0] sm:$0xf]  ;;  %v3666_v29 = vld [vmem:[#allocation11 + $0x4ec] sm:$0xf0]  ;;  %v2981_v39 = vor.u32 %v3606_v27, %v2980_v26  ;;  %1608 = vmatpush.bf16.msra.mxu1 %v2725_v35  ;;  %v2790_v21 = vld [vmem:[#allocation11 + $0x190] sm:$0xf0]  ;;  %v2665_v26 = vor.u32 %v3524_v13, %v2662_v14 }
  0x63   : > { %v3348_v30 = vld [vmem:[#allocation11 + $0x5e0] sm:$0xf]  ;;  %v3698_v32 = vld [vmem:[#allocation11 + $0x5ec] sm:$0xf0]  ;;  %v3221_v40 = vor.u32 %v3666_v29, %v3220_v28  ;;  %1622 = vmatpush.bf16.msra.mxu2 %v2853_v36  ;;  %v3552_v34 = vld [vmem:[#allocation11 + $0x164] sm:$0xf] }
  0x64   : > { %v3204_v41 = vld [vmem:[#allocation11 + $0x4c0] sm:$0xf]  ;;  %v3349_v42 = vor.u32 %v3698_v32, %v3348_v30  ;;  %v3662_v44 = vld [vmem:[#allocation11 + $0x4cc] sm:$0xf0]  ;;  %1636 = vmatpush.bf16.msra.mxu3 %v2981_v39  ;;  %v2793_v30 = vor.u32 %v3556_v20, %v2790_v21  ;;  %v3520_v32 = vld [vmem:[#allocation11 + $0x64] sm:$0xf] }
  0x65   : > { %v3332_v45 = vld [vmem:[#allocation11 + $0x5c0] sm:$0xf]  ;;  %v3694_v46 = vld [vmem:[#allocation11 + $0x5cc] sm:$0xf0]  ;;  %1643 = vmatpush.bf16.msrb.mxu0 %v3221_v40  ;;  %v3205_v54 = vor.u32 %v3662_v44, %v3204_v41  ;;  %v2774_v35 = vld [vmem:[#allocation11 + $0x170] sm:$0xf0]  ;;  %v2649_v38 = vor.u32 %v3520_v32, %v2646_v33 }
  0x66   : > { %v2572_v52 = vld [vmem:[%s4289_s26] sm:$0xf]  ;;  %1657 = vmatpush.bf16.msrb.mxu1 %v3349_v42  ;;  %v3333_v58 = vor.u32 %v3694_v46, %v3332_v45  ;;  %v3502_v1 = vld [vmem:[%s4289_s26 + $0x4] sm:$0xf]  ;;  %v2777_v42 = vor.u32 %v3552_v34, %v2774_v35  ;;  %v2588_v21 = vld [vmem:[%s4289_s26 + $0x10] sm:$0xf] }
  0x67   : > { %v3188_v55 = vld [vmem:[#allocation11 + $0x4a0] sm:$0xf]  ;;  %v3658_v56 = vld [vmem:[#allocation11 + $0x4ac] sm:$0xf0]  ;;  %v4305_v57 = vor.u32 %v3505_v53, %v2572_v52  ;;  %1671 = vmatpush.bf16.msrb.mxu2 %v2713_v43  ;;  %v4310_v6 = vor.u32 %v3502_v1, %v2574_v2  ;;  %v3516_v44 = vld [vmem:[#allocation11 + $0x44] sm:$0xf] }
  0x68   : > { %v3316_v60 = vld [vmem:[#allocation11 + $0x5a0] sm:$0xf]  ;;  %v3690_v61 = vld [vmem:[#allocation11 + $0x5ac] sm:$0xf0]  ;;  %1685 = vmatpush.bf16.msrb.mxu3 %v2841_v47  ;;  %v3189_v7 = vor.u32 %v3658_v56, %v3188_v55  ;;  %v2630_v45 = vld [vmem:[#allocation11 + $0x50] sm:$0xf0] }
  0x69   : > { %1595 = vmatmul.bf16.vlgmr.msra.gmra.mxu0 %v4305_v57  ;;  %v3172_v5 = vld [vmem:[#allocation11 + $0x480] sm:$0xf]  ;;  %v3654_v8 = vld [vmem:[#allocation11 + $0x48c] sm:$0xf0]  ;;  %v3317_v11 = vor.u32 %v3690_v61, %v3316_v60  ;;  %1609 = vmatmul.bf16.vlgmr.msra.gmra.mxu1 %v4310_v6  ;;  %v3548_v46 = vld [vmem:[#allocation11 + $0x144] sm:$0xf]  ;;  %v2633_v50 = vor.u32 %v3516_v44, %v2630_v45 }
  0x6a   : > { %1644 = vmatpush.bf16.msrb.mxu0 %v3205_v54  ;;  %v3300_v9 = vld [vmem:[#allocation11 + $0x580] sm:$0xf]  ;;  %v3686_v10 = vld [vmem:[#allocation11 + $0x58c] sm:$0xf0]  ;;  %1658 = vmatpush.bf16.msrb.mxu1 %v3333_v58  ;;  %v3173_v24 = vor.u32 %v3654_v8, %v3172_v5  ;;  %v2758_v47 = vld [vmem:[#allocation11 + $0x150] sm:$0xf0] }
  0x6b   : > { %1672 = vmatpush.bf16.msrb.mxu2 %v2697_v59  ;;  %v3506_v17 = vld [vmem:[%s4289_s26 + $0x1c] sm:$0xf0]  ;;  %v2582_v19 = vld [vmem:[%s4289_s26 + $0x20] sm:$0xf0]  ;;  %v3301_v25 = vor.u32 %v3686_v10, %v3300_v9  ;;  %v2761_v54 = vor.u32 %v3548_v46, %v2758_v47 }
  0x6c   : > { %1686 = vmatpush.bf16.msrb.mxu3 %v2825_v63  ;;  %v4317_v22 = vor.u32 %v3506_v17, %v2580_v15  ;;  %v4319_v23 = vor.u32 %v3503_v18, %v2582_v19  ;;  %v3156_v27 = vld [vmem:[#allocation11 + $0x460] sm:$0xf]  ;;  %v3650_v28 = vld [vmem:[#allocation11 + $0x46c] sm:$0xf0]  ;;  %v3512_v56 = vld [vmem:[#allocation11 + $0x24] sm:$0xf] }
  0x6d   : > { %v3284_v29 = vld [vmem:[#allocation11 + $0x560] sm:$0xf]  ;;  %v3682_v31 = vld [vmem:[#allocation11 + $0x56c] sm:$0xf0]  ;;  %v3157_v36 = vor.u32 %v3650_v28, %v3156_v27  ;;  %v2614_v58 = vld [vmem:[#allocation11 + $0x30] sm:$0xf0] }
  0x6e   : > { %1645 = vmatpush.bf16.msrb.mxu0 %v3189_v7  ;;  %1659 = vmatpush.bf16.msrb.mxu1 %v3317_v11  ;;  %v3285_v37 = vor.u32 %v3682_v31, %v3284_v29  ;;  %v3140_v39 = vld [vmem:[#allocation11 + $0x440] sm:$0xf]  ;;  %v3646_v40 = vld [vmem:[#allocation11 + $0x44c] sm:$0xf0]  ;;  %v3544_v59 = vld [vmem:[#allocation11 + $0x124] sm:$0xf]  ;;  %v2617_v2 = vor.u32 %v3512_v56, %v2614_v58 }
  0x6f   : > { %1673 = vmatpush.bf16.msrb.mxu2 %v2681_v12  ;;  %1637 = vmatmul.bf16.vlgmr.msra.gmra.mxu3 %v4319_v23  ;;  %v3268_v41 = vld [vmem:[#allocation11 + $0x540] sm:$0xf]  ;;  %v3678_v43 = vld [vmem:[#allocation11 + $0x54c] sm:$0xf0]  ;;  %v3141_v48 = vor.u32 %v3646_v40, %v3140_v39  ;;  %v2742_v60 = vld [vmem:[#allocation11 + $0x130] sm:$0xf0] }
  0x70   : > { %1687 = vmatpush.bf16.msrb.mxu3 %v2809_v16  ;;  %1623 = vmatmul.bf16.vlgmr.msra.gmra.mxu2 %v4317_v22  ;;  %v3269_v49 = vor.u32 %v3678_v43, %v3268_v41  ;;  %v3124_v51 = vld [vmem:[#allocation11 + $0x420] sm:$0xf]  ;;  %v3642_v52 = vld [vmem:[#allocation11 + $0x42c] sm:$0xf0]  ;;  %v3508_v4 = vld [vmem:[#allocation11 + $0x4] sm:$0xf]  ;;  %v2745_v7 = vor.u32 %v3544_v59, %v2742_v60 }
  0x71   : > { %v3252_v53 = vld [vmem:[#allocation11 + $0x520] sm:$0xf]  ;;  %v3674_v55 = vld [vmem:[#allocation11 + $0x52c] sm:$0xf0]  ;;  %v3125_v61 = vor.u32 %v3642_v52, %v3124_v51  ;;  %v2598_v5 = vld [vmem:[#allocation11 + $0x10] sm:$0xf0] }
  0x72   : > { %1646 = vmatpush.bf16.msrb.mxu0 %v3173_v24  ;;  %1660 = vmatpush.bf16.msrb.mxu1 %v3301_v25  ;;  %v3108_v62 = vld [vmem:[#allocation11 + $0x400] sm:$0xf]  ;;  %v3638_v63 = vld [vmem:[#allocation11 + $0x40c] sm:$0xf0]  ;;  %v3253_v1 = vor.u32 %v3674_v55, %v3252_v53  ;;  %v3540_v8 = vld [vmem:[#allocation11 + $0x104] sm:$0xf]  ;;  %v2601_v19 = vor.u32 %v3508_v4, %v2598_v5 }
  0x73   : > { %1674 = vmatpush.bf16.msrb.mxu2 %v2665_v26  ;;  %v3236_v0 = vld [vmem:[#allocation11 + $0x500] sm:$0xf]  ;;  %v3670_v3 = vld [vmem:[#allocation11 + $0x50c] sm:$0xf0]  ;;  %v2726_v9 = vld [vmem:[#allocation11 + $0x110] sm:$0xf0]  ;;  %v3109_v14 = vor.u32 %v3638_v63, %v3108_v62 }
  0x74   : > { %1688 = vmatpush.bf16.msrb.mxu3 %v2793_v30  ;;  %v3600_v10 = vld [vmem:[#allocation11 + $0x2e4] sm:$0xf]  ;;  %v2966_v11 = vld [vmem:[#allocation11 + $0x2f0] sm:$0xf0]  ;;  %v3237_v18 = vor.u32 %v3670_v3, %v3236_v0  ;;  %v2729_v25 = vor.u32 %v3540_v8, %v2726_v9  ;;  %v2590_v28 = vld [vmem:[%s4289_s26 + $0x28] sm:$0xf0] }
  0x75   : > { %v3632_v12 = vld [vmem:[#allocation11 + $0x3e4] sm:$0xf]  ;;  %v3094_v13 = vld [vmem:[#allocation11 + $0x3f0] sm:$0xf0]  ;;  %v2969_v26 = vor.u32 %v3600_v10, %v2966_v11 }
  0x76   : > { %1647 = vmatpush.bf16.msrb.mxu0 %v3157_v36  ;;  %1661 = vmatpush.bf16.msrb.mxu1 %v3285_v37  ;;  %v3664_v15 = vld [vmem:[#allocation11 + $0x4e4] sm:$0xf]  ;;  %v3222_v16 = vld [vmem:[#allocation11 + $0x4f0] sm:$0xf0]  ;;  %v3097_v29 = vor.u32 %v3632_v12, %v3094_v13 }
  0x77   : > { %1675 = vmatpush.bf16.msrb.mxu2 %v2649_v38  ;;  %v3696_v17 = vld [vmem:[#allocation11 + $0x5e4] sm:$0xf]  ;;  %v3350_v20 = vld [vmem:[#allocation11 + $0x5f0] sm:$0xf0]  ;;  %v3225_v30 = vor.u32 %v3664_v15, %v3222_v16 }
  0x78   : > { %1689 = vmatpush.bf16.msrb.mxu3 %v2777_v42  ;;  %v3507_v24 = vld [vmem:[%s4289_s26 + $0x24] sm:$0xf0]  ;;  %v3504_v27 = vld [vmem:[%s4289_s26 + $0x14] sm:$0xf]  ;;  %v3353_v34 = vor.u32 %v3696_v17, %v3350_v20 }
  0x79   : > { %v3596_v31 = vld [vmem:[#allocation11 + $0x2c4] sm:$0xf]  ;;  %v2950_v32 = vld [vmem:[#allocation11 + $0x2d0] sm:$0xf0]  ;;  %v4327_v35 = vor.u32 %v3507_v24, %v2588_v21  ;;  %v4329_v39 = vor.u32 %v3504_v27, %v2590_v28 }
  0x7a   : > { %1648 = vmatpush.bf16.msrb.mxu0 %v3141_v48  ;;  %1662 = vmatpush.bf16.msrb.mxu1 %v3269_v49  ;;  %v3628_v33 = vld [vmem:[#allocation11 + $0x3c4] sm:$0xf]  ;;  %v3078_v36 = vld [vmem:[#allocation11 + $0x3d0] sm:$0xf0]  ;;  %v2953_v42 = vor.u32 %v3596_v31, %v2950_v32 }
  0x7b   : > { %1676 = vmatpush.bf16.msrb.mxu2 %v2633_v50  ;;  %v3660_v37 = vld [vmem:[#allocation11 + $0x4c4] sm:$0xf]  ;;  %v3206_v38 = vld [vmem:[#allocation11 + $0x4d0] sm:$0xf0]  ;;  %v3081_v43 = vor.u32 %v3628_v33, %v3078_v36 }
  0x7c   : > { %1690 = vmatpush.bf16.msrb.mxu3 %v2761_v54  ;;  %v3692_v40 = vld [vmem:[#allocation11 + $0x5c4] sm:$0xf]  ;;  %v3334_v41 = vld [vmem:[#allocation11 + $0x5d0] sm:$0xf0]  ;;  %v3209_v44 = vor.u32 %v3660_v37, %v3206_v38 }
  0x7d   : > { %v3592_v45 = vld [vmem:[#allocation11 + $0x2a4] sm:$0xf]  ;;  %v2934_v46 = vld [vmem:[#allocation11 + $0x2b0] sm:$0xf0]  ;;  %v3337_v48 = vor.u32 %v3692_v40, %v3334_v41 }
  0x7e   : > { %1649 = vmatpush.bf16.msrb.mxu0 %v3125_v61  ;;  %1663 = vmatpush.bf16.msrb.mxu1 %v3253_v1  ;;  %v3624_v47 = vld [vmem:[#allocation11 + $0x3a4] sm:$0xf]  ;;  %v3062_v49 = vld [vmem:[#allocation11 + $0x3b0] sm:$0xf0]  ;;  %v2937_v54 = vor.u32 %v3592_v45, %v2934_v46 }
  0x7f   : > { %1677 = vmatpush.bf16.msrb.mxu2 %v2617_v2  ;;  %v3656_v50 = vld [vmem:[#allocation11 + $0x4a4] sm:$0xf]  ;;  %v3190_v51 = vld [vmem:[#allocation11 + $0x4b0] sm:$0xf0]  ;;  %v3065_v55 = vor.u32 %v3624_v47, %v3062_v49 }
  0x80   : > { %1691 = vmatpush.bf16.msrb.mxu3 %v2745_v7  ;;  %v3688_v52 = vld [vmem:[#allocation11 + $0x5a4] sm:$0xf]  ;;  %v3318_v53 = vld [vmem:[#allocation11 + $0x5b0] sm:$0xf0]  ;;  %v3193_v56 = vor.u32 %v3656_v50, %v3190_v51 }
  0x81   : > { %v3588_v58 = vld [vmem:[#allocation11 + $0x284] sm:$0xf]  ;;  %v2918_v59 = vld [vmem:[#allocation11 + $0x290] sm:$0xf0]  ;;  %v3321_v61 = vor.u32 %v3688_v52, %v3318_v53 }
  0x82   : > { %1650 = vmatpush.bf16.msrb.mxu0 %v3109_v14  ;;  %1664 = vmatpush.bf16.msrb.mxu1 %v3237_v18  ;;  %v3620_v60 = vld [vmem:[#allocation11 + $0x384] sm:$0xf]  ;;  %v3046_v62 = vld [vmem:[#allocation11 + $0x390] sm:$0xf0]  ;;  %v2921_v3 = vor.u32 %v3588_v58, %v2918_v59  ;;  %v3539_v58 = vld [vmem:[#allocation11 + $0xf4] sm:$0xf0] }
  0x83   : > { %1678 = vmatpush.bf16.msrb.mxu2 %v2601_v19  ;;  %v3652_v63 = vld [vmem:[#allocation11 + $0x484] sm:$0xf]  ;;  %v3174_v0 = vld [vmem:[#allocation11 + $0x490] sm:$0xf0]  ;;  %v3049_v4 = vor.u32 %v3620_v60, %v3046_v62  ;;  %v2844_v59 = vld [vmem:[#allocation11 + $0x1e8] sm:$0xf] }
  0x84   : > { %1692 = vmatpush.bf16.msrb.mxu3 %v2729_v25  ;;  %v3684_v1 = vld [vmem:[#allocation11 + $0x584] sm:$0xf]  ;;  %v3302_v2 = vld [vmem:[#allocation11 + $0x590] sm:$0xf0]  ;;  %v3177_v5 = vor.u32 %v3652_v63, %v3174_v0  ;;  %v2972_v62 = vld [vmem:[#allocation11 + $0x2e8] sm:$0xf] }
  0x85   : > { %1651 = vmatmul.bf16.vlgmr.msrb.gmra.mxu0 %v4327_v35  ;;  %1665 = vmatmul.bf16.vlgmr.msrb.gmra.mxu1 %v4329_v39  ;;  %v3584_v7 = vld [vmem:[#allocation11 + $0x264] sm:$0xf]  ;;  %v2902_v8 = vld [vmem:[#allocation11 + $0x270] sm:$0xf0]  ;;  %v3305_v10 = vor.u32 %v3684_v1, %v3302_v2  ;;  %v3603_v63 = vld [vmem:[#allocation11 + $0x2f4] sm:$0xf0] }
  0x86   : > { %1699 = vmatpush.bf16.msra.mxu0 %v2969_v26  ;;  %1713 = vmatpush.bf16.msra.mxu1 %v3097_v29  ;;  %v3616_v9 = vld [vmem:[#allocation11 + $0x364] sm:$0xf]  ;;  %v3030_v11 = vld [vmem:[#allocation11 + $0x370] sm:$0xf0]  ;;  %v2905_v16 = vor.u32 %v3584_v7, %v2902_v8  ;;  %v3100_v2 = vld [vmem:[#allocation11 + $0x3e8] sm:$0xf]  ;;  %v2973_v8 = vor.u32 %v3603_v63, %v2972_v62 }
  0x87   : > { %1727 = vmatpush.bf16.msra.mxu2 %v3225_v30  ;;  %1693 = vmatmul.bf16.vlgmr.msrb.gmra.mxu3 %v4310_v6  ;;  %v3648_v12 = vld [vmem:[#allocation11 + $0x464] sm:$0xf]  ;;  %v3158_v13 = vld [vmem:[#allocation11 + $0x470] sm:$0xf0]  ;;  %v3033_v17 = vor.u32 %v3616_v9, %v3030_v11  ;;  %v2700_v9 = vld [vmem:[#allocation11 + $0xc8] sm:$0xf] }
  0x88   : > { %1741 = vmatpush.bf16.msra.mxu3 %v3353_v34  ;;  %1679 = vmatmul.bf16.vlgmr.msrb.gmra.mxu2 %v4305_v57  ;;  %v3680_v14 = vld [vmem:[#allocation11 + $0x564] sm:$0xf]  ;;  %v3286_v15 = vld [vmem:[#allocation11 + $0x570] sm:$0xf0]  ;;  %v3161_v18 = vor.u32 %v3648_v12, %v3158_v13  ;;  %v2828_v11 = vld [vmem:[#allocation11 + $0x1c8] sm:$0xf] }
  0x89   : > { %v3580_v19 = vld [vmem:[#allocation11 + $0x244] sm:$0xf]  ;;  %v2886_v20 = vld [vmem:[#allocation11 + $0x250] sm:$0xf0]  ;;  %v3289_v24 = vor.u32 %v3680_v14, %v3286_v15  ;;  %v3567_v13 = vld [vmem:[#allocation11 + $0x1d4] sm:$0xf0] }
  0x8a   : > { %1700 = vmatpush.bf16.msra.mxu0 %v2953_v42  ;;  %1714 = vmatpush.bf16.msra.mxu1 %v3081_v43  ;;  %v3612_v21 = vld [vmem:[#allocation11 + $0x344] sm:$0xf]  ;;  %v3014_v25 = vld [vmem:[#allocation11 + $0x350] sm:$0xf0]  ;;  %v2889_v30 = vor.u32 %v3580_v19, %v2886_v20  ;;  %v2956_v14 = vld [vmem:[#allocation11 + $0x2c8] sm:$0xf]  ;;  %v2829_v19 = vor.u32 %v3567_v13, %v2828_v11 }
  0x8b   : > { %1728 = vmatpush.bf16.msra.mxu2 %v3209_v44  ;;  %v3644_v26 = vld [vmem:[#allocation11 + $0x444] sm:$0xf]  ;;  %v3142_v27 = vld [vmem:[#allocation11 + $0x450] sm:$0xf0]  ;;  %v3017_v31 = vor.u32 %v3612_v21, %v3014_v25  ;;  %v3599_v15 = vld [vmem:[#allocation11 + $0x2d4] sm:$0xf0] }
  0x8c   : > { %1742 = vmatpush.bf16.msra.mxu3 %v3337_v48  ;;  %v3676_v28 = vld [vmem:[#allocation11 + $0x544] sm:$0xf]  ;;  %v3270_v29 = vld [vmem:[#allocation11 + $0x550] sm:$0xf0]  ;;  %v3145_v32 = vor.u32 %v3644_v26, %v3142_v27  ;;  %v2957_v20 = vor.u32 %v3599_v15, %v2956_v14  ;;  %v2684_v21 = vld [vmem:[#allocation11 + $0xa8] sm:$0xf] }
  0x8d   : > { %v3576_v33 = vld [vmem:[#allocation11 + $0x224] sm:$0xf]  ;;  %v2870_v34 = vld [vmem:[#allocation11 + $0x230] sm:$0xf0]  ;;  %v3273_v37 = vor.u32 %v3676_v28, %v3270_v29  ;;  %v2812_v25 = vld [vmem:[#allocation11 + $0x1a8] sm:$0xf] }
  0x8e   : > { %1701 = vmatpush.bf16.msra.mxu0 %v2937_v54  ;;  %1715 = vmatpush.bf16.msra.mxu1 %v3065_v55  ;;  %v3608_v36 = vld [vmem:[#allocation11 + $0x324] sm:$0xf]  ;;  %v2998_v38 = vld [vmem:[#allocation11 + $0x330] sm:$0xf0]  ;;  %v2873_v44 = vor.u32 %v3576_v33, %v2870_v34  ;;  %v3563_v27 = vld [vmem:[#allocation11 + $0x1b4] sm:$0xf0] }
  0x8f   : > { %1729 = vmatpush.bf16.msra.mxu2 %v3193_v56  ;;  %v3640_v40 = vld [vmem:[#allocation11 + $0x424] sm:$0xf]  ;;  %v3126_v41 = vld [vmem:[#allocation11 + $0x430] sm:$0xf0]  ;;  %v3001_v47 = vor.u32 %v3608_v36, %v2998_v38  ;;  %v2716_v56 = vld [vmem:[#allocation11 + $0xe8] sm:$0xf]  ;;  %v2813_v33 = vor.u32 %v3563_v27, %v2812_v25 }
  0x90   : > { %1743 = vmatpush.bf16.msra.mxu3 %v3321_v61  ;;  %v3672_v42 = vld [vmem:[#allocation11 + $0x524] sm:$0xf]  ;;  %v3254_v43 = vld [vmem:[#allocation11 + $0x530] sm:$0xf0]  ;;  %v3129_v48 = vor.u32 %v3640_v40, %v3126_v41  ;;  %v3571_v61 = vld [vmem:[#allocation11 + $0x1f4] sm:$0xf0] }
  0x91   : > { %v3572_v45 = vld [vmem:[#allocation11 + $0x204] sm:$0xf]  ;;  %v2854_v46 = vld [vmem:[#allocation11 + $0x210] sm:$0xf0]  ;;  %v3257_v52 = vor.u32 %v3672_v42, %v3254_v43  ;;  %v2845_v7 = vor.u32 %v3571_v61, %v2844_v59  ;;  %v2940_v28 = vld [vmem:[#allocation11 + $0x2a8] sm:$0xf] }
  0x92   : > { %1702 = vmatpush.bf16.msra.mxu0 %v2921_v3  ;;  %1716 = vmatpush.bf16.msra.mxu1 %v3049_v4  ;;  %v3604_v49 = vld [vmem:[#allocation11 + $0x304] sm:$0xf]  ;;  %v2982_v50 = vld [vmem:[#allocation11 + $0x310] sm:$0xf0]  ;;  %v2857_v60 = vor.u32 %v3572_v45, %v2854_v46  ;;  %v3635_v3 = vld [vmem:[#allocation11 + $0x3f4] sm:$0xf0] }
  0x93   : > { %1730 = vmatpush.bf16.msra.mxu2 %v3177_v5  ;;  %v3636_v51 = vld [vmem:[#allocation11 + $0x404] sm:$0xf]  ;;  %v3110_v53 = vld [vmem:[#allocation11 + $0x410] sm:$0xf0]  ;;  %v2985_v0 = vor.u32 %v3604_v49, %v2982_v50  ;;  %v2717_v5 = vor.u32 %v3539_v58, %v2716_v56  ;;  %v3101_v12 = vor.u32 %v3635_v3, %v3100_v2  ;;  %v3595_v29 = vld [vmem:[#allocation11 + $0x2b4] sm:$0xf0] }
  0x94   : > { %1744 = vmatpush.bf16.msra.mxu3 %v3305_v10  ;;  %v3668_v54 = vld [vmem:[#allocation11 + $0x504] sm:$0xf]  ;;  %v3238_v55 = vld [vmem:[#allocation11 + $0x510] sm:$0xf0]  ;;  %v3113_v1 = vor.u32 %v3636_v51, %v3110_v53  ;;  %v3535_v10 = vld [vmem:[#allocation11 + $0xd4] sm:$0xf0]  ;;  %v2941_v34 = vor.u32 %v3595_v29, %v2940_v28 }
  0x95   : > { %v3241_v4 = vor.u32 %v3668_v54, %v3238_v55  ;;  %v2668_v36 = vld [vmem:[#allocation11 + $0x88] sm:$0xf]  ;;  %v3559_v41 = vld [vmem:[#allocation11 + $0x194] sm:$0xf0] }
  0x96   : > { %1703 = vmatpush.bf16.msra.mxu0 %v2905_v16  ;;  %1717 = vmatpush.bf16.msra.mxu1 %v3033_v17  ;;  %v3084_v16 = vld [vmem:[#allocation11 + $0x3c8] sm:$0xf]  ;;  %v3631_v17 = vld [vmem:[#allocation11 + $0x3d4] sm:$0xf0] }
  0x97   : > { %1731 = vmatpush.bf16.msra.mxu2 %v3161_v18  ;;  %v2701_v18 = vor.u32 %v3535_v10, %v2700_v9  ;;  %v3085_v26 = vor.u32 %v3631_v17, %v3084_v16  ;;  %v2796_v38 = vld [vmem:[#allocation11 + $0x188] sm:$0xf]  ;;  %v3591_v43 = vld [vmem:[#allocation11 + $0x294] sm:$0xf0] }
  0x98   : > { %1745 = vmatpush.bf16.msra.mxu3 %v3289_v24  ;;  %v3531_v24 = vld [vmem:[#allocation11 + $0xb4] sm:$0xf0]  ;;  %v2924_v42 = vld [vmem:[#allocation11 + $0x288] sm:$0xf] }
  0x99   : > { %v3623_v45 = vld [vmem:[#allocation11 + $0x394] sm:$0xf0]  ;;  %v2652_v49 = vld [vmem:[#allocation11 + $0x68] sm:$0xf] }
  0x9a   : > { %1704 = vmatpush.bf16.msra.mxu0 %v2889_v30  ;;  %1718 = vmatpush.bf16.msra.mxu1 %v3017_v31  ;;  %v3068_v30 = vld [vmem:[#allocation11 + $0x3a8] sm:$0xf]  ;;  %v3627_v31 = vld [vmem:[#allocation11 + $0x3b4] sm:$0xf0] }
  0x9b   : > { %1732 = vmatpush.bf16.msra.mxu2 %v3145_v32  ;;  %v2685_v32 = vor.u32 %v3531_v24, %v2684_v21  ;;  %v3069_v40 = vor.u32 %v3627_v31, %v3068_v30  ;;  %v3523_v50 = vld [vmem:[#allocation11 + $0x74] sm:$0xf0]  ;;  %v2780_v51 = vld [vmem:[#allocation11 + $0x168] sm:$0xf] }
  0x9c   : > { %1746 = vmatpush.bf16.msra.mxu3 %v3273_v37  ;;  %v3527_v37 = vld [vmem:[#allocation11 + $0x94] sm:$0xf0]  ;;  %v2908_v54 = vld [vmem:[#allocation11 + $0x268] sm:$0xf]  ;;  %v2653_v59 = vor.u32 %v3523_v50, %v2652_v49 }
  0x9d   : > { %v2669_v46 = vor.u32 %v3527_v37, %v2668_v36  ;;  %v3555_v53 = vld [vmem:[#allocation11 + $0x174] sm:$0xf0]  ;;  %v3036_v56 = vld [vmem:[#allocation11 + $0x368] sm:$0xf] }
  0x9e   : > { %1705 = vmatpush.bf16.msra.mxu0 %v2873_v44  ;;  %1719 = vmatpush.bf16.msra.mxu1 %v3001_v47  ;;  %v3052_v44 = vld [vmem:[#allocation11 + $0x388] sm:$0xf]  ;;  %v2797_v47 = vor.u32 %v3559_v41, %v2796_v38  ;;  %v3587_v55 = vld [vmem:[#allocation11 + $0x274] sm:$0xf0]  ;;  %v3537_v41 = vld [vmem:[#allocation11 + $0xec] sm:$0xf] }
  0x9f   : > { %1733 = vmatpush.bf16.msra.mxu2 %v3129_v48  ;;  %v2925_v48 = vor.u32 %v3591_v43, %v2924_v42  ;;  %v3619_v58 = vld [vmem:[#allocation11 + $0x374] sm:$0xf0]  ;;  %v2909_v61 = vor.u32 %v3587_v55, %v2908_v54  ;;  %v2636_v62 = vld [vmem:[#allocation11 + $0x48] sm:$0xf]  ;;  %v2718_v42 = vld [vmem:[#allocation11 + $0xf8] sm:$0xf0] }
  0xa0   : > { %1747 = vmatpush.bf16.msra.mxu3 %v3257_v52  ;;  %v3053_v52 = vor.u32 %v3623_v45, %v3052_v44  ;;  %v3519_v63 = vld [vmem:[#allocation11 + $0x54] sm:$0xf0]  ;;  %v2892_v3 = vld [vmem:[#allocation11 + $0x248] sm:$0xf]  ;;  %v3569_v45 = vld [vmem:[#allocation11 + $0x1ec] sm:$0xf]  ;;  %v2721_v50 = vor.u32 %v3537_v41, %v2718_v42 }
  0xa1   : > { %v3551_v2 = vld [vmem:[#allocation11 + $0x154] sm:$0xf0]  ;;  %v2620_v11 = vld [vmem:[#allocation11 + $0x28] sm:$0xf] }
  0xa2   : > { %1706 = vmatpush.bf16.msra.mxu0 %v2857_v60  ;;  %1720 = vmatpush.bf16.msra.mxu1 %v2985_v0  ;;  %v2781_v60 = vor.u32 %v3555_v53, %v2780_v51  ;;  %v2764_v0 = vld [vmem:[#allocation11 + $0x148] sm:$0xf]  ;;  %v3547_v15 = vld [vmem:[#allocation11 + $0x134] sm:$0xf0] }
  0xa3   : > { %1734 = vmatpush.bf16.msra.mxu2 %v3113_v1  ;;  %v3037_v1 = vor.u32 %v3619_v58, %v3036_v56  ;;  %v2765_v9 = vor.u32 %v3551_v2, %v2764_v0  ;;  %v2748_v13 = vld [vmem:[#allocation11 + $0x128] sm:$0xf]  ;;  %v3579_v17 = vld [vmem:[#allocation11 + $0x234] sm:$0xf0]  ;;  %v3533_v56 = vld [vmem:[#allocation11 + $0xcc] sm:$0xf] }
  0xa4   : > { %1748 = vmatpush.bf16.msra.mxu3 %v3241_v4  ;;  %v3583_v4 = vld [vmem:[#allocation11 + $0x254] sm:$0xf0]  ;;  %v2876_v16 = vld [vmem:[#allocation11 + $0x228] sm:$0xf]  ;;  %v2749_v25 = vor.u32 %v3547_v15, %v2748_v13  ;;  %v2702_v58 = vld [vmem:[#allocation11 + $0xd8] sm:$0xf0] }
  0xa5   : > { %1707 = vmatmul.bf16.vlgmr.msra.gmra.mxu0 %v4317_v22  ;;  %1721 = vmatmul.bf16.vlgmr.msra.gmra.mxu1 %v4319_v23  ;;  %v2893_v10 = vor.u32 %v3583_v4, %v2892_v3  ;;  %v2604_v21 = vld [vmem:[#allocation11 + $0x8] sm:$0xf]  ;;  %v3511_v24 = vld [vmem:[#allocation11 + $0x14] sm:$0xf0] }
  0xa6   : > { %1755 = vmatpush.bf16.msrb.mxu0 %v2717_v5  ;;  %1769 = vmatpush.bf16.msrb.mxu1 %v2845_v7  ;;  %v3020_v5 = vld [vmem:[#allocation11 + $0x348] sm:$0xf]  ;;  %v3615_v7 = vld [vmem:[#allocation11 + $0x354] sm:$0xf0]  ;;  %v2605_v38 = vor.u32 %v3511_v24, %v2604_v21  ;;  %v2798_v21 = vld [vmem:[#allocation11 + $0x198] sm:$0xf0] }
  0xa7   : > { %1783 = vmatpush.bf16.msrb.mxu2 %v2973_v8  ;;  %1749 = vmatmul.bf16.vlgmr.msra.gmra.mxu3 %v4329_v39  ;;  %v2637_v8 = vor.u32 %v3519_v63, %v2636_v62  ;;  %v3021_v14 = vor.u32 %v3615_v7, %v3020_v5  ;;  %v2732_v27 = vld [vmem:[#allocation11 + $0x108] sm:$0xf]  ;;  %v3543_v28 = vld [vmem:[#allocation11 + $0x114] sm:$0xf0]  ;;  %v2705_v63 = vor.u32 %v3533_v56, %v2702_v58  ;;  %v3529_v5 = vld [vmem:[#allocation11 + $0xac] sm:$0xf] }
  0xa8   : > { %1797 = vmatpush.bf16.msrb.mxu3 %v3101_v12  ;;  %1735 = vmatmul.bf16.vlgmr.msra.gmra.mxu2 %v4327_v35  ;;  %v3515_v12 = vld [vmem:[#allocation11 + $0x34] sm:$0xf0]  ;;  %v2860_v29 = vld [vmem:[#allocation11 + $0x208] sm:$0xf]  ;;  %v2733_v43 = vor.u32 %v3543_v28, %v2732_v27  ;;  %v2686_v7 = vld [vmem:[#allocation11 + $0xb8] sm:$0xf0] }
  0xa9   : > { %v3575_v31 = vld [vmem:[#allocation11 + $0x214] sm:$0xf0]  ;;  %v3356_v37 = vld [vmem:[#allocation11 + $0x5e8] sm:$0xf] }
  0xaa   : > { %1756 = vmatpush.bf16.msrb.mxu0 %v2701_v18  ;;  %1770 = vmatpush.bf16.msrb.mxu1 %v2829_v19  ;;  %v3004_v18 = vld [vmem:[#allocation11 + $0x328] sm:$0xf]  ;;  %v3611_v19 = vld [vmem:[#allocation11 + $0x334] sm:$0xf0]  ;;  %v2861_v44 = vor.u32 %v3575_v31, %v2860_v29 }
  0xab   : > { %1784 = vmatpush.bf16.msrb.mxu2 %v2957_v20  ;;  %v2621_v20 = vor.u32 %v3515_v12, %v2620_v11  ;;  %v3005_v30 = vor.u32 %v3611_v19, %v3004_v18  ;;  %v3667_v36 = vld [vmem:[#allocation11 + $0x4f4] sm:$0xf0]  ;;  %v3212_v51 = vld [vmem:[#allocation11 + $0x4c8] sm:$0xf]  ;;  %v2689_v12 = vor.u32 %v3529_v5, %v2686_v7  ;;  %v3525_v18 = vld [vmem:[#allocation11 + $0x8c] sm:$0xf] }
  0xac   : > { %1798 = vmatpush.bf16.msrb.mxu3 %v3085_v26  ;;  %v2877_v26 = vor.u32 %v3579_v17, %v2876_v16  ;;  %v3340_v53 = vld [vmem:[#allocation11 + $0x5c8] sm:$0xf]  ;;  %v3695_v55 = vld [vmem:[#allocation11 + $0x5d4] sm:$0xf0]  ;;  %v2670_v19 = vld [vmem:[#allocation11 + $0x98] sm:$0xf0] }
  0xad   : > { %v3341_v62 = vor.u32 %v3695_v55, %v3340_v53  ;;  %v3196_v0 = vld [vmem:[#allocation11 + $0x4a8] sm:$0xf]  ;;  %v3691_v4 = vld [vmem:[#allocation11 + $0x5b4] sm:$0xf0]  ;;  %v3509_v7 = vld [vmem:[#allocation11 + $0xc] sm:$0xf] }
  0xae   : > { %1757 = vmatpush.bf16.msrb.mxu0 %v2685_v32  ;;  %1771 = vmatpush.bf16.msrb.mxu1 %v2813_v33  ;;  %v2988_v32 = vld [vmem:[#allocation11 + $0x308] sm:$0xf]  ;;  %v3607_v33 = vld [vmem:[#allocation11 + $0x314] sm:$0xf0] }
  0xaf   : > { %1785 = vmatpush.bf16.msrb.mxu2 %v2941_v34  ;;  %v3228_v34 = vld [vmem:[#allocation11 + $0x4e8] sm:$0xf]  ;;  %v3687_v17 = vld [vmem:[#allocation11 + $0x594] sm:$0xf0] }
  0xb0   : > { %1799 = vmatpush.bf16.msrb.mxu3 %v3069_v40  ;;  %v3699_v40 = vld [vmem:[#allocation11 + $0x5f4] sm:$0xf0]  ;;  %v3324_v2 = vld [vmem:[#allocation11 + $0x5a8] sm:$0xf] }
  0xb1   : > { %v3357_v49 = vor.u32 %v3699_v40, %v3356_v37  ;;  %v3325_v11 = vor.u32 %v3691_v4, %v3324_v2  ;;  %v3180_v13 = vld [vmem:[#allocation11 + $0x488] sm:$0xf]  ;;  %v3651_v28 = vld [vmem:[#allocation11 + $0x474] sm:$0xf0] }
  0xb2   : > { %1758 = vmatpush.bf16.msrb.mxu0 %v2669_v46  ;;  %1772 = vmatpush.bf16.msrb.mxu1 %v2797_v47  ;;  %v2846_v46 = vld [vmem:[#allocation11 + $0x1f8] sm:$0xf0]  ;;  %v2989_v47 = vor.u32 %v3607_v33, %v2988_v32  ;;  %v3308_v15 = vld [vmem:[#allocation11 + $0x588] sm:$0xf]  ;;  %v3683_v31 = vld [vmem:[#allocation11 + $0x574] sm:$0xf0] }
  0xb3   : > { %1786 = vmatpush.bf16.msrb.mxu2 %v2925_v48  ;;  %v3229_v48 = vor.u32 %v3667_v36, %v3228_v34  ;;  %v2849_v54 = vor.u32 %v3569_v45, %v2846_v46  ;;  %v3164_v27 = vld [vmem:[#allocation11 + $0x468] sm:$0xf]  ;;  %v3521_v32 = vld [vmem:[#allocation11 + $0x6c] sm:$0xf]  ;;  %v2654_v33 = vld [vmem:[#allocation11 + $0x78] sm:$0xf0] }
  0xb4   : > { %1800 = vmatpush.bf16.msrb.mxu3 %v3053_v52  ;;  %v3663_v52 = vld [vmem:[#allocation11 + $0x4d4] sm:$0xf0]  ;;  %v3292_v29 = vld [vmem:[#allocation11 + $0x568] sm:$0xf]  ;;  %v3553_v34 = vld [vmem:[#allocation11 + $0x16c] sm:$0xf]  ;;  %v3165_v37 = vor.u32 %v3651_v28, %v3164_v27  ;;  %v2657_v40 = vor.u32 %v3521_v32, %v2654_v33 }
  0xb5   : > { %v2782_v36 = vld [vmem:[#allocation11 + $0x178] sm:$0xf0]  ;;  %v3148_v41 = vld [vmem:[#allocation11 + $0x448] sm:$0xf]  ;;  %v3647_v42 = vld [vmem:[#allocation11 + $0x454] sm:$0xf0] }
  0xb6   : > { %1759 = vmatpush.bf16.msrb.mxu0 %v2653_v59  ;;  %1773 = vmatpush.bf16.msrb.mxu1 %v2781_v60  ;;  %v3565_v59 = vld [vmem:[#allocation11 + $0x1cc] sm:$0xf]  ;;  %v2830_v60 = vld [vmem:[#allocation11 + $0x1d8] sm:$0xf0]  ;;  %v3679_v45 = vld [vmem:[#allocation11 + $0x554] sm:$0xf0] }
  0xb7   : > { %1787 = vmatpush.bf16.msrb.mxu2 %v2909_v61  ;;  %v3213_v61 = vor.u32 %v3663_v52, %v3212_v51  ;;  %v2833_v3 = vor.u32 %v3565_v59, %v2830_v60  ;;  %v3517_v46 = vld [vmem:[#allocation11 + $0x4c] sm:$0xf]  ;;  %v3132_v53 = vld [vmem:[#allocation11 + $0x428] sm:$0xf]  ;;  %v3675_v58 = vld [vmem:[#allocation11 + $0x534] sm:$0xf0] }
  0xb8   : > { %1801 = vmatpush.bf16.msrb.mxu3 %v3037_v1  ;;  %v3659_v1 = vld [vmem:[#allocation11 + $0x4b4] sm:$0xf0]  ;;  %v3260_v55 = vld [vmem:[#allocation11 + $0x528] sm:$0xf]  ;;  %v3513_v59 = vld [vmem:[#allocation11 + $0x2c] sm:$0xf] }
  0xb9   : > { %v2622_v60 = vld [vmem:[#allocation11 + $0x38] sm:$0xf0]  ;;  %v3261_v2 = vor.u32 %v3675_v58, %v3260_v55  ;;  %v3244_v4 = vld [vmem:[#allocation11 + $0x508] sm:$0xf]  ;;  %v3671_v5 = vld [vmem:[#allocation11 + $0x514] sm:$0xf0] }
  0xba   : > { %1760 = vmatpush.bf16.msrb.mxu0 %v2637_v8  ;;  %1774 = vmatpush.bf16.msrb.mxu1 %v2765_v9  ;;  %v3561_v8 = vld [vmem:[#allocation11 + $0x1ac] sm:$0xf]  ;;  %v2814_v9 = vld [vmem:[#allocation11 + $0x1b8] sm:$0xf0] }
  0xbb   : > { %1788 = vmatpush.bf16.msrb.mxu2 %v2893_v10  ;;  %v3197_v10 = vor.u32 %v3659_v1, %v3196_v0  ;;  %v2817_v16 = vor.u32 %v3561_v8, %v2814_v9  ;;  %v3116_v0 = vld [vmem:[#allocation11 + $0x408] sm:$0xf]  ;;  %v3639_v1 = vld [vmem:[#allocation11 + $0x414] sm:$0xf0]  ;;  %v2606_v9 = vld [vmem:[#allocation11 + $0x18] sm:$0xf0] }
  0xbc   : > { %1802 = vmatpush.bf16.msrb.mxu3 %v3021_v14  ;;  %v3655_v14 = vld [vmem:[#allocation11 + $0x494] sm:$0xf0]  ;;  %v3086_v33 = vld [vmem:[#allocation11 + $0x3d8] sm:$0xf0]  ;;  %v3589_v55 = vld [vmem:[#allocation11 + $0x28c] sm:$0xf] }
  0xbd   : > { %v3181_v24 = vor.u32 %v3655_v14, %v3180_v13  ;;  %v2974_v13 = vld [vmem:[#allocation11 + $0x2f8] sm:$0xf0]  ;;  %v3633_v14 = vld [vmem:[#allocation11 + $0x3ec] sm:$0xf] }
  0xbe   : > { %1761 = vmatpush.bf16.msrb.mxu0 %v2621_v20  ;;  %1775 = vmatpush.bf16.msrb.mxu1 %v2749_v25  ;;  %v3557_v20 = vld [vmem:[#allocation11 + $0x18c] sm:$0xf]  ;;  %v3309_v25 = vor.u32 %v3687_v17, %v3308_v15  ;;  %v3117_v15 = vor.u32 %v3639_v1, %v3116_v0  ;;  %v3310_v0 = vld [vmem:[#allocation11 + $0x598] sm:$0xf0] }
  0xbf   : > { %1789 = vmatpush.bf16.msrb.mxu2 %v2877_v26  ;;  %v2673_v26 = vor.u32 %v3525_v18, %v2670_v19  ;;  %v3665_v17 = vld [vmem:[#allocation11 + $0x4ec] sm:$0xf]  ;;  %v3230_v18 = vld [vmem:[#allocation11 + $0x4f8] sm:$0xf0]  ;;  %v3245_v19 = vor.u32 %v3671_v5, %v3244_v4 }
  0xc0   : > { %1803 = vmatpush.bf16.msrb.mxu3 %v3005_v30  ;;  %v2801_v30 = vor.u32 %v3557_v20, %v2798_v21  ;;  %v2609_v20 = vor.u32 %v3509_v7, %v2606_v9  ;;  %v3697_v21 = vld [vmem:[#allocation11 + $0x5ec] sm:$0xf]  ;;  %v3233_v28 = vor.u32 %v3665_v17, %v3230_v18  ;;  %v3038_v7 = vld [vmem:[#allocation11 + $0x378] sm:$0xf0] }
  0xc1   : > { %v3621_v58 = vld [vmem:[#allocation11 + $0x38c] sm:$0xf]  ;;  %v3166_v9 = vld [vmem:[#allocation11 + $0x478] sm:$0xf0] }
  0xc2   : > { %1762 = vmatpush.bf16.msrb.mxu0 %v2605_v38  ;;  %1776 = vmatpush.bf16.msrb.mxu1 %v2733_v43  ;;  %v3293_v38 = vor.u32 %v3683_v31, %v3292_v29  ;;  %v3276_v43 = vld [vmem:[#allocation11 + $0x548] sm:$0xf]  ;;  %v3597_v29 = vld [vmem:[#allocation11 + $0x2cc] sm:$0xf] }
  0xc3   : > { %1790 = vmatpush.bf16.msrb.mxu2 %v2861_v44  ;;  %v2785_v44 = vor.u32 %v3553_v34, %v2782_v36  ;;  %v3277_v51 = vor.u32 %v3679_v45, %v3276_v43  ;;  %v3629_v31 = vld [vmem:[#allocation11 + $0x3cc] sm:$0xf]  ;;  %v3214_v36 = vld [vmem:[#allocation11 + $0x4d8] sm:$0xf0] }
  0xc4   : > { %1804 = vmatpush.bf16.msrb.mxu3 %v2989_v47  ;;  %v2638_v47 = vld [vmem:[#allocation11 + $0x58] sm:$0xf0]  ;;  %v3661_v34 = vld [vmem:[#allocation11 + $0x4cc] sm:$0xf] }
  0xc5   : > { %1763 = vmatmul.bf16.vlgmr.msrb.gmra.mxu0 %v4305_v57  ;;  %1777 = vmatmul.bf16.vlgmr.msrb.gmra.mxu1 %v4310_v6  ;;  %v2641_v52 = vor.u32 %v3517_v46, %v2638_v47  ;;  %v3593_v43 = vld [vmem:[#allocation11 + $0x2ac] sm:$0xf]  ;;  %v3070_v47 = vld [vmem:[#allocation11 + $0x3b8] sm:$0xf0] }
  0xc6   : > { %1811 = vmatpush.bf16.msra.mxu0 %v3229_v48  ;;  %1825 = vmatpush.bf16.msra.mxu1 %v3357_v49  ;;  %v3549_v48 = vld [vmem:[#allocation11 + $0x14c] sm:$0xf]  ;;  %v2766_v49 = vld [vmem:[#allocation11 + $0x158] sm:$0xf0] }
  0xc7   : > { %1839 = vmatpush.bf16.msra.mxu2 %v2721_v50  ;;  %1805 = vmatmul.bf16.vlgmr.msrb.gmra.mxu3 %v4319_v23  ;;  %v3149_v50 = vor.u32 %v3647_v42, %v3148_v41  ;;  %v2769_v56 = vor.u32 %v3549_v48, %v2766_v49  ;;  %v3089_v41 = vor.u32 %v3629_v31, %v3086_v33  ;;  %v3625_v45 = vld [vmem:[#allocation11 + $0x3ac] sm:$0xf]  ;;  %v3198_v49 = vld [vmem:[#allocation11 + $0x4b8] sm:$0xf0] }
  0xc8   : > { %1853 = vmatpush.bf16.msra.mxu3 %v2849_v54  ;;  %1791 = vmatmul.bf16.vlgmr.msrb.gmra.mxu2 %v4317_v22  ;;  %v3643_v54 = vld [vmem:[#allocation11 + $0x434] sm:$0xf0]  ;;  %v3217_v42 = vor.u32 %v3661_v34, %v3214_v36  ;;  %v3657_v48 = vld [vmem:[#allocation11 + $0x4ac] sm:$0xf]  ;;  %v3006_v33 = vld [vmem:[#allocation11 + $0x338] sm:$0xf0] }
  0xc9   : > { %v3617_v4 = vld [vmem:[#allocation11 + $0x36c] sm:$0xf]  ;;  %v3134_v36 = vld [vmem:[#allocation11 + $0x438] sm:$0xf0] }
  0xca   : > { %1812 = vmatpush.bf16.msra.mxu0 %v3213_v61  ;;  %1826 = vmatpush.bf16.msra.mxu1 %v3341_v62  ;;  %v3545_v61 = vld [vmem:[#allocation11 + $0x12c] sm:$0xf]  ;;  %v2750_v62 = vld [vmem:[#allocation11 + $0x138] sm:$0xf0] }
  0xcb   : > { %1840 = vmatpush.bf16.msra.mxu2 %v2705_v63  ;;  %v3133_v63 = vor.u32 %v3643_v54, %v3132_v53  ;;  %v2753_v8 = vor.u32 %v3545_v61, %v2750_v62  ;;  %v3073_v53 = vor.u32 %v3625_v45, %v3070_v47  ;;  %v3201_v54 = vor.u32 %v3657_v48, %v3198_v49  ;;  %v3653_v61 = vld [vmem:[#allocation11 + $0x48c] sm:$0xf]  ;;  %v3182_v62 = vld [vmem:[#allocation11 + $0x498] sm:$0xf0] }
  0xcc   : > { %1854 = vmatpush.bf16.msra.mxu3 %v2833_v3  ;;  %v2625_v3 = vor.u32 %v3513_v59, %v2622_v60  ;;  %v3054_v60 = vld [vmem:[#allocation11 + $0x398] sm:$0xf0]  ;;  %v3613_v17 = vld [vmem:[#allocation11 + $0x34c] sm:$0xf] }
  0xcd   : > { %v3057_v1 = vor.u32 %v3621_v58, %v3054_v60  ;;  %v3609_v31 = vld [vmem:[#allocation11 + $0x32c] sm:$0xf]  ;;  %v3118_v49 = vld [vmem:[#allocation11 + $0x418] sm:$0xf0]  ;;  %v3714_v58 = vld [vmem:[#allocation8 + $0x74] sm:$0xf] }
  0xce   : > { %1813 = vmatpush.bf16.msra.mxu0 %v3197_v10  ;;  %1827 = vmatpush.bf16.msra.mxu1 %v3325_v11  ;;  %v3541_v10 = vld [vmem:[#allocation11 + $0x10c] sm:$0xf]  ;;  %v2734_v11 = vld [vmem:[#allocation11 + $0x118] sm:$0xf0] }
  0xcf   : > { %1841 = vmatpush.bf16.msra.mxu2 %v2689_v12  ;;  %v3601_v12 = vld [vmem:[#allocation11 + $0x2ec] sm:$0xf] }
  0xd0   : > { %1855 = vmatpush.bf16.msra.mxu3 %v2817_v16  ;;  %v3102_v16 = vld [vmem:[#allocation11 + $0x3f8] sm:$0xf0]  ;;  %v3641_v34 = vld [vmem:[#allocation11 + $0x42c] sm:$0xf] }
  0xd1   : > { %v3105_v27 = vor.u32 %v3633_v14, %v3102_v16  ;;  %v2894_v16 = vld [vmem:[#allocation11 + $0x258] sm:$0xf0]  ;;  %v3605_v45 = vld [vmem:[#allocation11 + $0x30c] sm:$0xf] }
  0xd2   : > { %1814 = vmatpush.bf16.msra.mxu0 %v3181_v24  ;;  %1828 = vmatpush.bf16.msra.mxu1 %v3309_v25  ;;  %v3358_v24 = vld [vmem:[#allocation11 + $0x5f8] sm:$0xf0]  ;;  %v2737_v25 = vor.u32 %v3541_v10, %v2734_v11  ;;  %v3681_v10 = vld [vmem:[#allocation11 + $0x56c] sm:$0xf] }
  0xd3   : > { %1842 = vmatpush.bf16.msra.mxu2 %v2673_v26  ;;  %v2977_v26 = vor.u32 %v3601_v12, %v2974_v13  ;;  %v3361_v32 = vor.u32 %v3697_v21, %v3358_v24  ;;  %v3294_v11 = vld [vmem:[#allocation11 + $0x578] sm:$0xf0]  ;;  %v3041_v13 = vor.u32 %v3617_v4, %v3038_v7  ;;  %v3677_v24 = vld [vmem:[#allocation11 + $0x54c] sm:$0xf]  ;;  %v3729_v7 = vld [vmem:[#allocation8 + $0xe4] sm:$0xf0] }
  0xd4   : > { %1856 = vmatpush.bf16.msra.mxu3 %v2801_v30  ;;  %v2958_v30 = vld [vmem:[#allocation11 + $0x2d8] sm:$0xf0]  ;;  %v3297_v18 = vor.u32 %v3681_v10, %v3294_v11  ;;  %v3637_v47 = vld [vmem:[#allocation11 + $0x40c] sm:$0xf]  ;;  %v3728_v11 = vld [vmem:[#allocation8 + $0xe4] sm:$0xf] }
  0xd5   : > { %v3150_v21 = vld [vmem:[#allocation11 + $0x458] sm:$0xf0] }
  0xd6   : > { %1815 = vmatpush.bf16.msra.mxu0 %v3165_v37  ;;  %1829 = vmatpush.bf16.msra.mxu1 %v3293_v38  ;;  %v3693_v37 = vld [vmem:[#allocation11 + $0x5cc] sm:$0xf]  ;;  %v3342_v38 = vld [vmem:[#allocation11 + $0x5d8] sm:$0xf0] }
  0xd7   : > { %1843 = vmatpush.bf16.msra.mxu2 %v2657_v40  ;;  %v2961_v40 = vor.u32 %v3597_v29, %v2958_v30  ;;  %v3345_v46 = vor.u32 %v3693_v37, %v3342_v38  ;;  %v3577_v29 = vld [vmem:[#allocation11 + $0x22c] sm:$0xf]  ;;  %v2878_v30 = vld [vmem:[#allocation11 + $0x238] sm:$0xf0] }
  0xd8   : > { %1857 = vmatpush.bf16.msra.mxu3 %v2785_v44  ;;  %v2942_v44 = vld [vmem:[#allocation11 + $0x2b8] sm:$0xf0]  ;;  %v3673_v37 = vld [vmem:[#allocation11 + $0x52c] sm:$0xf] }
  0xd9   : > { %v3262_v38 = vld [vmem:[#allocation11 + $0x538] sm:$0xf0] }
  0xda   : > { %1816 = vmatpush.bf16.msra.mxu0 %v3149_v50  ;;  %1830 = vmatpush.bf16.msra.mxu1 %v3277_v51  ;;  %v3689_v50 = vld [vmem:[#allocation11 + $0x5ac] sm:$0xf]  ;;  %v3326_v51 = vld [vmem:[#allocation11 + $0x5b8] sm:$0xf0]  ;;  %v3265_v48 = vor.u32 %v3673_v37, %v3262_v38  ;;  %v3724_v38 = vld [vmem:[#allocation8 + $0xc4] sm:$0xf] }
  0xdb   : > { %1844 = vmatpush.bf16.msra.mxu2 %v2641_v52  ;;  %v2945_v52 = vor.u32 %v3593_v43, %v2942_v44  ;;  %v3329_v59 = vor.u32 %v3689_v50, %v3326_v51  ;;  %v3009_v43 = vor.u32 %v3609_v31, %v3006_v33  ;;  %v3137_v44 = vor.u32 %v3641_v34, %v3134_v36  ;;  %v3669_v50 = vld [vmem:[#allocation11 + $0x50c] sm:$0xf]  ;;  %v3246_v51 = vld [vmem:[#allocation11 + $0x518] sm:$0xf0]  ;;  %v3708_v36 = vld [vmem:[#allocation8 + $0x44] sm:$0xf] }
  0xdc   : > { %1858 = vmatpush.bf16.msra.mxu3 %v2769_v56  ;;  %v2926_v56 = vld [vmem:[#allocation11 + $0x298] sm:$0xf0] }
  0xdd   : > { %v3476_v4 = vld [vmem:[#allocation8 + $0xe0] sm:$0xf] }
  0xde   : > { %1817 = vmatpush.bf16.msra.mxu0 %v3133_v63  ;;  %1831 = vmatpush.bf16.msra.mxu1 %v3261_v2  ;;  %v3685_v63 = vld [vmem:[#allocation11 + $0x58c] sm:$0xf]  ;;  %v3396_v31 = vld [vmem:[#allocation8 + $0x40] sm:$0xf] }
  0xdf   : > { %1845 = vmatpush.bf16.msra.mxu2 %v2625_v3  ;;  %v3585_v2 = vld [vmem:[#allocation11 + $0x26c] sm:$0xf]  ;;  %v2910_v3 = vld [vmem:[#allocation11 + $0x278] sm:$0xf0]  ;;  %v3313_v5 = vor.u32 %v3685_v63, %v3310_v0  ;;  %v3249_v0 = vor.u32 %v3669_v50, %v3246_v51  ;;  %v3706_v50 = vld [vmem:[#allocation8 + $0x34] sm:$0xf] }
  0xe0   : > { %1859 = vmatpush.bf16.msra.mxu3 %v2753_v8  ;;  %v3649_v8 = vld [vmem:[#allocation11 + $0x46c] sm:$0xf]  ;;  %v2913_v12 = vor.u32 %v3585_v2, %v2910_v3  ;;  %v3486_v63 = vld [vmem:[#allocation8 + $0xf8] sm:$0xf0]  ;;  %v3412_v2 = vld [vmem:[#allocation8 + $0x60] sm:$0xf] }
  0xe1   : > { %v3169_v14 = vor.u32 %v3649_v8, %v3166_v9  ;;  %v3713_v3 = vld [vmem:[#allocation8 + $0x64] sm:$0xf0]  ;;  %v3712_v8 = vld [vmem:[#allocation8 + $0x64] sm:$0xf]  ;;  %v3414_v9 = vld [vmem:[#allocation8 + $0x68] sm:$0xf0] }
  0xe2   : > { %1818 = vmatpush.bf16.msra.mxu0 %v3117_v15  ;;  %1832 = vmatpush.bf16.msra.mxu1 %v3245_v19  ;;  %v3581_v15 = vld [vmem:[#allocation11 + $0x24c] sm:$0xf]  ;;  %v3022_v19 = vld [vmem:[#allocation11 + $0x358] sm:$0xf0] }
  0xe3   : > { %1846 = vmatpush.bf16.msra.mxu2 %v2609_v20  ;;  %v3645_v20 = vld [vmem:[#allocation11 + $0x44c] sm:$0xf]  ;;  %v3390_v51 = vld [vmem:[#allocation8 + $0x38] sm:$0xf0] }
  0xe4   : > { %1860 = vmatpush.bf16.msra.mxu3 %v2737_v25  ;;  %v3278_v25 = vld [vmem:[#allocation11 + $0x558] sm:$0xf0] }
  0xe5   : > { %1819 = vmatmul.bf16.vlgmr.msra.gmra.mxu0 %v4327_v35  ;;  %1833 = vmatmul.bf16.vlgmr.msra.gmra.mxu1 %v4329_v39 }
  0xe6   : > { %1867 = vmatpush.bf16.msrb.mxu0 %v2977_v26  ;;  %1881 = vmatpush.bf16.msrb.mxu1 %v3105_v27  ;;  %v2897_v26 = vor.u32 %v3581_v15, %v2894_v16  ;;  %v3025_v27 = vor.u32 %v3613_v17, %v3022_v19  ;;  %v4347_v10 = vpop.f32.mrf.mxu0  ;;  %v3477_v15 = vor.u32 %v3729_v7, %v3476_v4  ;;  %v3404_v17 = vld [vmem:[#allocation8 + $0x50] sm:$0xf] }
  0xe7   : > { %1895 = vmatpush.bf16.msrb.mxu2 %v3233_v28  ;;  %1861 = vmatmul.bf16.vlgmr.msra.gmra.mxu3 %v4310_v6  ;;  %v3185_v6 = vor.u32 %v3653_v61, %v3182_v62  ;;  %v3153_v28 = vor.u32 %v3645_v20, %v3150_v21  ;;  %v3121_v61 = vor.u32 %v3637_v47, %v3118_v49  ;;  %v3730_v62 = vld [vmem:[#allocation8 + $0xf4] sm:$0xf]  ;;  %v3468_v19 = vld [vmem:[#allocation8 + $0xd0] sm:$0xf]  ;;  %v3727_v21 = vld [vmem:[#allocation8 + $0xd4] sm:$0xf0] }
  0xe8   : > { %1909 = vmatpush.bf16.msrb.mxu3 %v3361_v32  ;;  %1847 = vmatmul.bf16.vlgmr.msra.gmra.mxu2 %v4305_v57  ;;  %v2929_v57 = vor.u32 %v3589_v55, %v2926_v56  ;;  %v3281_v32 = vor.u32 %v3677_v24, %v3278_v25  ;;  %v3731_v56 = vld [vmem:[#allocation8 + $0xf4] sm:$0xf0]  ;;  %v3417_v16 = vor.u32 %v3712_v8, %v3414_v9  ;;  %v3710_v24 = vld [vmem:[#allocation8 + $0x54] sm:$0xf]  ;;  %v3406_v25 = vld [vmem:[#allocation8 + $0x58] sm:$0xf0] }
  0xe9   : > { %v3723_v49 = vld [vmem:[#allocation8 + $0xb4] sm:$0xf0]  ;;  %v3372_v7 = vld [vmem:[#allocation8 + $0x10] sm:$0xf] }
  0xea   : > { %1868 = vmatpush.bf16.msrb.mxu0 %v2961_v40  ;;  %1882 = vmatpush.bf16.msrb.mxu1 %v3089_v41  ;;  %v2881_v40 = vor.u32 %v3577_v29, %v2878_v30  ;;  %v3573_v41 = vld [vmem:[#allocation11 + $0x20c] sm:$0xf]  ;;  %v3469_v29 = vor.u32 %v3727_v21, %v3468_v19  ;;  %v3409_v30 = vor.u32 %v3710_v24, %v3406_v25  ;;  %v3703_v8 = vld [vmem:[#allocation8 + $0x14] sm:$0xf0]  ;;  %v4372_v19 = vld [vmem:[%s4470_s5] sm:$0xf] }
  0xeb   : > { %1896 = vmatpush.bf16.msrb.mxu2 %v3217_v42  ;;  %v2862_v42 = vld [vmem:[#allocation11 + $0x218] sm:$0xf0]  ;;  %v3436_v9 = vld [vmem:[#allocation8 + $0x90] sm:$0xf]  ;;  %v3373_v21 = vor.u32 %v3703_v8, %v3372_v7 }
  0xec   : > { %1910 = vmatpush.bf16.msrb.mxu3 %v3345_v46  ;;  %v2990_v46 = vld [vmem:[#allocation11 + $0x318] sm:$0xf0]  ;;  %v2865_v55 = vor.u32 %v3573_v41, %v2862_v42 }
  0xed   : > { %v2993_v60 = vor.u32 %v3605_v45, %v2990_v46  ;;  %v3707_v45 = vld [vmem:[#allocation8 + $0x34] sm:$0xf0]  ;;  %v3452_v46 = vld [vmem:[#allocation8 + $0xb0] sm:$0xf] }
  0xee   : > { %1869 = vmatpush.bf16.msrb.mxu0 %v2945_v52  ;;  %1883 = vmatpush.bf16.msrb.mxu1 %v3073_v53  ;;  %v3420_v52 = vld [vmem:[#allocation8 + $0x70] sm:$0xf]  ;;  %v3715_v53 = vld [vmem:[#allocation8 + $0x74] sm:$0xf0]  ;;  %v4359_v41 = vpop.f32.mrf.mxu0 }
  0xef   : > { %1897 = vmatpush.bf16.msrb.mxu2 %v3201_v54  ;;  %v3484_v54 = vld [vmem:[#allocation8 + $0xf0] sm:$0xf] }
  0xf0   : > { %1911 = vmatpush.bf16.msrb.mxu3 %v3329_v59  ;;  %v3422_v59 = vld [vmem:[#allocation8 + $0x78] sm:$0xf0] }
  0xf2   : > { %1870 = vmatpush.bf16.msrb.mxu0 %v2929_v57  ;;  %1884 = vmatpush.bf16.msrb.mxu1 %v3057_v1  ;;  %v3421_v57 = vor.u32 %v3715_v53, %v3420_v52  ;;  %v3485_v1 = vor.u32 %v3731_v56, %v3484_v54  ;;  %v4357_v37 = vpop.f32.mrf.mxu3  ;;  %v3722_v52 = vld [vmem:[#allocation8 + $0xb4] sm:$0xf]  ;;  %v3454_v53 = vld [vmem:[#allocation8 + $0xb8] sm:$0xf0]  ;;  %v3393_v56 = vor.u32 %v3706_v50, %v3390_v51 }
  0xf3   : > { %1898 = vmatpush.bf16.msrb.mxu2 %v3185_v6  ;;  %v3425_v6 = vor.u32 %v3714_v58, %v3422_v59  ;;  %v4355_v33 = vpop.f32.mrf.mxu2  ;;  %v3380_v58 = vld [vmem:[#allocation8 + $0x20] sm:$0xf]  ;;  %v3705_v59 = vld [vmem:[#allocation8 + $0x24] sm:$0xf0] }
  0xf4   : > { %1912 = vmatpush.bf16.msrb.mxu3 %v3313_v5  ;;  %v3489_v5 = vor.u32 %v3730_v62, %v3486_v63  ;;  %v3721_v62 = vld [vmem:[#allocation8 + $0xa4] sm:$0xf0]  ;;  %v3704_v63 = vld [vmem:[#allocation8 + $0x24] sm:$0xf] }
  0xf6   : > { %1871 = vmatpush.bf16.msrb.mxu0 %v2913_v12  ;;  %1885 = vmatpush.bf16.msrb.mxu1 %v3041_v13  ;;  %v3478_v12 = vld [vmem:[#allocation8 + $0xe8] sm:$0xf0]  ;;  %v4349_v13 = vpop.f32.mrf.mxu1 }
  0xf7   : > { %1899 = vmatpush.bf16.msrb.mxu2 %v3169_v14  ;;  %v3413_v14 = vor.u32 %v3713_v3, %v3412_v2  ;;  %v3481_v20 = vor.u32 %v3728_v11, %v3478_v12  ;;  %v3381_v2 = vor.u32 %v3705_v59, %v3380_v58  ;;  %v3719_v12 = vld [vmem:[#allocation8 + $0x94] sm:$0xf0] }
  0xf8   : > { %1913 = vmatpush.bf16.msrb.mxu3 %v3297_v18  ;;  %v3711_v18 = vld [vmem:[#allocation8 + $0x54] sm:$0xf0]  ;;  %v3437_v24 = vor.u32 %v3719_v12, %v3436_v9 }
  0xfa   : > { %1872 = vmatpush.bf16.msrb.mxu0 %v2897_v26  ;;  %1886 = vmatpush.bf16.msrb.mxu1 %v3025_v27  ;;  %v3726_v26 = vld [vmem:[#allocation8 + $0xd4] sm:$0xf]  ;;  %v3470_v27 = vld [vmem:[#allocation8 + $0xd8] sm:$0xf0]  ;;  %v4365_v3 = vpop.f32.mrf.mxu3 }
  0xfb   : > { %1900 = vmatpush.bf16.msrb.mxu2 %v3153_v28  ;;  %v3405_v28 = vor.u32 %v3711_v18, %v3404_v17  ;;  %v3473_v34 = vor.u32 %v3726_v26, %v3470_v27  ;;  %v3718_v17 = vld [vmem:[#allocation8 + $0x94] sm:$0xf]  ;;  %v3438_v18 = vld [vmem:[#allocation8 + $0x98] sm:$0xf0]  ;;  %v3364_v26 = vld [vmem:[#allocation8] sm:$0xf] }
  0xfc   : > { %1914 = vmatpush.bf16.msrb.mxu3 %v3281_v32  ;;  %v3460_v32 = vld [vmem:[#allocation8 + $0xc0] sm:$0xf]  ;;  %v3701_v27 = vld [vmem:[#allocation8 + $0x4] sm:$0xf0] }
  0xfe   : > { %1873 = vmatpush.bf16.msrb.mxu0 %v2881_v40  ;;  %1887 = vmatpush.bf16.msrb.mxu1 %v3009_v43  ;;  %v4361_v47 = vpop.f32.mrf.mxu1 }
  0xff   : > { %1901 = vmatpush.bf16.msrb.mxu2 %v3137_v44  ;;  %v3388_v44 = vld [vmem:[#allocation8 + $0x30] sm:$0xf] }
 0x100   : > { %1915 = vmatpush.bf16.msrb.mxu3 %v3265_v48  ;;  %v3389_v54 = vor.u32 %v3707_v45, %v3388_v44  ;;  %v4387_v44 = vld [vmem:[%s4281_s17 + $0x18] sm:$0xff] }
 0x102   : > { %1874 = vmatpush.bf16.msrb.mxu0 %v2865_v55  ;;  %1888 = vmatpush.bf16.msrb.mxu1 %v2993_v60  ;;  %v3453_v55 = vor.u32 %v3723_v49, %v3452_v46  ;;  %v3444_v60 = vld [vmem:[#allocation8 + $0xa0] sm:$0xf] }
 0x103   : > { %1902 = vmatpush.bf16.msrb.mxu2 %v3121_v61  ;;  %v3457_v61 = vor.u32 %v3722_v52, %v3454_v53  ;;  %v3445_v4 = vor.u32 %v3721_v62, %v3444_v60 }
 0x104   : > { %1916 = vmatpush.bf16.msrb.mxu3 %v3249_v0  ;;  %v3382_v0 = vld [vmem:[#allocation8 + $0x28] sm:$0xf0] }
 0x105   : > { %1875 = vmatmul.bf16.vlgmr.msrb.gmra.mxu0 %v4317_v22  ;;  %1889 = vmatmul.bf16.vlgmr.msrb.gmra.mxu1 %v4319_v23  ;;  %v3709_v22 = vld [vmem:[#allocation8 + $0x44] sm:$0xf0]  ;;  %v3398_v23 = vld [vmem:[#allocation8 + $0x48] sm:$0xf0] }
 0x106   : > { %2135 = vmatpush.bf16.msra.mxu0 %v3421_v57  ;;  %2149 = vmatpush.bf16.msra.mxu1 %v3485_v1  ;;  %v3397_v40 = vor.u32 %v3709_v22, %v3396_v31  ;;  %v3401_v43 = vor.u32 %v3708_v36, %v3398_v23  ;;  %v3720_v57 = vld [vmem:[#allocation8 + $0xa4] sm:$0xf]  ;;  %v3446_v1 = vld [vmem:[#allocation8 + $0xa8] sm:$0xf0]  ;;  %v3365_v36 = vor.u32 %v3701_v27, %v3364_v26 }
 0x107   : > { %2163 = vmatpush.bf16.msra.mxu2 %v3425_v6  ;;  %1917 = vmatmul.bf16.vlgmr.msrb.gmra.mxu3 %v4329_v39  ;;  %v3462_v39 = vld [vmem:[#allocation8 + $0xc8] sm:$0xf0]  ;;  %v4363_v6 = vpop.f32.mrf.mxu2  ;;  %v3449_v11 = vor.u32 %v3720_v57, %v3446_v1  ;;  %v3700_v31 = vld [vmem:[#allocation8 + $0x4] sm:$0xf] }
 0x108   : > { %2177 = vmatpush.bf16.msra.mxu3 %v3489_v5  ;;  %1903 = vmatmul.bf16.vlgmr.msrb.gmra.mxu2 %v4327_v35  ;;  %v3725_v35 = vld [vmem:[#allocation8 + $0xc4] sm:$0xf0]  ;;  %v3465_v48 = vor.u32 %v3724_v38, %v3462_v39  ;;  %v3385_v5 = vor.u32 %v3704_v63, %v3382_v0  ;;  %v3366_v22 = vld [vmem:[#allocation8 + $0x8] sm:$0xf0]  ;;  %v4378_v38 = vld [vmem:[%s4281_s17] sm:$0xff] }
 0x109   : > { %v3461_v42 = vor.u32 %v3725_v35, %v3460_v32  ;;  %v589_v32 = vperm.slane %v4372_v19, 0  ;;  %v3430_v35 = vld [vmem:[#allocation8 + $0x88] sm:$0xf0]  ;;  %v4381_v39 = vld [vmem:[%s4281_s17 + $0x10] sm:$0xff] }
 0x10a   : > { %2136 = vmatpush.bf16.msra.mxu0 %v3413_v14  ;;  %2150 = vmatpush.bf16.msra.mxu1 %v3477_v15  ;;  %v3702_v14 = vld [vmem:[#allocation8 + $0x14] sm:$0xf]  ;;  %v3374_v15 = vld [vmem:[#allocation8 + $0x18] sm:$0xf0]  ;;  %v1694_v45 = vpop.f32.mrf.mxu3  ;;  %v1935_v50 = vpack.c.bf16 %v4381_v39, %v4378_v38 }
 0x10b   : > { %2164 = vmatpush.bf16.msra.mxu2 %v3417_v16  ;;  %v4367_v16 = vpop.f32.mrf.mxu0  ;;  %v3377_v25 = vor.u32 %v3702_v14, %v3374_v15  ;;  %v1597_v49 = vadd.f32 %v4347_v10, %v589_v32  ;;  %v1599_v58 = vadd.f32 %v4359_v41, %v589_v32 }
 0x10c   : > { %2178 = vmatpush.bf16.msra.mxu3 %v3481_v20  ;;  %v4374_v20 = vpop.f32.mrf.mxu1 }
 0x10d   : > { %v1613_v0 = vadd.f32 %v4361_v47, %v1599_v58 }
 0x10e   : > { %2137 = vmatpush.bf16.msra.mxu0 %v3405_v28  ;;  %2151 = vmatpush.bf16.msra.mxu1 %v3469_v29  ;;  %v3428_v28 = vld [vmem:[#allocation8 + $0x80] sm:$0xf]  ;;  %v3441_v29 = vor.u32 %v3718_v17, %v3438_v18 }
 0x10f   : > { %2165 = vmatpush.bf16.msra.mxu2 %v3409_v30  ;;  %v3717_v30 = vld [vmem:[#allocation8 + $0x84] sm:$0xf0]  ;;  %v1680_v23 = vpop.f32.mrf.mxu2 }
 0x110   : > { %2179 = vmatpush.bf16.msra.mxu3 %v3473_v34  ;;  %v3716_v34 = vld [vmem:[#allocation8 + $0x84] sm:$0xf] }
 0x111   : > { %v3433_v46 = vor.u32 %v3716_v34, %v3430_v35 }
 0x112   : > { %2138 = vmatpush.bf16.msra.mxu0 %v3397_v40  ;;  %2152 = vmatpush.bf16.msra.mxu1 %v3461_v42  ;;  %v3429_v40 = vor.u32 %v3717_v30, %v3428_v28  ;;  %v3369_v42 = vor.u32 %v3700_v31, %v3366_v22  ;;  %v1696_v60 = vpop.f32.mrf.mxu3 }
 0x113   : > { %2166 = vmatpush.bf16.msra.mxu2 %v3401_v43  ;;  %v4384_v43 = vld [vmem:[%s4281_s17 + $0x8] sm:$0xff]  ;;  %v1654_v52 = vpop.f32.mrf.mxu0 }
 0x114   : > { %2180 = vmatpush.bf16.msra.mxu3 %v3465_v48  ;;  %v590_v48 = vperm.slane %v4372_v19, 1  ;;  %v1936_v51 = vpack.c.bf16 %v4387_v44, %v4384_v43  ;;  %v1668_v53 = vpop.f32.mrf.mxu1 }
 0x116   : > { %2139 = vmatpush.bf16.msra.mxu0 %v3389_v54  ;;  %2153 = vmatpush.bf16.msra.mxu1 %v3453_v55  ;;  %v1681_v54 = vadd.f32 %v1680_v23, %v590_v48  ;;  %v1611_v55 = vadd.f32 %v4349_v13, %v1597_v49 }
 0x117   : > { %2167 = vmatpush.bf16.msra.mxu2 %v3393_v56  ;;  %v1682_v56 = vpop.f32.mrf.mxu2 }
 0x118   : > { %2181 = vmatpush.bf16.msra.mxu3 %v3457_v61  ;;  %v1695_v10 = vadd.f32 %v1694_v45, %v1681_v54  ;;  %v1625_v59 = vadd.f32 %v4355_v33, %v1611_v55  ;;  %v1683_v1 = vadd.f32 %v1682_v56, %v590_v48  ;;  %v591_v48 = vperm.slane %v4372_v19, 2 }
 0x11a   : > { %2140 = vmatpush.bf16.msra.mxu0 %v3381_v2  ;;  %2154 = vmatpush.bf16.msra.mxu1 %v3445_v4  ;;  %v1639_v57 = vadd.f32 %v4357_v37, %v1625_v59  ;;  %v1627_v4 = vadd.f32 %v4363_v6, %v1613_v0 }
 0x11b   : > { %2168 = vmatpush.bf16.msra.mxu2 %v3385_v5  ;;  %v1697_v5 = vadd.f32 %v1696_v60, %v1683_v1 }
 0x11c   : > { %2182 = vmatpush.bf16.msra.mxu3 %v3449_v11  ;;  %v1653_v2 = vadd.f32 %v4367_v16, %v1639_v57  ;;  %v1641_v11 = vadd.f32 %v4365_v3, %v1627_v4 }
 0x11e   : > { %2141 = vmatpush.bf16.msra.mxu0 %v3373_v21  ;;  %2155 = vmatpush.bf16.msra.mxu1 %v3437_v24  ;;  %v1667_v33 = vadd.f32 %v4374_v20, %v1653_v2  ;;  %v1655_v37 = vadd.f32 %v1654_v52, %v1641_v11 }
 0x11f   : > { %2169 = vmatpush.bf16.msra.mxu2 %v3377_v25 }
 0x120   : > { %2183 = vmatpush.bf16.msra.mxu3 %v3441_v29  ;;  %v1669_v27 = vadd.f32 %v1668_v53, %v1655_v37 }
 0x122   : > { %2142 = vmatpush.bf16.msra.mxu0 %v3365_v36  ;;  %2156 = vmatpush.bf16.msra.mxu1 %v3429_v40  ;;  %v1708_v61 = vpop.f32.mrf.mxu0  ;;  %v1722_v63 = vpop.f32.mrf.mxu1 }
 0x123   : > { %2170 = vmatpush.bf16.msra.mxu2 %v3369_v42  ;;  %v1709_v62 = vadd.f32 %v1708_v61, %v1695_v10 }
 0x124   : > { %2184 = vmatpush.bf16.msra.mxu3 %v3433_v46 }
 0x125   : > { %2143 = vmatmul.bf16.vlgmr.msra.gmra.mxu0 %v1935_v50  ;;  %2157 = vmatmul.bf16.vlgmr.msra.gmra.mxu1 %v1936_v51  ;;  %v1723_v13 = vadd.f32 %v1722_v63, %v1709_v62 }
 0x126   : > { %2171 = vmatmul.bf16.vlgmr.msra.gmra.mxu2 %v1935_v50 }
 0x127   : > { %2185 = vmatmul.bf16.vlgmr.msra.gmra.mxu3 %v1936_v51  ;;  %v592_v51 = vperm.slane %v4372_v19, 3 }
 0x12a   : > { %v1710_v41 = vpop.f32.mrf.mxu0  ;;  %v1750_v9 = vpop.f32.mrf.mxu3 }
 0x12b   : > { %v1736_v7 = vpop.f32.mrf.mxu2  ;;  %v1711_v12 = vadd.f32 %v1710_v41, %v1697_v5  ;;  %v1724_v47 = vpop.f32.mrf.mxu1 }
 0x12c   : > { %v1737_v8 = vadd.f32 %v1736_v7, %v1723_v13 }
 0x12d   : > { %v1725_v21 = vadd.f32 %v1724_v47, %v1711_v12 }
 0x12e   : > { %v1751_v14 = vadd.f32 %v1750_v9, %v1737_v8 }
 0x130   : > { %v1923_v15 = vpack.c.bf16 %v1751_v14, %v1667_v33 }
 0x132   : > { %v2205_v17 = vunpack.c.l.b16 %v1923_v15  ;;  %v2206_v18 = vunpack.c.h.b16 %v1923_v15  ;;  %v1752_v26 = vpop.f32.mrf.mxu3 }
 0x133   : > { %v1738_v16 = vpop.f32.mrf.mxu2 }
 0x134   : > { %v2207_v24 = vpack.c.b16 %v2205_v17, %v2205_v17  ;;  %v2208_v6 = vpack.c.b16 %v2206_v18, %v2206_v18  ;;  %v1739_v25 = vadd.f32 %v1738_v16, %v1725_v21 }
 0x136   : > { %v1753_v28 = vadd.f32 %v1752_v26, %v1739_v25  ;;  %2218 = vmatpush.bf16.xpose.msrb.mxu0 %v2207_v24  ;;  %2231 = vmatpush.bf16.xpose.msrb.mxu1 %v2208_v6 }
 0x138   : > { %v1925_v20 = vpack.c.bf16 %v1753_v28, %v1669_v27 }
 0x13a   : > { %v2245_v29 = vunpack.c.l.b16 %v1925_v20  ;;  %v2246_v3 = vunpack.c.h.b16 %v1925_v20 }
 0x13c   : > { %v2247_v30 = vpack.c.b16 %v2245_v29, %v2245_v29  ;;  %v2248_v31 = vpack.c.b16 %v2246_v3, %v2246_v3 }
 0x13e   : > { %2258 = vmatpush.bf16.xpose.msrb.mxu2 %v2247_v30  ;;  %2271 = vmatpush.bf16.xpose.msrb.mxu3 %v2248_v31 }
 0x142   : > { %v1764_v22 = vpop.f32.mrf.mxu0  ;;  %v1778_v32 = vpop.f32.mrf.mxu1 }
 0x143   : > { %v1765_v52 = vadd.f32 %v1764_v22, %v591_v48 }
 0x145   : > { %v1779_v10 = vadd.f32 %v1778_v32, %v1765_v52 }
 0x14a   : > { %v1806_v35 = vpop.f32.mrf.mxu3  ;;  %v1766_v36 = vpop.f32.mrf.mxu0 }
 0x14b   : > { %v1792_v34 = vpop.f32.mrf.mxu2  ;;  %v1780_v23 = vpop.f32.mrf.mxu1  ;;  %v1767_v59 = vadd.f32 %v1766_v36, %v591_v48  ;;  %v1969_v36 = vld [vmem:[#allocation9] sm:$0x3] }
 0x14c   : > { %v1793_v60 = vadd.f32 %v1792_v34, %v1779_v10 }
 0x14d   : > { %v1781_v57 = vadd.f32 %v1780_v23, %v1767_v59  ;;  %v1971_v23 = vperm.slane %v1969_v36, 0 }
 0x14e   : > { %v1807_v1 = vadd.f32 %v1806_v35, %v1793_v60 }
 0x152   : > { %v1808_v42 = vpop.f32.mrf.mxu3 }
 0x153   : > { %v1794_v40 = vpop.f32.mrf.mxu2 }
 0x154   : > { %v1795_v5 = vadd.f32 %v1794_v40, %v1781_v57 }
 0x156   : > { %v1809_v11 = vadd.f32 %v1808_v42, %v1795_v5 }
 0x162   : > { %v1820_v45 = vpop.f32.mrf.mxu0  ;;  %v1834_v46 = vpop.f32.mrf.mxu1 }
 0x163   : > { %v1821_v4 = vadd.f32 %v1820_v45, %v1807_v1  ;;  %v1972_v45 = vperm.slane %v1969_v36, 1 }
 0x165   : > { %v1835_v33 = vadd.f32 %v1834_v46, %v1821_v4 }
 0x16a   : > { %v1862_v50 = vpop.f32.mrf.mxu3  ;;  %v1822_v53 = vpop.f32.mrf.mxu0 }
 0x16b   : > { %v1848_v49 = vpop.f32.mrf.mxu2  ;;  %v1836_v54 = vpop.f32.mrf.mxu1  ;;  %v1823_v37 = vadd.f32 %v1822_v53, %v1809_v11 }
 0x16c   : > { %v1849_v55 = vadd.f32 %v1848_v49, %v592_v51 }
 0x16d   : > { %v1837_v27 = vadd.f32 %v1836_v54, %v1823_v37 }
 0x16e   : > { %v1863_v56 = vadd.f32 %v1862_v50, %v1849_v55 }
 0x172   : > { %v1864_v61 = vpop.f32.mrf.mxu3 }
 0x173   : > { %v1850_v58 = vpop.f32.mrf.mxu2 }
 0x174   : > { %v1851_v13 = vadd.f32 %v1850_v58, %v592_v51 }
 0x176   : > { %v1865_v19 = vadd.f32 %v1864_v61, %v1851_v13 }
 0x182   : > { %v1876_v62 = vpop.f32.mrf.mxu0  ;;  %v1890_v0 = vpop.f32.mrf.mxu1 }
 0x183   : > { %v1877_v63 = vadd.f32 %v1876_v62, %v1863_v56 }
 0x185   : > { %v1891_v2 = vadd.f32 %v1890_v0, %v1877_v63 }
 0x18a   : > { %v1878_v41 = vpop.f32.mrf.mxu0  ;;  %v1918_v9 = vpop.f32.mrf.mxu3 }
 0x18b   : > { %v1904_v7 = vpop.f32.mrf.mxu2  ;;  %v1879_v12 = vadd.f32 %v1878_v41, %v1865_v19  ;;  %v1892_v47 = vpop.f32.mrf.mxu1 }
 0x18c   : > { %v1905_v8 = vadd.f32 %v1904_v7, %v1891_v2 }
 0x18d   : > { %v1893_v21 = vadd.f32 %v1892_v47, %v1879_v12 }
 0x18e   : > { %v1919_v14 = vadd.f32 %v1918_v9, %v1905_v8 }
 0x190   : > { %v1924_v15 = vpack.c.bf16 %v1919_v14, %v1835_v33 }
 0x192   : > { %v2299_v17 = vunpack.c.l.b16 %v1924_v15  ;;  %v2300_v18 = vunpack.c.h.b16 %v1924_v15  ;;  %v1920_v26 = vpop.f32.mrf.mxu3 }
 0x193   : > { %v1906_v16 = vpop.f32.mrf.mxu2 }
 0x194   : > { %v2301_v24 = vpack.c.b16 %v2299_v17, %v2299_v17  ;;  %v2302_v6 = vpack.c.b16 %v2300_v18, %v2300_v18  ;;  %v1907_v25 = vadd.f32 %v1906_v16, %v1893_v21 }
 0x196   : > { %v1921_v28 = vadd.f32 %v1920_v26, %v1907_v25  ;;  %v2308_v20 = vsel %vm2306_vm0, %v2301_v24, 0  ;;  %v2311_v29 = vsel %vm2306_vm0, %v2302_v6, 0 }
 0x197   : > { %2320 = vmatpush.bf16.msra.mxu0 %v2308_v20  ;;  %2333 = vmatpush.bf16.msra.mxu1 %v2311_v29 }
 0x198   : > { %v1926_v3 = vpack.c.bf16 %v1921_v28, %v1837_v27 }
 0x19a   : > { %v2340_v30 = vunpack.c.l.b16 %v1926_v3  ;;  %v2341_v31 = vunpack.c.h.b16 %v1926_v3 }
 0x19c   : > { %v2342_v22 = vpack.c.b16 %v2340_v30, %v2340_v30  ;;  %v2343_v32 = vpack.c.b16 %v2341_v31, %v2341_v31 }
 0x19e   : > { %v2348_v34 = vsel %vm2306_vm0, %v2342_v22, 0  ;;  %v2351_v35 = vsel %vm2306_vm0, %v2343_v32, 0 }
 0x19f   : > { %2360 = vmatpush.bf16.msra.mxu2 %v2348_v34  ;;  %2373 = vmatpush.bf16.msra.mxu3 %v2351_v35 }
 0x1a2   : > { %v2144_v40 = vpop.f32.mrf.mxu0  ;;  %v2158_v46 = vpop.f32.mrf.mxu1 }
 0x1a3   : > { %v2145_v42 = vadd.f32 %v2144_v40, %v1971_v23 }
 0x1a5   : > { %v2159_v49 = vadd.f32 %v2158_v46, %v2145_v42 }
 0x1a9   : > { %v2172_v48 = vpop.f32.mrf.mxu2 }
 0x1aa   : > { %v2173_v50 = vadd.f32 %v2172_v48, %v1972_v45  ;;  %v2186_v51 = vpop.f32.mrf.mxu3  ;;  %v2146_v53 = vpop.f32.mrf.mxu0 }
 0x1ab   : > { %v2147_v56 = vadd.f32 %v2146_v53, %v1971_v23  ;;  %v2160_v62 = vpop.f32.mrf.mxu1 }
 0x1ac   : > { %v2187_v52 = vadd.f32 %v2186_v51, %v2173_v50 }
 0x1ad   : > { %v2161_v0 = vadd.f32 %v2160_v62, %v2147_v56 }
 0x1ae   : > { %v2191_v54 = vpack.c.bf16 %v2187_v52, %v2159_v49 }
 0x1b0   : > { %v2198_v55 = vunpack.c.l.b16 %v2191_v54  ;;  %v2199_v10 = vunpack.c.h.b16 %v2191_v54 }
 0x1b1   : > { %v2174_v58 = vpop.f32.mrf.mxu2 }
 0x1b2   : > { %v2200_v59 = vpack.c.b16 %v2198_v55, %v2198_v55  ;;  %v2201_v60 = vpack.c.b16 %v2199_v10, %v2199_v10  ;;  %v2175_v61 = vadd.f32 %v2174_v58, %v1972_v45  ;;  %v2188_v63 = vpop.f32.mrf.mxu3 }
 0x1b4   : > { %v2189_v57 = vadd.f32 %v2188_v63, %v2175_v61  ;;  %2219 = vmatmul.bf16.vlgmr.msrb.gmra.mxu0 %v2200_v59  ;;  %2232 = vmatmul.bf16.vlgmr.msrb.gmra.mxu1 %v2201_v60 }
 0x1b6   : > { %v2192_v1 = vpack.c.bf16 %v2189_v57, %v2161_v0 }
 0x1b8   : > { %v2238_v13 = vunpack.c.l.b16 %v2192_v1  ;;  %v2239_v2 = vunpack.c.h.b16 %v2192_v1 }
 0x1ba   : > { %v2240_v4 = vpack.c.b16 %v2238_v13, %v2238_v13  ;;  %v2241_v5 = vpack.c.b16 %v2239_v2, %v2239_v2 }
 0x1bc   : > { %2259 = vmatmul.bf16.vlgmr.msrb.gmra.mxu2 %v2240_v4  ;;  %2272 = vmatmul.bf16.vlgmr.msrb.gmra.mxu3 %v2241_v5 }
 0x231   : > { %v2220_v19 = vpop.f32.mrf.mxu0  ;;  %v2233_v7 = vpop.f32.mrf.mxu1 }
 0x232   : > { %v2234_v14 = vadd.f32 %v2233_v7, %v2220_v19 }
 0x234   : > { %v2278_v37 = vsel %vm2277_vm1, %v2234_v14, -inf }
 0x239   : > { %v2222_v8 = vpop.f32.mrf.mxu0  ;;  %v2235_v41 = vpop.f32.mrf.mxu1 }
 0x23f   : > { %v2260_v9 = vpop.f32.mrf.mxu2  ;;  %v2273_v33 = vpop.f32.mrf.mxu3 }
 0x240   : > { %v2274_v11 = vadd.f32 %v2273_v33, %v2260_v9 }
 0x242   : > { %v2281_v12 = vsel %vm2277_vm1, %v2274_v11, -inf }
 0x243   : > { %2282 = vmax.xlane.f32.xlu0 %v2281_v12 }
 0x247   : > { %v2262_v47 = vpop.f32.mrf.mxu2  ;;  %v2275_v15 = vpop.f32.mrf.mxu3 }
 0x24b   : > { %2279 = vmax.xlane.f32.xlu0 %v2278_v37 }
 0x2b6   : > { %v2283_v17 = vpop.xlane.xlu0 %2282 }
 0x2b7   : > { %v2285_v18 = vsub.f32 %v2274_v11, %v2283_v17 }
 0x2b9   : > { %v2288_v21 = vmul.f32 1.442695, %v2285_v18 }
 0x2bb   : > { %3843 = vpow2.f32 %v2288_v21 }
 0x2be   : > { %v2280_v16 = vpop.xlane.xlu0 %2279 }
 0x2bf   : > { %v2284_v24 = vsub.f32 %v2234_v14, %v2280_v16 }
 0x2c1   : > { %v3844_v6 = vpop.eup %3843  ;;  %v2286_v25 = vmul.f32 1.442695, %v2284_v24 }
 0x2c2   : > { %v2297_v26 = vpack.c.bf16 %v3844_v6, %v3844_v6  ;;  %v2293_v29 = vsel %vm2277_vm1, %v3844_v6, 0.0 }
 0x2c3   : > { %3845 = vpow2.f32 %v2286_v25 }
 0x2c4   : > { %3492 = vmatmul.msk.bf16.vlgmr.msra.gmra.mxu2 %vm2277_vm1, %v2297_v26  ;;  %3493 = vmatmul.msk.bf16.vlgmr.msra.gmra.mxu3 %vm2277_vm1, %v2297_v26 }
 0x2c9   : > { %v3846_v27 = vpop.eup %3845 }
 0x2ca   : > { %v2296_v28 = vpack.c.bf16 %v3846_v27, %v3846_v27  ;;  %v2290_v20 = vsel %vm2277_vm1, %v3846_v27, 0.0 }
 0x2cb   : > { %2291 = vadd.xlane.f32.xlu1 %v2290_v20 }
 0x2cc   : > { %3490 = vmatmul.msk.bf16.vlgmr.msra.gmra.mxu0 %vm2277_vm1, %v2296_v28  ;;  %3491 = vmatmul.msk.bf16.vlgmr.msra.gmra.mxu1 %vm2277_vm1, %v2296_v28 }
 0x2d3   : > { %2294 = vadd.xlane.f32.xlu1 %v2293_v29 }
 0x33e   : > { %v2292_v3 = vpop.xlane.xlu1 %2291 }
 0x33f   : > { %3847 = vrcp.f32 %v2292_v3 }
 0x345   : > { %v3848_v32 = vpop.eup %3847 }
 0x346   : > { %v2295_v30 = vpop.xlane.xlu1 %2294 }
 0x347   : > { %3849 = vrcp.f32 %v2295_v30  ;;  %v2362_v31 = vpop.f32.mrf.mxu2  ;;  %v2375_v22 = vpop.f32.mrf.mxu3 }
 0x349   : > { %v2322_v34 = vpop.f32.mrf.mxu0  ;;  %v2335_v35 = vpop.f32.mrf.mxu1 }
 0x34a   : > { %v2381_v36 = vmul.f32 %v3848_v32, %v2322_v34  ;;  %v2382_v23 = vmul.f32 %v3848_v32, %v2335_v35 }
 0x34c   : > { %v2385_v40 = vadd.f32 %v2381_v36, %v4378_v38  ;;  %v2386_v42 = vadd.f32 %v2382_v23, %v4384_v43 }
 0x34d   : > { %v3850_v45 = vpop.eup %3849 }
 0x34e   : > { %v2383_v46 = vmul.f32 %v3850_v45, %v2362_v31  ;;  %v2384_v48 = vmul.f32 %v3850_v45, %v2375_v22  ;;  %2389 = vst [vmem:[%s380_s12] sm:$0xff] %v2385_v40 }
 0x34f   : > { %2390 = vst [vmem:[%s380_s12 + $0x8] sm:$0xff] %v2386_v42  ;;  %v2364_v49 = vpop.f32.mrf.mxu2  ;;  %v2377_v50 = vpop.f32.mrf.mxu3 }
 0x350   : > { %v2387_v51 = vadd.f32 %v2383_v46, %v4381_v39  ;;  %v2388_v52 = vadd.f32 %v2384_v48, %v4387_v44 }
 0x351   : > { %v2324_v38 = vpop.f32.mrf.mxu0  ;;  %v2337_v53 = vpop.f32.mrf.mxu1 }
 0x352   : > { %2391 = vst [vmem:[%s380_s12 + $0x10] sm:$0xff] %v2387_v51 }
 0x353   : > { %2392 = vst [vmem:[%s380_s12 + $0x18] sm:$0xff] %v2388_v52 }
 0x354   : > { %4028 = shalt.err (!%p4025_p0)
}
 0x355   : > { %s4106_s2 = smov 256   ;;  %s4107_s17 = smov 16  }
 0x356   : > { %3753 = dma.vmem_to_hbm [thread:$0]  (%p4231_p3), %s4426_s8, 512, %s2412_s15, %s2394_s24, %s4106_s2, %s4106_s2, %s4107_s17  }
 0x357 PF: > { %s4499_s0 = sld [smem:[#allocation19_spill]]  ;;  %s2426_s3 = sand.u32 1, %s4075_s21  }
 0x358   : > { %p3773_p5 = pnand %p2556_p11, %p4188_p6  ;;  %s2427_s23 = scalar_lea.sflag [#allocation5], %s2426_s3 }
 0x35a   : > { %p3774_p7 = pneg %p3773_p5 }
 0x35c   : > { %4070 = dma.done.wait (%p3774_p7), %s2427_s23, 512  }
 0x35d   : > { %4072 = vsyncadd (%p3774_p7), %s2427_s23, 4294966784  ;;  %s26_s26 = sadd.s32 1, %s4499_s0   ;;  %s4500_s27 = sld [smem:[#allocation18_spill]] }
 0x35e   : > { %p23_p9 = scmp.ge.s32.totalorder %s26_s26, 4   ;;  %s4501_s23 = sld [smem:[#allocation21_spill]] }
 0x35f   : > { %s4502_s16 = sld [smem:[#allocation20_spill]]  ;;  %s4503_s21 = smov %s4079_s22 }
 0x360   : > { %s4505_s24 = smov %s4091_s25 }
 0x361   :  { %25 = sbr.rel (!%p23_p9) target bundleno = 14 (0xe), region = 118 }
 0x363   : > { %s4504_s22 = smov %s4500_s27 }
 0x365   : > { %s4506_s25 = smov %s4502_s16 }
 0x366   :  { %2433 = vsyncpa [#allocation4], 1 }
 0x367   :  { %2435 = vsyncpa [#allocation4 + $0x1], 1 }
 0x368   :  { %2436 = vsyncpa [#allocation7], 1 }
 0x369   :  { %2438 = vsyncpa [#allocation7 + $0x1], 1 }
 0x36a   :  { %2439 = vsyncpa [#allocation10], 1 }
 0x36b   :  { %2440 = vsyncpa [#allocation5], 1 }
 0x36c   :  { %2442 = vsyncpa [#allocation5 + $0x1], 1 }

// kernel: tpu_custom_call.1
= control target key start
LH: loop header
LB: loop body
LE: loop exit
PB: predicated region body
PF: predicated region fallthrough
CT: control target
= control target key end

     0   :  { %s4465_s0 = inlined_call_operand.hbm [shape: f32[4,8,256], index: 0, kind: input, shape index: {}]   ;;  %s4466_s1 = inlined_call_operand.hbm [shape: bf16[4,8,768], index: 1, kind: input, shape index: {}]   ;;  %s4467_s2 = inlined_call_operand.hbm [shape: bf16[256,256], index: 2, kind: input, shape index: {}]   ;;  %s4468_s3 = inlined_call_operand.hbm [shape: f32[1,256], index: 3, kind: input, shape index: {}]   ;;  %s4469_s4 = inlined_call_operand.hbm [shape: bf16[768,512], index: 4, kind: input, shape index: {}]   ;;  %s4470_s5 = inlined_call_operand.vmem [shape: f32[1,512], index: 5, kind: input, shape index: {}]   ;;  %s4471_s6 = inlined_call_operand.hbm [shape: f32[4,8,256], index: 6, kind: output, shape index: {}]  }
   0x1   :  { %4478 = sst [smem:[#allocation22_spill]] %s4465_s0 }
   0x2   :  { %4479 = sst [smem:[#allocation23_spill]] %s4467_s2 }
   0x3   :  { %4480 = sst [smem:[#allocation24_spill]] %s4468_s3 }
   0x4   :  { %4481 = sst [smem:[#allocation25_spill]] %s4469_s4 }
   0x5   :  { %11 = vsyncpa [#allocation4], 0 }
   0x6   :  { %13 = vsyncpa [#allocation4 + $0x1], 0 }
   0x7   :  { %14 = vsyncpa [#allocation7], 0 }
   0x8   :  { %16 = vsyncpa [#allocation7 + $0x1], 0 }
   0x9   :  { %17 = vsyncpa [#allocation10], 0 }
   0xa   :  { %18 = vsyncpa [#allocation5], 0 }
   0xb   :  { %20 = vsyncpa [#allocation5 + $0x1], 0  ;;  %s4143_s21 = smov 0   ;;  %s4145_s22 = smov 0  }
   0xc   :  { %s4147_s23 = smov 0   ;;  %s4149_s24 = smov 0  }
   0xd   :  { %s4151_s25 = smov 0   ;;  %s4153_s26 = smov 0  }
   0xe LB: > { %4482 = sst [smem:[#allocation18_spill]] %s4083_s23  ;;  %s4174_s27 = sadd.s32 4294967295, %s4095_s26   ;;  %s4095_s26 = sphi %s4153_s26, %s26_s26   ;;  %s4091_s25 = sphi %s4151_s25, %s4506_s25   ;;  %s4087_s24 = sphi %s4149_s24, %s4505_s24   ;;  %s4083_s23 = sphi %s4147_s23, %s4501_s23   ;;  %s4079_s22 = sphi %s4145_s22, %s4504_s22   ;;  %s4075_s21 = sphi %s4143_s21, %s4503_s21  }
   0xf   : > { %4483 = sst [smem:[#allocation19_spill]] %s4095_s26  ;;  %s2551_s28 = sadd.s32 4294967294, %s4095_s26  }
  0x10   : > { %p60_p0 = scmp.ne.s32.totalorder %s4079_s22, %s4075_s21  ;;  %p61_p1 = scmp.eq.s32.totalorder %s4174_s27, 0 }
  0x11   : > { %p196_p2 = scmp.eq.s32.totalorder %s4174_s27, 1  ;;  %p202_p3 = scmp.eq.s32.totalorder %s2551_s28, 1 }
  0x12   : > { %p4183_p4 = por %p61_p1, %p60_p0  ;;  %p2552_p5 = scmp.ge.s32.totalorder %s4095_s26, 1 }
  0x13   : > { %p4188_p6 = por %p202_p3, %p60_p0  ;;  %p209_p7 = scmp.lt.s32.totalorder %s4095_s26, 3 }
  0x14   : > { %s4486_s2 = sld [smem:[#allocation23_spill]]  ;;  %s4097_s11 = smov [#allocation8]  }
  0x15   : > { %p4196_p8 = pnand %p2552_p5, %p209_p7  ;;  %s222_s12 = sshll.u32 %s4097_s11, 4  ;;  %s223_s12 = int_to_ptr.vmem [resolvable:$true] %s222_s12 }
  0x16   : > { %p2556_p11 = scmp.ge.s32.totalorder %s4095_s26, 2  ;;  %s4489_s3 = sld [smem:[#allocation24_spill]] }
  0x17   : > { %p3755_p9 = pneg %p4196_p8  ;;  %s4098_s17 = smov 128  }
  0x18   : > { %s4099_s18 = smov 8   ;;  %s4100_s19 = smov [#allocation9]  }
  0x19   : > { %p4204_p10 = pnand %p3755_p9, %p61_p1  ;;  %s237_s20 = sshll.u32 %s4100_s19, 4  ;;  %s238_s20 = int_to_ptr.vmem [resolvable:$true] %s237_s20 }
  0x1a   : > { %s220_s9 = sshll.u32 %s4486_s2, 4  ;;  %s4490_s4 = sld [smem:[#allocation25_spill]]  ;;  %s221_s9 = int_to_ptr.hbm [resolvable:$true] %s220_s9 }
  0x1b   : > { %3758 = dma.hbm_to_vmem [thread:$0]  (!%p4204_p10), %s221_s9, 4096, %s223_s12, [#allocation7], %s4098_s17, %s4098_s17, %s4099_s18  }
  0x1c   : > { %s235_s16 = sshll.u32 %s4489_s3, 4  ;;  %s4101_s11 = smov [#allocation11]   ;;  %s236_s16 = int_to_ptr.hbm [resolvable:$true] %s235_s16 }
  0x1d   : > { %3761 = dma.hbm_to_vmem [thread:$0]  (!%p4204_p10), %s236_s16, 32, %s238_s20, [#allocation10]  }
  0x1e   : > { %s248_s14 = sshll.u32 %s4101_s11, 4  ;;  %s4472_s15 = smov 256   ;;  %s249_s14 = int_to_ptr.vmem [resolvable:$true] %s248_s14 }
  0x1f   : > { %s4473_s9 = smov 16   ;;  %s47_s12 = sadd.s32 1, %s4083_s23 }
  0x20   : > { %s246_s8 = sshll.u32 %s4490_s4, 4  ;;  %s38_s17 = sadd.s32 1, %s4091_s25  ;;  %s247_s8 = int_to_ptr.hbm [resolvable:$true] %s246_s8 }
  0x21   : > { %3764 = dma.hbm_to_vmem [thread:$0]  (!%p4204_p10), %s247_s8, 24576, %s249_s14, [#allocation10], %s4472_s15, %s4472_s15, %s4473_s9  }
  0x22   : > { %p54_p12 = scmp.ne.s32.totalorder %s4083_s23, %s4079_s22  ;;  %p40_p13 = scmp.ge.s32.totalorder %s38_s17, 2 }
  0x23   : > { %p55_p0 = scmp.eq.s32.totalorder %s4095_s26, 0  ;;  %p3779_p5 = scmp.lt.s32.totalorder %s4095_s26, 2 }
  0x24   : > { %p4231_p3 = por %p196_p2, %p54_p12  ;;  %s4508_s17 = smov (%p40_p13, %s38_s17), 0 }
  0x25   : > { %4492 = sst [smem:[#allocation20_spill]] %s4508_s17  ;;  %p4238_p7 = por %p55_p0, %p54_p12 }
  0x26   : > { %s265_s18 = sand.u32 1, %s4083_s23   ;;  %s42_s19 = ssub.s32 %s4091_s25, %s4508_s17 }
  0x27   : > { %p45_p9 = scmp.eq.s32.totalorder %s42_s19, 0  ;;  %s2557_s20 = sshll.u32 %s265_s18, 5 }
  0x28   : > { %s3501_s28 = sshll.u32 %s4091_s25, 5  ;;  %s4495_s0 = sld [smem:[#allocation22_spill]] }
  0x29   : > { %s4247_s7 = scalar_select %p45_p9, %s4083_s23, %s47_s12  }
  0x2a   : > { %s269_s15 = scalar_lea.vmem [#allocation3], %s2557_s20  ;;  %p4256_p2 = pnand %p3779_p5, %p4238_p7 }
  0x2b   : > { %4494 = sst [smem:[#allocation21_spill]] %s4247_s7  ;;  %s280_s9 = sshll.u32 %s269_s15, 4  ;;  %s281_s9 = int_to_ptr.vmem [resolvable:$true] %s280_s9 }
  0x2c   : > { %s290_s19 = sand.u32 1, %s4095_s26   ;;  %s3734_s12 = smul.u32 48, %s265_s18 }
  0x2d   : > { %s266_s4 = scalar_lea.sflag [#allocation4], %s265_s18  ;;  %s4497_s17 = smov 16  }
  0x2e   : > { %s277_s14 = scalar_lea.hbm %s4495_s0, %s3501_s28  ;;  %s4498_s8 = smov 256  }
  0x2f   : > { %s278_s2 = sshll.u32 %s277_s14, 4  ;;  %s3735_s15 = smul.u32 48, %s4091_s25  ;;  %s279_s2 = int_to_ptr.hbm [resolvable:$true] %s278_s2 }
  0x30   : > { %3768 = dma.hbm_to_vmem [thread:$0]  (!%p4256_p2), %s279_s2, 512, %s281_s9, %s266_s4, %s4498_s8, %s4498_s8, %s4497_s17  }
  0x31   : > { %s294_s20 = scalar_lea.vmem [#allocation6], %s3734_s12  ;;  %s300_s14 = scalar_lea.hbm %s4466_s1, %s3735_s15 }
  0x32   : > { %s303_s28 = sshll.u32 %s294_s20, 4  ;;  %s301_s0 = sshll.u32 %s300_s14, 4  ;;  %s304_s28 = int_to_ptr.vmem [resolvable:$true] %s303_s28  ;;  %s302_s0 = int_to_ptr.hbm [resolvable:$true] %s301_s0 }
  0x33   : > { %s291_s7 = scalar_lea.sflag [#allocation7], %s290_s19  ;;  %s4104_s23 = smov 384  }
  0x34   : > { %s4105_s26 = smov 24   ;;  %315 = sbr.rel (%p4196_p8) target bundleno = 855 (0x357), region = 44 }
  0x35   : > { %3771 = dma.hbm_to_vmem [thread:$0]  (!%p4256_p2), %s302_s0, 768, %s304_s28, %s291_s7, %s4104_s23, %s4104_s23, %s4105_s26  }
  0x36   : > { %s4275_s2 = sand.u32 (!%p4196_p8), 1, %s4079_s22  }
  0x37   : > { %s2565_s4 = sshll.u32 (!%p4196_p8), %s4275_s2, 5  ;;  %s318_s9 = scalar_lea.sflag (!%p4196_p8), [#allocation4], %s4275_s2 }
  0x38   : > { %s4281_s17 = scalar_lea.vmem (!%p4196_p8), [#allocation3], %s2565_s4 }
  0x39   : > { %4054 = dma.done.wait (%p4183_p4), %s318_s9, 512  }
  0x3a   : > { %4056 = vsyncadd (%p4183_p4), %s318_s9, 4294966784  ;;  %s327_s0 = sand.u32 1, %s4174_s27   ;;  %s3736_s3 = smul.u32 48, %s4275_s2 }
  0x3b   : > { %s328_s23 = scalar_lea.sflag [#allocation7], %s327_s0 }
  0x3c   : > { %s4289_s26 = scalar_lea.vmem [#allocation6], %s3736_s3 }
  0x3d   : > { %4058 = dma.done.wait (%p4183_p4), %s328_s23, 768  }
  0x3e   : > { %4060 = vsyncadd (%p4183_p4), %s328_s23, 4294966528 }
  0x3f   : > { %4062 = dma.done.wait (%p61_p1), [#allocation7], 4096  }
  0x40   : > { %4064 = vsyncadd (%p61_p1), [#allocation7], 4294963200 }
  0x41   : > { %4066 = dma.done.wait (%p61_p1), [#allocation10], 24608  }
  0x42   : > { %4068 = vsyncadd (%p61_p1), [#allocation10], 4294942688  ;;  %v2708_v0 = vld [vmem:[#allocation11 + $0xe0] sm:$0xf]  ;;  %v3538_v1 = vld [vmem:[#allocation11 + $0xec] sm:$0xf0] }
  0x43   : > { %v2836_v2 = vld [vmem:[#allocation11 + $0x1e0] sm:$0xf]  ;;  %v2709_v3 = vor.u32 %v3538_v1, %v2708_v0  ;;  %v3570_v4 = vld [vmem:[#allocation11 + $0x1ec] sm:$0xf0]  ;;  %vm2306_vm0 = vcmask 1043456   ;;  %vm2277_vm1 = vcmask 64512  }
  0x44   : > { %v2964_v5 = vld [vmem:[#allocation11 + $0x2e0] sm:$0xf]  ;;  %v3602_v6 = vld [vmem:[#allocation11 + $0x2ec] sm:$0xf0]  ;;  %v2837_v7 = vor.u32 %v3570_v4, %v2836_v2  ;;  %s3733_s10 = sshll.u32 %s4087_s24, 5  ;;  %s380_s12 = scalar_lea.vmem [#allocation12], %s2565_s4 }
  0x45   : > { %v2965_v8 = vor.u32 %v3602_v6, %v2964_v5  ;;  %v3092_v9 = vld [vmem:[#allocation11 + $0x3e0] sm:$0xf]  ;;  %v3634_v10 = vld [vmem:[#allocation11 + $0x3ec] sm:$0xf0]  ;;  %1587 = vmatpush.bf16.msra.mxu0 %v2709_v3  ;;  %s2408_s19 = scalar_lea.hbm %s4471_s6, %s3733_s10  ;;  %s2409_s8 = sshll.u32 %s380_s12, 4  ;;  %s4426_s8 = int_to_ptr.vmem [resolvable:$true] %s2409_s8 }
  0x46   : > { %v2692_v11 = vld [vmem:[#allocation11 + $0xc0] sm:$0xf]  ;;  %v3093_v12 = vor.u32 %v3634_v10, %v3092_v9  ;;  %v3534_v13 = vld [vmem:[#allocation11 + $0xcc] sm:$0xf0]  ;;  %1601 = vmatpush.bf16.msra.mxu1 %v2837_v7  ;;  %s2411_s15 = sshll.u32 %s2408_s19, 4  ;;  %s2394_s24 = scalar_lea.sflag [#allocation5], %s4275_s2  ;;  %s2412_s15 = int_to_ptr.hbm [resolvable:$true] %s2411_s15 }
  0x47   : > { %v2820_v14 = vld [vmem:[#allocation11 + $0x1c0] sm:$0xf]  ;;  %v3566_v15 = vld [vmem:[#allocation11 + $0x1cc] sm:$0xf0]  ;;  %1615 = vmatpush.bf16.msra.mxu2 %v2965_v8  ;;  %v2693_v16 = vor.u32 %v3534_v13, %v2692_v11  ;;  %s4015_s20 = sshra.s32 %s2412_s15, 4  ;;  %s4021_s14 = scalar_lea.hbm %s4471_s6, 64  ;;  %s4016_s20 = int_to_ptr.hbm [resolvable:$true] %s4015_s20 }
  0x48   : > { %v2821_v17 = vor.u32 %v3566_v15, %v2820_v14  ;;  %v2948_v18 = vld [vmem:[#allocation11 + $0x2c0] sm:$0xf]  ;;  %v3598_v19 = vld [vmem:[#allocation11 + $0x2cc] sm:$0xf0]  ;;  %1629 = vmatpush.bf16.msra.mxu3 %v3093_v12  ;;  %s4017_s28 = scalar_lea.hbm %s4016_s20, 32  ;;  %p4022_p10 = scmp.lt.s32.totalorder %s4016_s20, %s4471_s6 }
  0x49   : > { %v3076_v20 = vld [vmem:[#allocation11 + $0x3c0] sm:$0xf]  ;;  %v2949_v21 = vor.u32 %v3598_v19, %v2948_v18  ;;  %v3630_v22 = vld [vmem:[#allocation11 + $0x3cc] sm:$0xf0]  ;;  %1588 = vmatpush.bf16.msra.mxu0 %v2693_v16  ;;  %p4018_p1 = scmp.ne.s32.totalorder %s4016_s20, %s4017_s28  ;;  %p4023_p12 = scmp.lt.s32.totalorder %s4021_s14, %s4017_s28 }
  0x4a   : > { %v2676_v23 = vld [vmem:[#allocation11 + $0xa0] sm:$0xf]  ;;  %v3530_v24 = vld [vmem:[#allocation11 + $0xac] sm:$0xf0]  ;;  %v3077_v25 = vor.u32 %v3630_v22, %v3076_v20  ;;  %1602 = vmatpush.bf16.msra.mxu1 %v2821_v17 }
  0x4b   : > { %v2804_v26 = vld [vmem:[#allocation11 + $0x1a0] sm:$0xf]  ;;  %v3562_v27 = vld [vmem:[#allocation11 + $0x1ac] sm:$0xf0]  ;;  %v2677_v29 = vor.u32 %v3530_v24, %v2676_v23  ;;  %1616 = vmatpush.bf16.msra.mxu2 %v2949_v21  ;;  %p4019_p4 = pnand %p4018_p1, %p4231_p3  ;;  %p4024_p13 = por %p4023_p12, %p4022_p10 }
  0x4c   : > { %v2932_v28 = vld [vmem:[#allocation11 + $0x2a0] sm:$0xf]  ;;  %v3594_v30 = vld [vmem:[#allocation11 + $0x2ac] sm:$0xf0]  ;;  %v2805_v33 = vor.u32 %v3562_v27, %v2804_v26  ;;  %1630 = vmatpush.bf16.msra.mxu3 %v3077_v25 }
  0x4d   : > { %v3060_v31 = vld [vmem:[#allocation11 + $0x3a0] sm:$0xf]  ;;  %v3626_v32 = vld [vmem:[#allocation11 + $0x3ac] sm:$0xf0]  ;;  %v2933_v34 = vor.u32 %v3594_v30, %v2932_v28  ;;  %1589 = vmatpush.bf16.msra.mxu0 %v2677_v29  ;;  %p4020_p8 = pneg %p4019_p4 }
  0x4e   : > { %v2660_v35 = vld [vmem:[#allocation11 + $0x80] sm:$0xf]  ;;  %v3526_v36 = vld [vmem:[#allocation11 + $0x8c] sm:$0xf0]  ;;  %v3061_v38 = vor.u32 %v3626_v32, %v3060_v31  ;;  %1603 = vmatpush.bf16.msra.mxu1 %v2805_v33  ;;  %v3536_v33 = vld [vmem:[#allocation11 + $0xe4] sm:$0xf] }
  0x4f   : > { %v2788_v37 = vld [vmem:[#allocation11 + $0x180] sm:$0xf]  ;;  %v3558_v39 = vld [vmem:[#allocation11 + $0x18c] sm:$0xf0]  ;;  %v2661_v44 = vor.u32 %v3526_v36, %v2660_v35  ;;  %1617 = vmatpush.bf16.msra.mxu2 %v2933_v34  ;;  %v2710_v34 = vld [vmem:[#allocation11 + $0xf0] sm:$0xf0]  ;;  %p4025_p0 = pnand %p4024_p13, %p4020_p8 }
  0x50   : > { %v2916_v40 = vld [vmem:[#allocation11 + $0x280] sm:$0xf]  ;;  %v3590_v41 = vld [vmem:[#allocation11 + $0x28c] sm:$0xf0]  ;;  %v2789_v45 = vor.u32 %v3558_v39, %v2788_v37  ;;  %1631 = vmatpush.bf16.msra.mxu3 %v3061_v38  ;;  %v3568_v37 = vld [vmem:[#allocation11 + $0x1e4] sm:$0xf] }
  0x51   : > { %v3044_v42 = vld [vmem:[#allocation11 + $0x380] sm:$0xf]  ;;  %v3622_v43 = vld [vmem:[#allocation11 + $0x38c] sm:$0xf0]  ;;  %v2917_v46 = vor.u32 %v3590_v41, %v2916_v40  ;;  %1590 = vmatpush.bf16.msra.mxu0 %v2661_v44  ;;  %v2838_v38 = vld [vmem:[#allocation11 + $0x1f0] sm:$0xf0] }
  0x52   : > { %v2644_v47 = vld [vmem:[#allocation11 + $0x60] sm:$0xf]  ;;  %v3522_v48 = vld [vmem:[#allocation11 + $0x6c] sm:$0xf0]  ;;  %v3045_v50 = vor.u32 %v3622_v43, %v3044_v42  ;;  %1604 = vmatpush.bf16.msra.mxu1 %v2789_v45  ;;  %v2713_v43 = vor.u32 %v3536_v33, %v2710_v34  ;;  %v2646_v33 = vld [vmem:[#allocation11 + $0x70] sm:$0xf0] }
  0x53   : > { %v2772_v49 = vld [vmem:[#allocation11 + $0x160] sm:$0xf]  ;;  %v3554_v51 = vld [vmem:[#allocation11 + $0x16c] sm:$0xf0]  ;;  %v2645_v56 = vor.u32 %v3522_v48, %v2644_v47  ;;  %1618 = vmatpush.bf16.msra.mxu2 %v2917_v46  ;;  %v2841_v47 = vor.u32 %v3568_v37, %v2838_v38  ;;  %v3532_v48 = vld [vmem:[#allocation11 + $0xc4] sm:$0xf] }
  0x54   : > { %v2900_v52 = vld [vmem:[#allocation11 + $0x260] sm:$0xf]  ;;  %v3586_v53 = vld [vmem:[#allocation11 + $0x26c] sm:$0xf0]  ;;  %v2773_v57 = vor.u32 %v3554_v51, %v2772_v49  ;;  %1632 = vmatpush.bf16.msra.mxu3 %v3045_v50  ;;  %v2694_v49 = vld [vmem:[#allocation11 + $0xd0] sm:$0xf0] }
  0x55   : > { %v3028_v54 = vld [vmem:[#allocation11 + $0x360] sm:$0xf]  ;;  %v3618_v55 = vld [vmem:[#allocation11 + $0x36c] sm:$0xf0]  ;;  %v2901_v58 = vor.u32 %v3586_v53, %v2900_v52  ;;  %1591 = vmatpush.bf16.msra.mxu0 %v2645_v56  ;;  %v3564_v50 = vld [vmem:[#allocation11 + $0x1c4] sm:$0xf] }
  0x56   : > { %v2628_v59 = vld [vmem:[#allocation11 + $0x40] sm:$0xf]  ;;  %v3518_v60 = vld [vmem:[#allocation11 + $0x4c] sm:$0xf0]  ;;  %v3029_v62 = vor.u32 %v3618_v55, %v3028_v54  ;;  %1605 = vmatpush.bf16.msra.mxu1 %v2773_v57  ;;  %v2822_v51 = vld [vmem:[#allocation11 + $0x1d0] sm:$0xf0] }
  0x57   : > { %v2756_v61 = vld [vmem:[#allocation11 + $0x140] sm:$0xf]  ;;  %v3550_v63 = vld [vmem:[#allocation11 + $0x14c] sm:$0xf0]  ;;  %v2629_v4 = vor.u32 %v3518_v60, %v2628_v59  ;;  %1619 = vmatpush.bf16.msra.mxu2 %v2901_v58  ;;  %v3505_v53 = vld [vmem:[%s4289_s26 + $0x14] sm:$0xf0]  ;;  %v2697_v59 = vor.u32 %v3532_v48, %v2694_v49 }
  0x58   : > { %v2884_v0 = vld [vmem:[#allocation11 + $0x240] sm:$0xf]  ;;  %v3582_v1 = vld [vmem:[#allocation11 + $0x24c] sm:$0xf0]  ;;  %v2757_v5 = vor.u32 %v3550_v63, %v2756_v61  ;;  %1633 = vmatpush.bf16.msra.mxu3 %v3029_v62  ;;  %v3528_v62 = vld [vmem:[#allocation11 + $0xa4] sm:$0xf]  ;;  %v2825_v63 = vor.u32 %v3564_v50, %v2822_v51 }
  0x59   : > { %v3012_v2 = vld [vmem:[#allocation11 + $0x340] sm:$0xf]  ;;  %v3614_v3 = vld [vmem:[#allocation11 + $0x34c] sm:$0xf0]  ;;  %v2885_v6 = vor.u32 %v3582_v1, %v2884_v0  ;;  %1592 = vmatpush.bf16.msra.mxu0 %v2629_v4  ;;  %v2678_v0 = vld [vmem:[#allocation11 + $0xb0] sm:$0xf0] }
  0x5a   : > { %v2612_v7 = vld [vmem:[#allocation11 + $0x20] sm:$0xf]  ;;  %v3514_v8 = vld [vmem:[#allocation11 + $0x2c] sm:$0xf0]  ;;  %v3013_v10 = vor.u32 %v3614_v3, %v3012_v2  ;;  %1606 = vmatpush.bf16.msra.mxu1 %v2757_v5  ;;  %v2574_v2 = vld [vmem:[%s4289_s26 + $0x18] sm:$0xf0] }
  0x5b   : > { %v2740_v9 = vld [vmem:[#allocation11 + $0x120] sm:$0xf]  ;;  %v3546_v11 = vld [vmem:[#allocation11 + $0x12c] sm:$0xf0]  ;;  %v2613_v16 = vor.u32 %v3514_v8, %v2612_v7  ;;  %1620 = vmatpush.bf16.msra.mxu2 %v2885_v6  ;;  %v3560_v3 = vld [vmem:[#allocation11 + $0x1a4] sm:$0xf] }
  0x5c   : > { %v2868_v12 = vld [vmem:[#allocation11 + $0x220] sm:$0xf]  ;;  %v3578_v13 = vld [vmem:[#allocation11 + $0x22c] sm:$0xf0]  ;;  %v2741_v19 = vor.u32 %v3546_v11, %v2740_v9  ;;  %1634 = vmatpush.bf16.msra.mxu3 %v3013_v10  ;;  %v2806_v4 = vld [vmem:[#allocation11 + $0x1b0] sm:$0xf0] }
  0x5d   : > { %v2996_v14 = vld [vmem:[#allocation11 + $0x320] sm:$0xf]  ;;  %v3610_v15 = vld [vmem:[#allocation11 + $0x32c] sm:$0xf0]  ;;  %v2869_v20 = vor.u32 %v3578_v13, %v2868_v12  ;;  %1593 = vmatpush.bf16.msra.mxu0 %v2613_v16  ;;  %v2681_v12 = vor.u32 %v3528_v62, %v2678_v0  ;;  %v3524_v13 = vld [vmem:[#allocation11 + $0x84] sm:$0xf]  ;;  %v2809_v16 = vor.u32 %v3560_v3, %v2806_v4 }
  0x5e   : > { %v2596_v17 = vld [vmem:[#allocation11] sm:$0xf]  ;;  %v3510_v18 = vld [vmem:[#allocation11 + $0xc] sm:$0xf0]  ;;  %v2997_v24 = vor.u32 %v3610_v15, %v2996_v14  ;;  %1607 = vmatpush.bf16.msra.mxu1 %v2741_v19  ;;  %v2662_v14 = vld [vmem:[#allocation11 + $0x90] sm:$0xf0] }
  0x5f   : > { %v2724_v21 = vld [vmem:[#allocation11 + $0x100] sm:$0xf]  ;;  %v3542_v22 = vld [vmem:[#allocation11 + $0x10c] sm:$0xf0]  ;;  %v2597_v31 = vor.u32 %v3510_v18, %v2596_v17  ;;  %1621 = vmatpush.bf16.msra.mxu2 %v2869_v20  ;;  %v2580_v15 = vld [vmem:[%s4289_s26 + $0x8] sm:$0xf] }
  0x60   : > { %v2852_v23 = vld [vmem:[#allocation11 + $0x200] sm:$0xf]  ;;  %v3574_v25 = vld [vmem:[#allocation11 + $0x20c] sm:$0xf0]  ;;  %v2725_v35 = vor.u32 %v3542_v22, %v2724_v21  ;;  %1635 = vmatpush.bf16.msra.mxu3 %v2997_v24  ;;  %v3503_v18 = vld [vmem:[%s4289_s26 + $0xc] sm:$0xf] }
  0x61   : > { %v2980_v26 = vld [vmem:[#allocation11 + $0x300] sm:$0xf]  ;;  %v3606_v27 = vld [vmem:[#allocation11 + $0x30c] sm:$0xf0]  ;;  %v2853_v36 = vor.u32 %v3574_v25, %v2852_v23  ;;  %1594 = vmatpush.bf16.msra.mxu0 %v2597_v31  ;;  %v3556_v20 = vld [vmem:[#allocation11 + $0x184] sm:$0xf] }
  0x62   : > { %v3220_v28 = vld [vmem:[#allocation11 + $0x4e0] sm:$0xf]  ;;  %v3666_v29 = vld [vmem:[#allocation11 + $0x4ec] sm:$0xf0]  ;;  %v2981_v39 = vor.u32 %v3606_v27, %v2980_v26  ;;  %1608 = vmatpush.bf16.msra.mxu1 %v2725_v35  ;;  %v2790_v21 = vld [vmem:[#allocation11 + $0x190] sm:$0xf0]  ;;  %v2665_v26 = vor.u32 %v3524_v13, %v2662_v14 }
  0x63   : > { %v3348_v30 = vld [vmem:[#allocation11 + $0x5e0] sm:$0xf]  ;;  %v3698_v32 = vld [vmem:[#allocation11 + $0x5ec] sm:$0xf0]  ;;  %v3221_v40 = vor.u32 %v3666_v29, %v3220_v28  ;;  %1622 = vmatpush.bf16.msra.mxu2 %v2853_v36  ;;  %v3552_v34 = vld [vmem:[#allocation11 + $0x164] sm:$0xf] }
  0x64   : > { %v3204_v41 = vld [vmem:[#allocation11 + $0x4c0] sm:$0xf]  ;;  %v3349_v42 = vor.u32 %v3698_v32, %v3348_v30  ;;  %v3662_v44 = vld [vmem:[#allocation11 + $0x4cc] sm:$0xf0]  ;;  %1636 = vmatpush.bf16.msra.mxu3 %v2981_v39  ;;  %v2793_v30 = vor.u32 %v3556_v20, %v2790_v21  ;;  %v3520_v32 = vld [vmem:[#allocation11 + $0x64] sm:$0xf] }
  0x65   : > { %v3332_v45 = vld [vmem:[#allocation11 + $0x5c0] sm:$0xf]  ;;  %v3694_v46 = vld [vmem:[#allocation11 + $0x5cc] sm:$0xf0]  ;;  %1643 = vmatpush.bf16.msrb.mxu0 %v3221_v40  ;;  %v3205_v54 = vor.u32 %v3662_v44, %v3204_v41  ;;  %v2774_v35 = vld [vmem:[#allocation11 + $0x170] sm:$0xf0]  ;;  %v2649_v38 = vor.u32 %v3520_v32, %v2646_v33 }
  0x66   : > { %v2572_v52 = vld [vmem:[%s4289_s26] sm:$0xf]  ;;  %1657 = vmatpush.bf16.msrb.mxu1 %v3349_v42  ;;  %v3333_v58 = vor.u32 %v3694_v46, %v3332_v45  ;;  %v3502_v1 = vld [vmem:[%s4289_s26 + $0x4] sm:$0xf]  ;;  %v2777_v42 = vor.u32 %v3552_v34, %v2774_v35  ;;  %v2588_v21 = vld [vmem:[%s4289_s26 + $0x10] sm:$0xf] }
  0x67   : > { %v3188_v55 = vld [vmem:[#allocation11 + $0x4a0] sm:$0xf]  ;;  %v3658_v56 = vld [vmem:[#allocation11 + $0x4ac] sm:$0xf0]  ;;  %v4305_v57 = vor.u32 %v3505_v53, %v2572_v52  ;;  %1671 = vmatpush.bf16.msrb.mxu2 %v2713_v43  ;;  %v4310_v6 = vor.u32 %v3502_v1, %v2574_v2  ;;  %v3516_v44 = vld [vmem:[#allocation11 + $0x44] sm:$0xf] }
  0x68   : > { %v3316_v60 = vld [vmem:[#allocation11 + $0x5a0] sm:$0xf]  ;;  %v3690_v61 = vld [vmem:[#allocation11 + $0x5ac] sm:$0xf0]  ;;  %1685 = vmatpush.bf16.msrb.mxu3 %v2841_v47  ;;  %v3189_v7 = vor.u32 %v3658_v56, %v3188_v55  ;;  %v2630_v45 = vld [vmem:[#allocation11 + $0x50] sm:$0xf0] }
  0x69   : > { %1595 = vmatmul.bf16.vlgmr.msra.gmra.mxu0 %v4305_v57  ;;  %v3172_v5 = vld [vmem:[#allocation11 + $0x480] sm:$0xf]  ;;  %v3654_v8 = vld [vmem:[#allocation11 + $0x48c] sm:$0xf0]  ;;  %v3317_v11 = vor.u32 %v3690_v61, %v3316_v60  ;;  %1609 = vmatmul.bf16.vlgmr.msra.gmra.mxu1 %v4310_v6  ;;  %v3548_v46 = vld [vmem:[#allocation11 + $0x144] sm:$0xf]  ;;  %v2633_v50 = vor.u32 %v3516_v44, %v2630_v45 }
  0x6a   : > { %1644 = vmatpush.bf16.msrb.mxu0 %v3205_v54  ;;  %v3300_v9 = vld [vmem:[#allocation11 + $0x580] sm:$0xf]  ;;  %v3686_v10 = vld [vmem:[#allocation11 + $0x58c] sm:$0xf0]  ;;  %1658 = vmatpush.bf16.msrb.mxu1 %v3333_v58  ;;  %v3173_v24 = vor.u32 %v3654_v8, %v3172_v5  ;;  %v2758_v47 = vld [vmem:[#allocation11 + $0x150] sm:$0xf0] }
  0x6b   : > { %1672 = vmatpush.bf16.msrb.mxu2 %v2697_v59  ;;  %v3506_v17 = vld [vmem:[%s4289_s26 + $0x1c] sm:$0xf0]  ;;  %v2582_v19 = vld [vmem:[%s4289_s26 + $0x20] sm:$0xf0]  ;;  %v3301_v25 = vor.u32 %v3686_v10, %v3300_v9  ;;  %v2761_v54 = vor.u32 %v3548_v46, %v2758_v47 }
  0x6c   : > { %1686 = vmatpush.bf16.msrb.mxu3 %v2825_v63  ;;  %v4317_v22 = vor.u32 %v3506_v17, %v2580_v15  ;;  %v4319_v23 = vor.u32 %v3503_v18, %v2582_v19  ;;  %v3156_v27 = vld [vmem:[#allocation11 + $0x460] sm:$0xf]  ;;  %v3650_v28 = vld [vmem:[#allocation11 + $0x46c] sm:$0xf0]  ;;  %v3512_v56 = vld [vmem:[#allocation11 + $0x24] sm:$0xf] }
  0x6d   : > { %v3284_v29 = vld [vmem:[#allocation11 + $0x560] sm:$0xf]  ;;  %v3682_v31 = vld [vmem:[#allocation11 + $0x56c] sm:$0xf0]  ;;  %v3157_v36 = vor.u32 %v3650_v28, %v3156_v27  ;;  %v2614_v58 = vld [vmem:[#allocation11 + $0x30] sm:$0xf0] }
  0x6e   : > { %1645 = vmatpush.bf16.msrb.mxu0 %v3189_v7  ;;  %1659 = vmatpush.bf16.msrb.mxu1 %v3317_v11  ;;  %v3285_v37 = vor.u32 %v3682_v31, %v3284_v29  ;;  %v3140_v39 = vld [vmem:[#allocation11 + $0x440] sm:$0xf]  ;;  %v3646_v40 = vld [vmem:[#allocation11 + $0x44c] sm:$0xf0]  ;;  %v3544_v59 = vld [vmem:[#allocation11 + $0x124] sm:$0xf]  ;;  %v2617_v2 = vor.u32 %v3512_v56, %v2614_v58 }
  0x6f   : > { %1673 = vmatpush.bf16.msrb.mxu2 %v2681_v12  ;;  %1637 = vmatmul.bf16.vlgmr.msra.gmra.mxu3 %v4319_v23  ;;  %v3268_v41 = vld [vmem:[#allocation11 + $0x540] sm:$0xf]  ;;  %v3678_v43 = vld [vmem:[#allocation11 + $0x54c] sm:$0xf0]  ;;  %v3141_v48 = vor.u32 %v3646_v40, %v3140_v39  ;;  %v2742_v60 = vld [vmem:[#allocation11 + $0x130] sm:$0xf0] }
  0x70   : > { %1687 = vmatpush.bf16.msrb.mxu3 %v2809_v16  ;;  %1623 = vmatmul.bf16.vlgmr.msra.gmra.mxu2 %v4317_v22  ;;  %v3269_v49 = vor.u32 %v3678_v43, %v3268_v41  ;;  %v3124_v51 = vld [vmem:[#allocation11 + $0x420] sm:$0xf]  ;;  %v3642_v52 = vld [vmem:[#allocation11 + $0x42c] sm:$0xf0]  ;;  %v3508_v4 = vld [vmem:[#allocation11 + $0x4] sm:$0xf]  ;;  %v2745_v7 = vor.u32 %v3544_v59, %v2742_v60 }
  0x71   : > { %v3252_v53 = vld [vmem:[#allocation11 + $0x520] sm:$0xf]  ;;  %v3674_v55 = vld [vmem:[#allocation11 + $0x52c] sm:$0xf0]  ;;  %v3125_v61 = vor.u32 %v3642_v52, %v3124_v51  ;;  %v2598_v5 = vld [vmem:[#allocation11 + $0x10] sm:$0xf0] }
  0x72   : > { %1646 = vmatpush.bf16.msrb.mxu0 %v3173_v24  ;;  %1660 = vmatpush.bf16.msrb.mxu1 %v3301_v25  ;;  %v3108_v62 = vld [vmem:[#allocation11 + $0x400] sm:$0xf]  ;;  %v3638_v63 = vld [vmem:[#allocation11 + $0x40c] sm:$0xf0]  ;;  %v3253_v1 = vor.u32 %v3674_v55, %v3252_v53  ;;  %v3540_v8 = vld [vmem:[#allocation11 + $0x104] sm:$0xf]  ;;  %v2601_v19 = vor.u32 %v3508_v4, %v2598_v5 }
  0x73   : > { %1674 = vmatpush.bf16.msrb.mxu2 %v2665_v26  ;;  %v3236_v0 = vld [vmem:[#allocation11 + $0x500] sm:$0xf]  ;;  %v3670_v3 = vld [vmem:[#allocation11 + $0x50c] sm:$0xf0]  ;;  %v2726_v9 = vld [vmem:[#allocation11 + $0x110] sm:$0xf0]  ;;  %v3109_v14 = vor.u32 %v3638_v63, %v3108_v62 }
  0x74   : > { %1688 = vmatpush.bf16.msrb.mxu3 %v2793_v30  ;;  %v3600_v10 = vld [vmem:[#allocation11 + $0x2e4] sm:$0xf]  ;;  %v2966_v11 = vld [vmem:[#allocation11 + $0x2f0] sm:$0xf0]  ;;  %v3237_v18 = vor.u32 %v3670_v3, %v3236_v0  ;;  %v2729_v25 = vor.u32 %v3540_v8, %v2726_v9  ;;  %v2590_v28 = vld [vmem:[%s4289_s26 + $0x28] sm:$0xf0] }
  0x75   : > { %v3632_v12 = vld [vmem:[#allocation11 + $0x3e4] sm:$0xf]  ;;  %v3094_v13 = vld [vmem:[#allocation11 + $0x3f0] sm:$0xf0]  ;;  %v2969_v26 = vor.u32 %v3600_v10, %v2966_v11 }
  0x76   : > { %1647 = vmatpush.bf16.msrb.mxu0 %v3157_v36  ;;  %1661 = vmatpush.bf16.msrb.mxu1 %v3285_v37  ;;  %v3664_v15 = vld [vmem:[#allocation11 + $0x4e4] sm:$0xf]  ;;  %v3222_v16 = vld [vmem:[#allocation11 + $0x4f0] sm:$0xf0]  ;;  %v3097_v29 = vor.u32 %v3632_v12, %v3094_v13 }
  0x77   : > { %1675 = vmatpush.bf16.msrb.mxu2 %v2649_v38  ;;  %v3696_v17 = vld [vmem:[#allocation11 + $0x5e4] sm:$0xf]  ;;  %v3350_v20 = vld [vmem:[#allocation11 + $0x5f0] sm:$0xf0]  ;;  %v3225_v30 = vor.u32 %v3664_v15, %v3222_v16 }
  0x78   : > { %1689 = vmatpush.bf16.msrb.mxu3 %v2777_v42  ;;  %v3507_v24 = vld [vmem:[%s4289_s26 + $0x24] sm:$0xf0]  ;;  %v3504_v27 = vld [vmem:[%s4289_s26 + $0x14] sm:$0xf]  ;;  %v3353_v34 = vor.u32 %v3696_v17, %v3350_v20 }
  0x79   : > { %v3596_v31 = vld [vmem:[#allocation11 + $0x2c4] sm:$0xf]  ;;  %v2950_v32 = vld [vmem:[#allocation11 + $0x2d0] sm:$0xf0]  ;;  %v4327_v35 = vor.u32 %v3507_v24, %v2588_v21  ;;  %v4329_v39 = vor.u32 %v3504_v27, %v2590_v28 }
  0x7a   : > { %1648 = vmatpush.bf16.msrb.mxu0 %v3141_v48  ;;  %1662 = vmatpush.bf16.msrb.mxu1 %v3269_v49  ;;  %v3628_v33 = vld [vmem:[#allocation11 + $0x3c4] sm:$0xf]  ;;  %v3078_v36 = vld [vmem:[#allocation11 + $0x3d0] sm:$0xf0]  ;;  %v2953_v42 = vor.u32 %v3596_v31, %v2950_v32 }
  0x7b   : > { %1676 = vmatpush.bf16.msrb.mxu2 %v2633_v50  ;;  %v3660_v37 = vld [vmem:[#allocation11 + $0x4c4] sm:$0xf]  ;;  %v3206_v38 = vld [vmem:[#allocation11 + $0x4d0] sm:$0xf0]  ;;  %v3081_v43 = vor.u32 %v3628_v33, %v3078_v36 }
  0x7c   : > { %1690 = vmatpush.bf16.msrb.mxu3 %v2761_v54  ;;  %v3692_v40 = vld [vmem:[#allocation11 + $0x5c4] sm:$0xf]  ;;  %v3334_v41 = vld [vmem:[#allocation11 + $0x5d0] sm:$0xf0]  ;;  %v3209_v44 = vor.u32 %v3660_v37, %v3206_v38 }
  0x7d   : > { %v3592_v45 = vld [vmem:[#allocation11 + $0x2a4] sm:$0xf]  ;;  %v2934_v46 = vld [vmem:[#allocation11 + $0x2b0] sm:$0xf0]  ;;  %v3337_v48 = vor.u32 %v3692_v40, %v3334_v41 }
  0x7e   : > { %1649 = vmatpush.bf16.msrb.mxu0 %v3125_v61  ;;  %1663 = vmatpush.bf16.msrb.mxu1 %v3253_v1  ;;  %v3624_v47 = vld [vmem:[#allocation11 + $0x3a4] sm:$0xf]  ;;  %v3062_v49 = vld [vmem:[#allocation11 + $0x3b0] sm:$0xf0]  ;;  %v2937_v54 = vor.u32 %v3592_v45, %v2934_v46 }
  0x7f   : > { %1677 = vmatpush.bf16.msrb.mxu2 %v2617_v2  ;;  %v3656_v50 = vld [vmem:[#allocation11 + $0x4a4] sm:$0xf]  ;;  %v3190_v51 = vld [vmem:[#allocation11 + $0x4b0] sm:$0xf0]  ;;  %v3065_v55 = vor.u32 %v3624_v47, %v3062_v49 }
  0x80   : > { %1691 = vmatpush.bf16.msrb.mxu3 %v2745_v7  ;;  %v3688_v52 = vld [vmem:[#allocation11 + $0x5a4] sm:$0xf]  ;;  %v3318_v53 = vld [vmem:[#allocation11 + $0x5b0] sm:$0xf0]  ;;  %v3193_v56 = vor.u32 %v3656_v50, %v3190_v51 }
  0x81   : > { %v3588_v58 = vld [vmem:[#allocation11 + $0x284] sm:$0xf]  ;;  %v2918_v59 = vld [vmem:[#allocation11 + $0x290] sm:$0xf0]  ;;  %v3321_v61 = vor.u32 %v3688_v52, %v3318_v53 }
  0x82   : > { %1650 = vmatpush.bf16.msrb.mxu0 %v3109_v14  ;;  %1664 = vmatpush.bf16.msrb.mxu1 %v3237_v18  ;;  %v3620_v60 = vld [vmem:[#allocation11 + $0x384] sm:$0xf]  ;;  %v3046_v62 = vld [vmem:[#allocation11 + $0x390] sm:$0xf0]  ;;  %v2921_v3 = vor.u32 %v3588_v58, %v2918_v59  ;;  %v3539_v58 = vld [vmem:[#allocation11 + $0xf4] sm:$0xf0] }
  0x83   : > { %1678 = vmatpush.bf16.msrb.mxu2 %v2601_v19  ;;  %v3652_v63 = vld [vmem:[#allocation11 + $0x484] sm:$0xf]  ;;  %v3174_v0 = vld [vmem:[#allocation11 + $0x490] sm:$0xf0]  ;;  %v3049_v4 = vor.u32 %v3620_v60, %v3046_v62  ;;  %v2844_v59 = vld [vmem:[#allocation11 + $0x1e8] sm:$0xf] }
  0x84   : > { %1692 = vmatpush.bf16.msrb.mxu3 %v2729_v25  ;;  %v3684_v1 = vld [vmem:[#allocation11 + $0x584] sm:$0xf]  ;;  %v3302_v2 = vld [vmem:[#allocation11 + $0x590] sm:$0xf0]  ;;  %v3177_v5 = vor.u32 %v3652_v63, %v3174_v0  ;;  %v2972_v62 = vld [vmem:[#allocation11 + $0x2e8] sm:$0xf] }
  0x85   : > { %1651 = vmatmul.bf16.vlgmr.msrb.gmra.mxu0 %v4327_v35  ;;  %1665 = vmatmul.bf16.vlgmr.msrb.gmra.mxu1 %v4329_v39  ;;  %v3584_v7 = vld [vmem:[#allocation11 + $0x264] sm:$0xf]  ;;  %v2902_v8 = vld [vmem:[#allocation11 + $0x270] sm:$0xf0]  ;;  %v3305_v10 = vor.u32 %v3684_v1, %v3302_v2  ;;  %v3603_v63 = vld [vmem:[#allocation11 + $0x2f4] sm:$0xf0] }
  0x86   : > { %1699 = vmatpush.bf16.msra.mxu0 %v2969_v26  ;;  %1713 = vmatpush.bf16.msra.mxu1 %v3097_v29  ;;  %v3616_v9 = vld [vmem:[#allocation11 + $0x364] sm:$0xf]  ;;  %v3030_v11 = vld [vmem:[#allocation11 + $0x370] sm:$0xf0]  ;;  %v2905_v16 = vor.u32 %v3584_v7, %v2902_v8  ;;  %v3100_v2 = vld [vmem:[#allocation11 + $0x3e8] sm:$0xf]  ;;  %v2973_v8 = vor.u32 %v3603_v63, %v2972_v62 }
  0x87   : > { %1727 = vmatpush.bf16.msra.mxu2 %v3225_v30  ;;  %1693 = vmatmul.bf16.vlgmr.msrb.gmra.mxu3 %v4310_v6  ;;  %v3648_v12 = vld [vmem:[#allocation11 + $0x464] sm:$0xf]  ;;  %v3158_v13 = vld [vmem:[#allocation11 + $0x470] sm:$0xf0]  ;;  %v3033_v17 = vor.u32 %v3616_v9, %v3030_v11  ;;  %v2700_v9 = vld [vmem:[#allocation11 + $0xc8] sm:$0xf] }
  0x88   : > { %1741 = vmatpush.bf16.msra.mxu3 %v3353_v34  ;;  %1679 = vmatmul.bf16.vlgmr.msrb.gmra.mxu2 %v4305_v57  ;;  %v3680_v14 = vld [vmem:[#allocation11 + $0x564] sm:$0xf]  ;;  %v3286_v15 = vld [vmem:[#allocation11 + $0x570] sm:$0xf0]  ;;  %v3161_v18 = vor.u32 %v3648_v12, %v3158_v13  ;;  %v2828_v11 = vld [vmem:[#allocation11 + $0x1c8] sm:$0xf] }
  0x89   : > { %v3580_v19 = vld [vmem:[#allocation11 + $0x244] sm:$0xf]  ;;  %v2886_v20 = vld [vmem:[#allocation11 + $0x250] sm:$0xf0]  ;;  %v3289_v24 = vor.u32 %v3680_v14, %v3286_v15  ;;  %v3567_v13 = vld [vmem:[#allocation11 + $0x1d4] sm:$0xf0] }
  0x8a   : > { %1700 = vmatpush.bf16.msra.mxu0 %v2953_v42  ;;  %1714 = vmatpush.bf16.msra.mxu1 %v3081_v43  ;;  %v3612_v21 = vld [vmem:[#allocation11 + $0x344] sm:$0xf]  ;;  %v3014_v25 = vld [vmem:[#allocation11 + $0x350] sm:$0xf0]  ;;  %v2889_v30 = vor.u32 %v3580_v19, %v2886_v20  ;;  %v2956_v14 = vld [vmem:[#allocation11 + $0x2c8] sm:$0xf]  ;;  %v2829_v19 = vor.u32 %v3567_v13, %v2828_v11 }
  0x8b   : > { %1728 = vmatpush.bf16.msra.mxu2 %v3209_v44  ;;  %v3644_v26 = vld [vmem:[#allocation11 + $0x444] sm:$0xf]  ;;  %v3142_v27 = vld [vmem:[#allocation11 + $0x450] sm:$0xf0]  ;;  %v3017_v31 = vor.u32 %v3612_v21, %v3014_v25  ;;  %v3599_v15 = vld [vmem:[#allocation11 + $0x2d4] sm:$0xf0] }
  0x8c   : > { %1742 = vmatpush.bf16.msra.mxu3 %v3337_v48  ;;  %v3676_v28 = vld [vmem:[#allocation11 + $0x544] sm:$0xf]  ;;  %v3270_v29 = vld [vmem:[#allocation11 + $0x550] sm:$0xf0]  ;;  %v3145_v32 = vor.u32 %v3644_v26, %v3142_v27  ;;  %v2957_v20 = vor.u32 %v3599_v15, %v2956_v14  ;;  %v2684_v21 = vld [vmem:[#allocation11 + $0xa8] sm:$0xf] }
  0x8d   : > { %v3576_v33 = vld [vmem:[#allocation11 + $0x224] sm:$0xf]  ;;  %v2870_v34 = vld [vmem:[#allocation11 + $0x230] sm:$0xf0]  ;;  %v3273_v37 = vor.u32 %v3676_v28, %v3270_v29  ;;  %v2812_v25 = vld [vmem:[#allocation11 + $0x1a8] sm:$0xf] }
  0x8e   : > { %1701 = vmatpush.bf16.msra.mxu0 %v2937_v54  ;;  %1715 = vmatpush.bf16.msra.mxu1 %v3065_v55  ;;  %v3608_v36 = vld [vmem:[#allocation11 + $0x324] sm:$0xf]  ;;  %v2998_v38 = vld [vmem:[#allocation11 + $0x330] sm:$0xf0]  ;;  %v2873_v44 = vor.u32 %v3576_v33, %v2870_v34  ;;  %v3563_v27 = vld [vmem:[#allocation11 + $0x1b4] sm:$0xf0] }
  0x8f   : > { %1729 = vmatpush.bf16.msra.mxu2 %v3193_v56  ;;  %v3640_v40 = vld [vmem:[#allocation11 + $0x424] sm:$0xf]  ;;  %v3126_v41 = vld [vmem:[#allocation11 + $0x430] sm:$0xf0]  ;;  %v3001_v47 = vor.u32 %v3608_v36, %v2998_v38  ;;  %v2716_v56 = vld [vmem:[#allocation11 + $0xe8] sm:$0xf]  ;;  %v2813_v33 = vor.u32 %v3563_v27, %v2812_v25 }
  0x90   : > { %1743 = vmatpush.bf16.msra.mxu3 %v3321_v61  ;;  %v3672_v42 = vld [vmem:[#allocation11 + $0x524] sm:$0xf]  ;;  %v3254_v43 = vld [vmem:[#allocation11 + $0x530] sm:$0xf0]  ;;  %v3129_v48 = vor.u32 %v3640_v40, %v3126_v41  ;;  %v3571_v61 = vld [vmem:[#allocation11 + $0x1f4] sm:$0xf0] }
  0x91   : > { %v3572_v45 = vld [vmem:[#allocation11 + $0x204] sm:$0xf]  ;;  %v2854_v46 = vld [vmem:[#allocation11 + $0x210] sm:$0xf0]  ;;  %v3257_v52 = vor.u32 %v3672_v42, %v3254_v43  ;;  %v2845_v7 = vor.u32 %v3571_v61, %v2844_v59  ;;  %v2940_v28 = vld [vmem:[#allocation11 + $0x2a8] sm:$0xf] }
  0x92   : > { %1702 = vmatpush.bf16.msra.mxu0 %v2921_v3  ;;  %1716 = vmatpush.bf16.msra.mxu1 %v3049_v4  ;;  %v3604_v49 = vld [vmem:[#allocation11 + $0x304] sm:$0xf]  ;;  %v2982_v50 = vld [vmem:[#allocation11 + $0x310] sm:$0xf0]  ;;  %v2857_v60 = vor.u32 %v3572_v45, %v2854_v46  ;;  %v3635_v3 = vld [vmem:[#allocation11 + $0x3f4] sm:$0xf0] }
  0x93   : > { %1730 = vmatpush.bf16.msra.mxu2 %v3177_v5  ;;  %v3636_v51 = vld [vmem:[#allocation11 + $0x404] sm:$0xf]  ;;  %v3110_v53 = vld [vmem:[#allocation11 + $0x410] sm:$0xf0]  ;;  %v2985_v0 = vor.u32 %v3604_v49, %v2982_v50  ;;  %v2717_v5 = vor.u32 %v3539_v58, %v2716_v56  ;;  %v3101_v12 = vor.u32 %v3635_v3, %v3100_v2  ;;  %v3595_v29 = vld [vmem:[#allocation11 + $0x2b4] sm:$0xf0] }
  0x94   : > { %1744 = vmatpush.bf16.msra.mxu3 %v3305_v10  ;;  %v3668_v54 = vld [vmem:[#allocation11 + $0x504] sm:$0xf]  ;;  %v3238_v55 = vld [vmem:[#allocation11 + $0x510] sm:$0xf0]  ;;  %v3113_v1 = vor.u32 %v3636_v51, %v3110_v53  ;;  %v3535_v10 = vld [vmem:[#allocation11 + $0xd4] sm:$0xf0]  ;;  %v2941_v34 = vor.u32 %v3595_v29, %v2940_v28 }
  0x95   : > { %v3241_v4 = vor.u32 %v3668_v54, %v3238_v55  ;;  %v2668_v36 = vld [vmem:[#allocation11 + $0x88] sm:$0xf]  ;;  %v3559_v41 = vld [vmem:[#allocation11 + $0x194] sm:$0xf0] }
  0x96   : > { %1703 = vmatpush.bf16.msra.mxu0 %v2905_v16  ;;  %1717 = vmatpush.bf16.msra.mxu1 %v3033_v17  ;;  %v3084_v16 = vld [vmem:[#allocation11 + $0x3c8] sm:$0xf]  ;;  %v3631_v17 = vld [vmem:[#allocation11 + $0x3d4] sm:$0xf0] }
  0x97   : > { %1731 = vmatpush.bf16.msra.mxu2 %v3161_v18  ;;  %v2701_v18 = vor.u32 %v3535_v10, %v2700_v9  ;;  %v3085_v26 = vor.u32 %v3631_v17, %v3084_v16  ;;  %v2796_v38 = vld [vmem:[#allocation11 + $0x188] sm:$0xf]  ;;  %v3591_v43 = vld [vmem:[#allocation11 + $0x294] sm:$0xf0] }
  0x98   : > { %1745 = vmatpush.bf16.msra.mxu3 %v3289_v24  ;;  %v3531_v24 = vld [vmem:[#allocation11 + $0xb4] sm:$0xf0]  ;;  %v2924_v42 = vld [vmem:[#allocation11 + $0x288] sm:$0xf] }
  0x99   : > { %v3623_v45 = vld [vmem:[#allocation11 + $0x394] sm:$0xf0]  ;;  %v2652_v49 = vld [vmem:[#allocation11 + $0x68] sm:$0xf] }
  0x9a   : > { %1704 = vmatpush.bf16.msra.mxu0 %v2889_v30  ;;  %1718 = vmatpush.bf16.msra.mxu1 %v3017_v31  ;;  %v3068_v30 = vld [vmem:[#allocation11 + $0x3a8] sm:$0xf]  ;;  %v3627_v31 = vld [vmem:[#allocation11 + $0x3b4] sm:$0xf0] }
  0x9b   : > { %1732 = vmatpush.bf16.msra.mxu2 %v3145_v32  ;;  %v2685_v32 = vor.u32 %v3531_v24, %v2684_v21  ;;  %v3069_v40 = vor.u32 %v3627_v31, %v3068_v30  ;;  %v3523_v50 = vld [vmem:[#allocation11 + $0x74] sm:$0xf0]  ;;  %v2780_v51 = vld [vmem:[#allocation11 + $0x168] sm:$0xf] }
  0x9c   : > { %1746 = vmatpush.bf16.msra.mxu3 %v3273_v37  ;;  %v3527_v37 = vld [vmem:[#allocation11 + $0x94] sm:$0xf0]  ;;  %v2908_v54 = vld [vmem:[#allocation11 + $0x268] sm:$0xf]  ;;  %v2653_v59 = vor.u32 %v3523_v50, %v2652_v49 }
  0x9d   : > { %v2669_v46 = vor.u32 %v3527_v37, %v2668_v36  ;;  %v3555_v53 = vld [vmem:[#allocation11 + $0x174] sm:$0xf0]  ;;  %v3036_v56 = vld [vmem:[#allocation11 + $0x368] sm:$0xf] }
  0x9e   : > { %1705 = vmatpush.bf16.msra.mxu0 %v2873_v44  ;;  %1719 = vmatpush.bf16.msra.mxu1 %v3001_v47  ;;  %v3052_v44 = vld [vmem:[#allocation11 + $0x388] sm:$0xf]  ;;  %v2797_v47 = vor.u32 %v3559_v41, %v2796_v38  ;;  %v3587_v55 = vld [vmem:[#allocation11 + $0x274] sm:$0xf0]  ;;  %v3537_v41 = vld [vmem:[#allocation11 + $0xec] sm:$0xf] }
  0x9f   : > { %1733 = vmatpush.bf16.msra.mxu2 %v3129_v48  ;;  %v2925_v48 = vor.u32 %v3591_v43, %v2924_v42  ;;  %v3619_v58 = vld [vmem:[#allocation11 + $0x374] sm:$0xf0]  ;;  %v2909_v61 = vor.u32 %v3587_v55, %v2908_v54  ;;  %v2636_v62 = vld [vmem:[#allocation11 + $0x48] sm:$0xf]  ;;  %v2718_v42 = vld [vmem:[#allocation11 + $0xf8] sm:$0xf0] }
  0xa0   : > { %1747 = vmatpush.bf16.msra.mxu3 %v3257_v52  ;;  %v3053_v52 = vor.u32 %v3623_v45, %v3052_v44  ;;  %v3519_v63 = vld [vmem:[#allocation11 + $0x54] sm:$0xf0]  ;;  %v2892_v3 = vld [vmem:[#allocation11 + $0x248] sm:$0xf]  ;;  %v3569_v45 = vld [vmem:[#allocation11 + $0x1ec] sm:$0xf]  ;;  %v2721_v50 = vor.u32 %v3537_v41, %v2718_v42 }
  0xa1   : > { %v3551_v2 = vld [vmem:[#allocation11 + $0x154] sm:$0xf0]  ;;  %v2620_v11 = vld [vmem:[#allocation11 + $0x28] sm:$0xf] }
  0xa2   : > { %1706 = vmatpush.bf16.msra.mxu0 %v2857_v60  ;;  %1720 = vmatpush.bf16.msra.mxu1 %v2985_v0  ;;  %v2781_v60 = vor.u32 %v3555_v53, %v2780_v51  ;;  %v2764_v0 = vld [vmem:[#allocation11 + $0x148] sm:$0xf]  ;;  %v3547_v15 = vld [vmem:[#allocation11 + $0x134] sm:$0xf0] }
  0xa3   : > { %1734 = vmatpush.bf16.msra.mxu2 %v3113_v1  ;;  %v3037_v1 = vor.u32 %v3619_v58, %v3036_v56  ;;  %v2765_v9 = vor.u32 %v3551_v2, %v2764_v0  ;;  %v2748_v13 = vld [vmem:[#allocation11 + $0x128] sm:$0xf]  ;;  %v3579_v17 = vld [vmem:[#allocation11 + $0x234] sm:$0xf0]  ;;  %v3533_v56 = vld [vmem:[#allocation11 + $0xcc] sm:$0xf] }
  0xa4   : > { %1748 = vmatpush.bf16.msra.mxu3 %v3241_v4  ;;  %v3583_v4 = vld [vmem:[#allocation11 + $0x254] sm:$0xf0]  ;;  %v2876_v16 = vld [vmem:[#allocation11 + $0x228] sm:$0xf]  ;;  %v2749_v25 = vor.u32 %v3547_v15, %v2748_v13  ;;  %v2702_v58 = vld [vmem:[#allocation11 + $0xd8] sm:$0xf0] }
  0xa5   : > { %1707 = vmatmul.bf16.vlgmr.msra.gmra.mxu0 %v4317_v22  ;;  %1721 = vmatmul.bf16.vlgmr.msra.gmra.mxu1 %v4319_v23  ;;  %v2893_v10 = vor.u32 %v3583_v4, %v2892_v3  ;;  %v2604_v21 = vld [vmem:[#allocation11 + $0x8] sm:$0xf]  ;;  %v3511_v24 = vld [vmem:[#allocation11 + $0x14] sm:$0xf0] }
  0xa6   : > { %1755 = vmatpush.bf16.msrb.mxu0 %v2717_v5  ;;  %1769 = vmatpush.bf16.msrb.mxu1 %v2845_v7  ;;  %v3020_v5 = vld [vmem:[#allocation11 + $0x348] sm:$0xf]  ;;  %v3615_v7 = vld [vmem:[#allocation11 + $0x354] sm:$0xf0]  ;;  %v2605_v38 = vor.u32 %v3511_v24, %v2604_v21  ;;  %v2798_v21 = vld [vmem:[#allocation11 + $0x198] sm:$0xf0] }
  0xa7   : > { %1783 = vmatpush.bf16.msrb.mxu2 %v2973_v8  ;;  %1749 = vmatmul.bf16.vlgmr.msra.gmra.mxu3 %v4329_v39  ;;  %v2637_v8 = vor.u32 %v3519_v63, %v2636_v62  ;;  %v3021_v14 = vor.u32 %v3615_v7, %v3020_v5  ;;  %v2732_v27 = vld [vmem:[#allocation11 + $0x108] sm:$0xf]  ;;  %v3543_v28 = vld [vmem:[#allocation11 + $0x114] sm:$0xf0]  ;;  %v2705_v63 = vor.u32 %v3533_v56, %v2702_v58  ;;  %v3529_v5 = vld [vmem:[#allocation11 + $0xac] sm:$0xf] }
  0xa8   : > { %1797 = vmatpush.bf16.msrb.mxu3 %v3101_v12  ;;  %1735 = vmatmul.bf16.vlgmr.msra.gmra.mxu2 %v4327_v35  ;;  %v3515_v12 = vld [vmem:[#allocation11 + $0x34] sm:$0xf0]  ;;  %v2860_v29 = vld [vmem:[#allocation11 + $0x208] sm:$0xf]  ;;  %v2733_v43 = vor.u32 %v3543_v28, %v2732_v27  ;;  %v2686_v7 = vld [vmem:[#allocation11 + $0xb8] sm:$0xf0] }
  0xa9   : > { %v3575_v31 = vld [vmem:[#allocation11 + $0x214] sm:$0xf0]  ;;  %v3356_v37 = vld [vmem:[#allocation11 + $0x5e8] sm:$0xf] }
  0xaa   : > { %1756 = vmatpush.bf16.msrb.mxu0 %v2701_v18  ;;  %1770 = vmatpush.bf16.msrb.mxu1 %v2829_v19  ;;  %v3004_v18 = vld [vmem:[#allocation11 + $0x328] sm:$0xf]  ;;  %v3611_v19 = vld [vmem:[#allocation11 + $0x334] sm:$0xf0]  ;;  %v2861_v44 = vor.u32 %v3575_v31, %v2860_v29 }
  0xab   : > { %1784 = vmatpush.bf16.msrb.mxu2 %v2957_v20  ;;  %v2621_v20 = vor.u32 %v3515_v12, %v2620_v11  ;;  %v3005_v30 = vor.u32 %v3611_v19, %v3004_v18  ;;  %v3667_v36 = vld [vmem:[#allocation11 + $0x4f4] sm:$0xf0]  ;;  %v3212_v51 = vld [vmem:[#allocation11 + $0x4c8] sm:$0xf]  ;;  %v2689_v12 = vor.u32 %v3529_v5, %v2686_v7  ;;  %v3525_v18 = vld [vmem:[#allocation11 + $0x8c] sm:$0xf] }
  0xac   : > { %1798 = vmatpush.bf16.msrb.mxu3 %v3085_v26  ;;  %v2877_v26 = vor.u32 %v3579_v17, %v2876_v16  ;;  %v3340_v53 = vld [vmem:[#allocation11 + $0x5c8] sm:$0xf]  ;;  %v3695_v55 = vld [vmem:[#allocation11 + $0x5d4] sm:$0xf0]  ;;  %v2670_v19 = vld [vmem:[#allocation11 + $0x98] sm:$0xf0] }
  0xad   : > { %v3341_v62 = vor.u32 %v3695_v55, %v3340_v53  ;;  %v3196_v0 = vld [vmem:[#allocation11 + $0x4a8] sm:$0xf]  ;;  %v3691_v4 = vld [vmem:[#allocation11 + $0x5b4] sm:$0xf0]  ;;  %v3509_v7 = vld [vmem:[#allocation11 + $0xc] sm:$0xf] }
  0xae   : > { %1757 = vmatpush.bf16.msrb.mxu0 %v2685_v32  ;;  %1771 = vmatpush.bf16.msrb.mxu1 %v2813_v33  ;;  %v2988_v32 = vld [vmem:[#allocation11 + $0x308] sm:$0xf]  ;;  %v3607_v33 = vld [vmem:[#allocation11 + $0x314] sm:$0xf0] }
  0xaf   : > { %1785 = vmatpush.bf16.msrb.mxu2 %v2941_v34  ;;  %v3228_v34 = vld [vmem:[#allocation11 + $0x4e8] sm:$0xf]  ;;  %v3687_v17 = vld [vmem:[#allocation11 + $0x594] sm:$0xf0] }
  0xb0   : > { %1799 = vmatpush.bf16.msrb.mxu3 %v3069_v40  ;;  %v3699_v40 = vld [vmem:[#allocation11 + $0x5f4] sm:$0xf0]  ;;  %v3324_v2 = vld [vmem:[#allocation11 + $0x5a8] sm:$0xf] }
  0xb1   : > { %v3357_v49 = vor.u32 %v3699_v40, %v3356_v37  ;;  %v3325_v11 = vor.u32 %v3691_v4, %v3324_v2  ;;  %v3180_v13 = vld [vmem:[#allocation11 + $0x488] sm:$0xf]  ;;  %v3651_v28 = vld [vmem:[#allocation11 + $0x474] sm:$0xf0] }
  0xb2   : > { %1758 = vmatpush.bf16.msrb.mxu0 %v2669_v46  ;;  %1772 = vmatpush.bf16.msrb.mxu1 %v2797_v47  ;;  %v2846_v46 = vld [vmem:[#allocation11 + $0x1f8] sm:$0xf0]  ;;  %v2989_v47 = vor.u32 %v3607_v33, %v2988_v32  ;;  %v3308_v15 = vld [vmem:[#allocation11 + $0x588] sm:$0xf]  ;;  %v3683_v31 = vld [vmem:[#allocation11 + $0x574] sm:$0xf0] }
  0xb3   : > { %1786 = vmatpush.bf16.msrb.mxu2 %v2925_v48  ;;  %v3229_v48 = vor.u32 %v3667_v36, %v3228_v34  ;;  %v2849_v54 = vor.u32 %v3569_v45, %v2846_v46  ;;  %v3164_v27 = vld [vmem:[#allocation11 + $0x468] sm:$0xf]  ;;  %v3521_v32 = vld [vmem:[#allocation11 + $0x6c] sm:$0xf]  ;;  %v2654_v33 = vld [vmem:[#allocation11 + $0x78] sm:$0xf0] }
  0xb4   : > { %1800 = vmatpush.bf16.msrb.mxu3 %v3053_v52  ;;  %v3663_v52 = vld [vmem:[#allocation11 + $0x4d4] sm:$0xf0]  ;;  %v3292_v29 = vld [vmem:[#allocation11 + $0x568] sm:$0xf]  ;;  %v3553_v34 = vld [vmem:[#allocation11 + $0x16c] sm:$0xf]  ;;  %v3165_v37 = vor.u32 %v3651_v28, %v3164_v27  ;;  %v2657_v40 = vor.u32 %v3521_v32, %v2654_v33 }
  0xb5   : > { %v2782_v36 = vld [vmem:[#allocation11 + $0x178] sm:$0xf0]  ;;  %v3148_v41 = vld [vmem:[#allocation11 + $0x448] sm:$0xf]  ;;  %v3647_v42 = vld [vmem:[#allocation11 + $0x454] sm:$0xf0] }
  0xb6   : > { %1759 = vmatpush.bf16.msrb.mxu0 %v2653_v59  ;;  %1773 = vmatpush.bf16.msrb.mxu1 %v2781_v60  ;;  %v3565_v59 = vld [vmem:[#allocation11 + $0x1cc] sm:$0xf]  ;;  %v2830_v60 = vld [vmem:[#allocation11 + $0x1d8] sm:$0xf0]  ;;  %v3679_v45 = vld [vmem:[#allocation11 + $0x554] sm:$0xf0] }
  0xb7   : > { %1787 = vmatpush.bf16.msrb.mxu2 %v2909_v61  ;;  %v3213_v61 = vor.u32 %v3663_v52, %v3212_v51  ;;  %v2833_v3 = vor.u32 %v3565_v59, %v2830_v60  ;;  %v3517_v46 = vld [vmem:[#allocation11 + $0x4c] sm:$0xf]  ;;  %v3132_v53 = vld [vmem:[#allocation11 + $0x428] sm:$0xf]  ;;  %v3675_v58 = vld [vmem:[#allocation11 + $0x534] sm:$0xf0] }
  0xb8   : > { %1801 = vmatpush.bf16.msrb.mxu3 %v3037_v1  ;;  %v3659_v1 = vld [vmem:[#allocation11 + $0x4b4] sm:$0xf0]  ;;  %v3260_v55 = vld [vmem:[#allocation11 + $0x528] sm:$0xf]  ;;  %v3513_v59 = vld [vmem:[#allocation11 + $0x2c] sm:$0xf] }
  0xb9   : > { %v2622_v60 = vld [vmem:[#allocation11 + $0x38] sm:$0xf0]  ;;  %v3261_v2 = vor.u32 %v3675_v58, %v3260_v55  ;;  %v3244_v4 = vld [vmem:[#allocation11 + $0x508] sm:$0xf]  ;;  %v3671_v5 = vld [vmem:[#allocation11 + $0x514] sm:$0xf0] }
  0xba   : > { %1760 = vmatpush.bf16.msrb.mxu0 %v2637_v8  ;;  %1774 = vmatpush.bf16.msrb.mxu1 %v2765_v9  ;;  %v3561_v8 = vld [vmem:[#allocation11 + $0x1ac] sm:$0xf]  ;;  %v2814_v9 = vld [vmem:[#allocation11 + $0x1b8] sm:$0xf0] }
  0xbb   : > { %1788 = vmatpush.bf16.msrb.mxu2 %v2893_v10  ;;  %v3197_v10 = vor.u32 %v3659_v1, %v3196_v0  ;;  %v2817_v16 = vor.u32 %v3561_v8, %v2814_v9  ;;  %v3116_v0 = vld [vmem:[#allocation11 + $0x408] sm:$0xf]  ;;  %v3639_v1 = vld [vmem:[#allocation11 + $0x414] sm:$0xf0]  ;;  %v2606_v9 = vld [vmem:[#allocation11 + $0x18] sm:$0xf0] }
  0xbc   : > { %1802 = vmatpush.bf16.msrb.mxu3 %v3021_v14  ;;  %v3655_v14 = vld [vmem:[#allocation11 + $0x494] sm:$0xf0]  ;;  %v3086_v33 = vld [vmem:[#allocation11 + $0x3d8] sm:$0xf0]  ;;  %v3589_v55 = vld [vmem:[#allocation11 + $0x28c] sm:$0xf] }
  0xbd   : > { %v3181_v24 = vor.u32 %v3655_v14, %v3180_v13  ;;  %v2974_v13 = vld [vmem:[#allocation11 + $0x2f8] sm:$0xf0]  ;;  %v3633_v14 = vld [vmem:[#allocation11 + $0x3ec] sm:$0xf] }
  0xbe   : > { %1761 = vmatpush.bf16.msrb.mxu0 %v2621_v20  ;;  %1775 = vmatpush.bf16.msrb.mxu1 %v2749_v25  ;;  %v3557_v20 = vld [vmem:[#allocation11 + $0x18c] sm:$0xf]  ;;  %v3309_v25 = vor.u32 %v3687_v17, %v3308_v15  ;;  %v3117_v15 = vor.u32 %v3639_v1, %v3116_v0  ;;  %v3310_v0 = vld [vmem:[#allocation11 + $0x598] sm:$0xf0] }
  0xbf   : > { %1789 = vmatpush.bf16.msrb.mxu2 %v2877_v26  ;;  %v2673_v26 = vor.u32 %v3525_v18, %v2670_v19  ;;  %v3665_v17 = vld [vmem:[#allocation11 + $0x4ec] sm:$0xf]  ;;  %v3230_v18 = vld [vmem:[#allocation11 + $0x4f8] sm:$0xf0]  ;;  %v3245_v19 = vor.u32 %v3671_v5, %v3244_v4 }
  0xc0   : > { %1803 = vmatpush.bf16.msrb.mxu3 %v3005_v30  ;;  %v2801_v30 = vor.u32 %v3557_v20, %v2798_v21  ;;  %v2609_v20 = vor.u32 %v3509_v7, %v2606_v9  ;;  %v3697_v21 = vld [vmem:[#allocation11 + $0x5ec] sm:$0xf]  ;;  %v3233_v28 = vor.u32 %v3665_v17, %v3230_v18  ;;  %v3038_v7 = vld [vmem:[#allocation11 + $0x378] sm:$0xf0] }
  0xc1   : > { %v3621_v58 = vld [vmem:[#allocation11 + $0x38c] sm:$0xf]  ;;  %v3166_v9 = vld [vmem:[#allocation11 + $0x478] sm:$0xf0] }
  0xc2   : > { %1762 = vmatpush.bf16.msrb.mxu0 %v2605_v38  ;;  %1776 = vmatpush.bf16.msrb.mxu1 %v2733_v43  ;;  %v3293_v38 = vor.u32 %v3683_v31, %v3292_v29  ;;  %v3276_v43 = vld [vmem:[#allocation11 + $0x548] sm:$0xf]  ;;  %v3597_v29 = vld [vmem:[#allocation11 + $0x2cc] sm:$0xf] }
  0xc3   : > { %1790 = vmatpush.bf16.msrb.mxu2 %v2861_v44  ;;  %v2785_v44 = vor.u32 %v3553_v34, %v2782_v36  ;;  %v3277_v51 = vor.u32 %v3679_v45, %v3276_v43  ;;  %v3629_v31 = vld [vmem:[#allocation11 + $0x3cc] sm:$0xf]  ;;  %v3214_v36 = vld [vmem:[#allocation11 + $0x4d8] sm:$0xf0] }
  0xc4   : > { %1804 = vmatpush.bf16.msrb.mxu3 %v2989_v47  ;;  %v2638_v47 = vld [vmem:[#allocation11 + $0x58] sm:$0xf0]  ;;  %v3661_v34 = vld [vmem:[#allocation11 + $0x4cc] sm:$0xf] }
  0xc5   : > { %1763 = vmatmul.bf16.vlgmr.msrb.gmra.mxu0 %v4305_v57  ;;  %1777 = vmatmul.bf16.vlgmr.msrb.gmra.mxu1 %v4310_v6  ;;  %v2641_v52 = vor.u32 %v3517_v46, %v2638_v47  ;;  %v3593_v43 = vld [vmem:[#allocation11 + $0x2ac] sm:$0xf]  ;;  %v3070_v47 = vld [vmem:[#allocation11 + $0x3b8] sm:$0xf0] }
  0xc6   : > { %1811 = vmatpush.bf16.msra.mxu0 %v3229_v48  ;;  %1825 = vmatpush.bf16.msra.mxu1 %v3357_v49  ;;  %v3549_v48 = vld [vmem:[#allocation11 + $0x14c] sm:$0xf]  ;;  %v2766_v49 = vld [vmem:[#allocation11 + $0x158] sm:$0xf0] }
  0xc7   : > { %1839 = vmatpush.bf16.msra.mxu2 %v2721_v50  ;;  %1805 = vmatmul.bf16.vlgmr.msrb.gmra.mxu3 %v4319_v23  ;;  %v3149_v50 = vor.u32 %v3647_v42, %v3148_v41  ;;  %v2769_v56 = vor.u32 %v3549_v48, %v2766_v49  ;;  %v3089_v41 = vor.u32 %v3629_v31, %v3086_v33  ;;  %v3625_v45 = vld [vmem:[#allocation11 + $0x3ac] sm:$0xf]  ;;  %v3198_v49 = vld [vmem:[#allocation11 + $0x4b8] sm:$0xf0] }
  0xc8   : > { %1853 = vmatpush.bf16.msra.mxu3 %v2849_v54  ;;  %1791 = vmatmul.bf16.vlgmr.msrb.gmra.mxu2 %v4317_v22  ;;  %v3643_v54 = vld [vmem:[#allocation11 + $0x434] sm:$0xf0]  ;;  %v3217_v42 = vor.u32 %v3661_v34, %v3214_v36  ;;  %v3657_v48 = vld [vmem:[#allocation11 + $0x4ac] sm:$0xf]  ;;  %v3006_v33 = vld [vmem:[#allocation11 + $0x338] sm:$0xf0] }
  0xc9   : > { %v3617_v4 = vld [vmem:[#allocation11 + $0x36c] sm:$0xf]  ;;  %v3134_v36 = vld [vmem:[#allocation11 + $0x438] sm:$0xf0] }
  0xca   : > { %1812 = vmatpush.bf16.msra.mxu0 %v3213_v61  ;;  %1826 = vmatpush.bf16.msra.mxu1 %v3341_v62  ;;  %v3545_v61 = vld [vmem:[#allocation11 + $0x12c] sm:$0xf]  ;;  %v2750_v62 = vld [vmem:[#allocation11 + $0x138] sm:$0xf0] }
  0xcb   : > { %1840 = vmatpush.bf16.msra.mxu2 %v2705_v63  ;;  %v3133_v63 = vor.u32 %v3643_v54, %v3132_v53  ;;  %v2753_v8 = vor.u32 %v3545_v61, %v2750_v62  ;;  %v3073_v53 = vor.u32 %v3625_v45, %v3070_v47  ;;  %v3201_v54 = vor.u32 %v3657_v48, %v3198_v49  ;;  %v3653_v61 = vld [vmem:[#allocation11 + $0x48c] sm:$0xf]  ;;  %v3182_v62 = vld [vmem:[#allocation11 + $0x498] sm:$0xf0] }
  0xcc   : > { %1854 = vmatpush.bf16.msra.mxu3 %v2833_v3  ;;  %v2625_v3 = vor.u32 %v3513_v59, %v2622_v60  ;;  %v3054_v60 = vld [vmem:[#allocation11 + $0x398] sm:$0xf0]  ;;  %v3613_v17 = vld [vmem:[#allocation11 + $0x34c] sm:$0xf] }
  0xcd   : > { %v3057_v1 = vor.u32 %v3621_v58, %v3054_v60  ;;  %v3609_v31 = vld [vmem:[#allocation11 + $0x32c] sm:$0xf]  ;;  %v3118_v49 = vld [vmem:[#allocation11 + $0x418] sm:$0xf0]  ;;  %v3714_v58 = vld [vmem:[#allocation8 + $0x74] sm:$0xf] }
  0xce   : > { %1813 = vmatpush.bf16.msra.mxu0 %v3197_v10  ;;  %1827 = vmatpush.bf16.msra.mxu1 %v3325_v11  ;;  %v3541_v10 = vld [vmem:[#allocation11 + $0x10c] sm:$0xf]  ;;  %v2734_v11 = vld [vmem:[#allocation11 + $0x118] sm:$0xf0] }
  0xcf   : > { %1841 = vmatpush.bf16.msra.mxu2 %v2689_v12  ;;  %v3601_v12 = vld [vmem:[#allocation11 + $0x2ec] sm:$0xf] }
  0xd0   : > { %1855 = vmatpush.bf16.msra.mxu3 %v2817_v16  ;;  %v3102_v16 = vld [vmem:[#allocation11 + $0x3f8] sm:$0xf0]  ;;  %v3641_v34 = vld [vmem:[#allocation11 + $0x42c] sm:$0xf] }
  0xd1   : > { %v3105_v27 = vor.u32 %v3633_v14, %v3102_v16  ;;  %v2894_v16 = vld [vmem:[#allocation11 + $0x258] sm:$0xf0]  ;;  %v3605_v45 = vld [vmem:[#allocation11 + $0x30c] sm:$0xf] }
  0xd2   : > { %1814 = vmatpush.bf16.msra.mxu0 %v3181_v24  ;;  %1828 = vmatpush.bf16.msra.mxu1 %v3309_v25  ;;  %v3358_v24 = vld [vmem:[#allocation11 + $0x5f8] sm:$0xf0]  ;;  %v2737_v25 = vor.u32 %v3541_v10, %v2734_v11  ;;  %v3681_v10 = vld [vmem:[#allocation11 + $0x56c] sm:$0xf] }
  0xd3   : > { %1842 = vmatpush.bf16.msra.mxu2 %v2673_v26  ;;  %v2977_v26 = vor.u32 %v3601_v12, %v2974_v13  ;;  %v3361_v32 = vor.u32 %v3697_v21, %v3358_v24  ;;  %v3294_v11 = vld [vmem:[#allocation11 + $0x578] sm:$0xf0]  ;;  %v3041_v13 = vor.u32 %v3617_v4, %v3038_v7  ;;  %v3677_v24 = vld [vmem:[#allocation11 + $0x54c] sm:$0xf]  ;;  %v3729_v7 = vld [vmem:[#allocation8 + $0xe4] sm:$0xf0] }
  0xd4   : > { %1856 = vmatpush.bf16.msra.mxu3 %v2801_v30  ;;  %v2958_v30 = vld [vmem:[#allocation11 + $0x2d8] sm:$0xf0]  ;;  %v3297_v18 = vor.u32 %v3681_v10, %v3294_v11  ;;  %v3637_v47 = vld [vmem:[#allocation11 + $0x40c] sm:$0xf]  ;;  %v3728_v11 = vld [vmem:[#allocation8 + $0xe4] sm:$0xf] }
  0xd5   : > { %v3150_v21 = vld [vmem:[#allocation11 + $0x458] sm:$0xf0] }
  0xd6   : > { %1815 = vmatpush.bf16.msra.mxu0 %v3165_v37  ;;  %1829 = vmatpush.bf16.msra.mxu1 %v3293_v38  ;;  %v3693_v37 = vld [vmem:[#allocation11 + $0x5cc] sm:$0xf]  ;;  %v3342_v38 = vld [vmem:[#allocation11 + $0x5d8] sm:$0xf0] }
  0xd7   : > { %1843 = vmatpush.bf16.msra.mxu2 %v2657_v40  ;;  %v2961_v40 = vor.u32 %v3597_v29, %v2958_v30  ;;  %v3345_v46 = vor.u32 %v3693_v37, %v3342_v38  ;;  %v3577_v29 = vld [vmem:[#allocation11 + $0x22c] sm:$0xf]  ;;  %v2878_v30 = vld [vmem:[#allocation11 + $0x238] sm:$0xf0] }
  0xd8   : > { %1857 = vmatpush.bf16.msra.mxu3 %v2785_v44  ;;  %v2942_v44 = vld [vmem:[#allocation11 + $0x2b8] sm:$0xf0]  ;;  %v3673_v37 = vld [vmem:[#allocation11 + $0x52c] sm:$0xf] }
  0xd9   : > { %v3262_v38 = vld [vmem:[#allocation11 + $0x538] sm:$0xf0] }
  0xda   : > { %1816 = vmatpush.bf16.msra.mxu0 %v3149_v50  ;;  %1830 = vmatpush.bf16.msra.mxu1 %v3277_v51  ;;  %v3689_v50 = vld [vmem:[#allocation11 + $0x5ac] sm:$0xf]  ;;  %v3326_v51 = vld [vmem:[#allocation11 + $0x5b8] sm:$0xf0]  ;;  %v3265_v48 = vor.u32 %v3673_v37, %v3262_v38  ;;  %v3724_v38 = vld [vmem:[#allocation8 + $0xc4] sm:$0xf] }
  0xdb   : > { %1844 = vmatpush.bf16.msra.mxu2 %v2641_v52  ;;  %v2945_v52 = vor.u32 %v3593_v43, %v2942_v44  ;;  %v3329_v59 = vor.u32 %v3689_v50, %v3326_v51  ;;  %v3009_v43 = vor.u32 %v3609_v31, %v3006_v33  ;;  %v3137_v44 = vor.u32 %v3641_v34, %v3134_v36  ;;  %v3669_v50 = vld [vmem:[#allocation11 + $0x50c] sm:$0xf]  ;;  %v3246_v51 = vld [vmem:[#allocation11 + $0x518] sm:$0xf0]  ;;  %v3708_v36 = vld [vmem:[#allocation8 + $0x44] sm:$0xf] }
  0xdc   : > { %1858 = vmatpush.bf16.msra.mxu3 %v2769_v56  ;;  %v2926_v56 = vld [vmem:[#allocation11 + $0x298] sm:$0xf0] }
  0xdd   : > { %v3476_v4 = vld [vmem:[#allocation8 + $0xe0] sm:$0xf] }
  0xde   : > { %1817 = vmatpush.bf16.msra.mxu0 %v3133_v63  ;;  %1831 = vmatpush.bf16.msra.mxu1 %v3261_v2  ;;  %v3685_v63 = vld [vmem:[#allocation11 + $0x58c] sm:$0xf]  ;;  %v3396_v31 = vld [vmem:[#allocation8 + $0x40] sm:$0xf] }
  0xdf   : > { %1845 = vmatpush.bf16.msra.mxu2 %v2625_v3  ;;  %v3585_v2 = vld [vmem:[#allocation11 + $0x26c] sm:$0xf]  ;;  %v2910_v3 = vld [vmem:[#allocation11 + $0x278] sm:$0xf0]  ;;  %v3313_v5 = vor.u32 %v3685_v63, %v3310_v0  ;;  %v3249_v0 = vor.u32 %v3669_v50, %v3246_v51  ;;  %v3706_v50 = vld [vmem:[#allocation8 + $0x34] sm:$0xf] }
  0xe0   : > { %1859 = vmatpush.bf16.msra.mxu3 %v2753_v8  ;;  %v3649_v8 = vld [vmem:[#allocation11 + $0x46c] sm:$0xf]  ;;  %v2913_v12 = vor.u32 %v3585_v2, %v2910_v3  ;;  %v3486_v63 = vld [vmem:[#allocation8 + $0xf8] sm:$0xf0]  ;;  %v3412_v2 = vld [vmem:[#allocation8 + $0x60] sm:$0xf] }
  0xe1   : > { %v3169_v14 = vor.u32 %v3649_v8, %v3166_v9  ;;  %v3713_v3 = vld [vmem:[#allocation8 + $0x64] sm:$0xf0]  ;;  %v3712_v8 = vld [vmem:[#allocation8 + $0x64] sm:$0xf]  ;;  %v3414_v9 = vld [vmem:[#allocation8 + $0x68] sm:$0xf0] }
  0xe2   : > { %1818 = vmatpush.bf16.msra.mxu0 %v3117_v15  ;;  %1832 = vmatpush.bf16.msra.mxu1 %v3245_v19  ;;  %v3581_v15 = vld [vmem:[#allocation11 + $0x24c] sm:$0xf]  ;;  %v3022_v19 = vld [vmem:[#allocation11 + $0x358] sm:$0xf0] }
  0xe3   : > { %1846 = vmatpush.bf16.msra.mxu2 %v2609_v20  ;;  %v3645_v20 = vld [vmem:[#allocation11 + $0x44c] sm:$0xf]  ;;  %v3390_v51 = vld [vmem:[#allocation8 + $0x38] sm:$0xf0] }
  0xe4   : > { %1860 = vmatpush.bf16.msra.mxu3 %v2737_v25  ;;  %v3278_v25 = vld [vmem:[#allocation11 + $0x558] sm:$0xf0] }
  0xe5   : > { %1819 = vmatmul.bf16.vlgmr.msra.gmra.mxu0 %v4327_v35  ;;  %1833 = vmatmul.bf16.vlgmr.msra.gmra.mxu1 %v4329_v39 }
  0xe6   : > { %1867 = vmatpush.bf16.msrb.mxu0 %v2977_v26  ;;  %1881 = vmatpush.bf16.msrb.mxu1 %v3105_v27  ;;  %v2897_v26 = vor.u32 %v3581_v15, %v2894_v16  ;;  %v3025_v27 = vor.u32 %v3613_v17, %v3022_v19  ;;  %v4347_v10 = vpop.f32.mrf.mxu0  ;;  %v3477_v15 = vor.u32 %v3729_v7, %v3476_v4  ;;  %v3404_v17 = vld [vmem:[#allocation8 + $0x50] sm:$0xf] }
  0xe7   : > { %1895 = vmatpush.bf16.msrb.mxu2 %v3233_v28  ;;  %1861 = vmatmul.bf16.vlgmr.msra.gmra.mxu3 %v4310_v6  ;;  %v3185_v6 = vor.u32 %v3653_v61, %v3182_v62  ;;  %v3153_v28 = vor.u32 %v3645_v20, %v3150_v21  ;;  %v3121_v61 = vor.u32 %v3637_v47, %v3118_v49  ;;  %v3730_v62 = vld [vmem:[#allocation8 + $0xf4] sm:$0xf]  ;;  %v3468_v19 = vld [vmem:[#allocation8 + $0xd0] sm:$0xf]  ;;  %v3727_v21 = vld [vmem:[#allocation8 + $0xd4] sm:$0xf0] }
  0xe8   : > { %1909 = vmatpush.bf16.msrb.mxu3 %v3361_v32  ;;  %1847 = vmatmul.bf16.vlgmr.msra.gmra.mxu2 %v4305_v57  ;;  %v2929_v57 = vor.u32 %v3589_v55, %v2926_v56  ;;  %v3281_v32 = vor.u32 %v3677_v24, %v3278_v25  ;;  %v3731_v56 = vld [vmem:[#allocation8 + $0xf4] sm:$0xf0]  ;;  %v3417_v16 = vor.u32 %v3712_v8, %v3414_v9  ;;  %v3710_v24 = vld [vmem:[#allocation8 + $0x54] sm:$0xf]  ;;  %v3406_v25 = vld [vmem:[#allocation8 + $0x58] sm:$0xf0] }
  0xe9   : > { %v3723_v49 = vld [vmem:[#allocation8 + $0xb4] sm:$0xf0]  ;;  %v3372_v7 = vld [vmem:[#allocation8 + $0x10] sm:$0xf] }
  0xea   : > { %1868 = vmatpush.bf16.msrb.mxu0 %v2961_v40  ;;  %1882 = vmatpush.bf16.msrb.mxu1 %v3089_v41  ;;  %v2881_v40 = vor.u32 %v3577_v29, %v2878_v30  ;;  %v3573_v41 = vld [vmem:[#allocation11 + $0x20c] sm:$0xf]  ;;  %v3469_v29 = vor.u32 %v3727_v21, %v3468_v19  ;;  %v3409_v30 = vor.u32 %v3710_v24, %v3406_v25  ;;  %v3703_v8 = vld [vmem:[#allocation8 + $0x14] sm:$0xf0]  ;;  %v4372_v19 = vld [vmem:[%s4470_s5] sm:$0xf] }
  0xeb   : > { %1896 = vmatpush.bf16.msrb.mxu2 %v3217_v42  ;;  %v2862_v42 = vld [vmem:[#allocation11 + $0x218] sm:$0xf0]  ;;  %v3436_v9 = vld [vmem:[#allocation8 + $0x90] sm:$0xf]  ;;  %v3373_v21 = vor.u32 %v3703_v8, %v3372_v7 }
  0xec   : > { %1910 = vmatpush.bf16.msrb.mxu3 %v3345_v46  ;;  %v2990_v46 = vld [vmem:[#allocation11 + $0x318] sm:$0xf0]  ;;  %v2865_v55 = vor.u32 %v3573_v41, %v2862_v42 }
  0xed   : > { %v2993_v60 = vor.u32 %v3605_v45, %v2990_v46  ;;  %v3707_v45 = vld [vmem:[#allocation8 + $0x34] sm:$0xf0]  ;;  %v3452_v46 = vld [vmem:[#allocation8 + $0xb0] sm:$0xf] }
  0xee   : > { %1869 = vmatpush.bf16.msrb.mxu0 %v2945_v52  ;;  %1883 = vmatpush.bf16.msrb.mxu1 %v3073_v53  ;;  %v3420_v52 = vld [vmem:[#allocation8 + $0x70] sm:$0xf]  ;;  %v3715_v53 = vld [vmem:[#allocation8 + $0x74] sm:$0xf0]  ;;  %v4359_v41 = vpop.f32.mrf.mxu0 }
  0xef   : > { %1897 = vmatpush.bf16.msrb.mxu2 %v3201_v54  ;;  %v3484_v54 = vld [vmem:[#allocation8 + $0xf0] sm:$0xf] }
  0xf0   : > { %1911 = vmatpush.bf16.msrb.mxu3 %v3329_v59  ;;  %v3422_v59 = vld [vmem:[#allocation8 + $0x78] sm:$0xf0] }
  0xf2   : > { %1870 = vmatpush.bf16.msrb.mxu0 %v2929_v57  ;;  %1884 = vmatpush.bf16.msrb.mxu1 %v3057_v1  ;;  %v3421_v57 = vor.u32 %v3715_v53, %v3420_v52  ;;  %v3485_v1 = vor.u32 %v3731_v56, %v3484_v54  ;;  %v4357_v37 = vpop.f32.mrf.mxu3  ;;  %v3722_v52 = vld [vmem:[#allocation8 + $0xb4] sm:$0xf]  ;;  %v3454_v53 = vld [vmem:[#allocation8 + $0xb8] sm:$0xf0]  ;;  %v3393_v56 = vor.u32 %v3706_v50, %v3390_v51 }
  0xf3   : > { %1898 = vmatpush.bf16.msrb.mxu2 %v3185_v6  ;;  %v3425_v6 = vor.u32 %v3714_v58, %v3422_v59  ;;  %v4355_v33 = vpop.f32.mrf.mxu2  ;;  %v3380_v58 = vld [vmem:[#allocation8 + $0x20] sm:$0xf]  ;;  %v3705_v59 = vld [vmem:[#allocation8 + $0x24] sm:$0xf0] }
  0xf4   : > { %1912 = vmatpush.bf16.msrb.mxu3 %v3313_v5  ;;  %v3489_v5 = vor.u32 %v3730_v62, %v3486_v63  ;;  %v3721_v62 = vld [vmem:[#allocation8 + $0xa4] sm:$0xf0]  ;;  %v3704_v63 = vld [vmem:[#allocation8 + $0x24] sm:$0xf] }
  0xf6   : > { %1871 = vmatpush.bf16.msrb.mxu0 %v2913_v12  ;;  %1885 = vmatpush.bf16.msrb.mxu1 %v3041_v13  ;;  %v3478_v12 = vld [vmem:[#allocation8 + $0xe8] sm:$0xf0]  ;;  %v4349_v13 = vpop.f32.mrf.mxu1 }
  0xf7   : > { %1899 = vmatpush.bf16.msrb.mxu2 %v3169_v14  ;;  %v3413_v14 = vor.u32 %v3713_v3, %v3412_v2  ;;  %v3481_v20 = vor.u32 %v3728_v11, %v3478_v12  ;;  %v3381_v2 = vor.u32 %v3705_v59, %v3380_v58  ;;  %v3719_v12 = vld [vmem:[#allocation8 + $0x94] sm:$0xf0] }
  0xf8   : > { %1913 = vmatpush.bf16.msrb.mxu3 %v3297_v18  ;;  %v3711_v18 = vld [vmem:[#allocation8 + $0x54] sm:$0xf0]  ;;  %v3437_v24 = vor.u32 %v3719_v12, %v3436_v9 }
  0xfa   : > { %1872 = vmatpush.bf16.msrb.mxu0 %v2897_v26  ;;  %1886 = vmatpush.bf16.msrb.mxu1 %v3025_v27  ;;  %v3726_v26 = vld [vmem:[#allocation8 + $0xd4] sm:$0xf]  ;;  %v3470_v27 = vld [vmem:[#allocation8 + $0xd8] sm:$0xf0]  ;;  %v4365_v3 = vpop.f32.mrf.mxu3 }
  0xfb   : > { %1900 = vmatpush.bf16.msrb.mxu2 %v3153_v28  ;;  %v3405_v28 = vor.u32 %v3711_v18, %v3404_v17  ;;  %v3473_v34 = vor.u32 %v3726_v26, %v3470_v27  ;;  %v3718_v17 = vld [vmem:[#allocation8 + $0x94] sm:$0xf]  ;;  %v3438_v18 = vld [vmem:[#allocation8 + $0x98] sm:$0xf0]  ;;  %v3364_v26 = vld [vmem:[#allocation8] sm:$0xf] }
  0xfc   : > { %1914 = vmatpush.bf16.msrb.mxu3 %v3281_v32  ;;  %v3460_v32 = vld [vmem:[#allocation8 + $0xc0] sm:$0xf]  ;;  %v3701_v27 = vld [vmem:[#allocation8 + $0x4] sm:$0xf0] }
  0xfe   : > { %1873 = vmatpush.bf16.msrb.mxu0 %v2881_v40  ;;  %1887 = vmatpush.bf16.msrb.mxu1 %v3009_v43  ;;  %v4361_v47 = vpop.f32.mrf.mxu1 }
  0xff   : > { %1901 = vmatpush.bf16.msrb.mxu2 %v3137_v44  ;;  %v3388_v44 = vld [vmem:[#allocation8 + $0x30] sm:$0xf] }
 0x100   : > { %1915 = vmatpush.bf16.msrb.mxu3 %v3265_v48  ;;  %v3389_v54 = vor.u32 %v3707_v45, %v3388_v44  ;;  %v4387_v44 = vld [vmem:[%s4281_s17 + $0x18] sm:$0xff] }
 0x102   : > { %1874 = vmatpush.bf16.msrb.mxu0 %v2865_v55  ;;  %1888 = vmatpush.bf16.msrb.mxu1 %v2993_v60  ;;  %v3453_v55 = vor.u32 %v3723_v49, %v3452_v46  ;;  %v3444_v60 = vld [vmem:[#allocation8 + $0xa0] sm:$0xf] }
 0x103   : > { %1902 = vmatpush.bf16.msrb.mxu2 %v3121_v61  ;;  %v3457_v61 = vor.u32 %v3722_v52, %v3454_v53  ;;  %v3445_v4 = vor.u32 %v3721_v62, %v3444_v60 }
 0x104   : > { %1916 = vmatpush.bf16.msrb.mxu3 %v3249_v0  ;;  %v3382_v0 = vld [vmem:[#allocation8 + $0x28] sm:$0xf0] }
 0x105   : > { %1875 = vmatmul.bf16.vlgmr.msrb.gmra.mxu0 %v4317_v22  ;;  %1889 = vmatmul.bf16.vlgmr.msrb.gmra.mxu1 %v4319_v23  ;;  %v3709_v22 = vld [vmem:[#allocation8 + $0x44] sm:$0xf0]  ;;  %v3398_v23 = vld [vmem:[#allocation8 + $0x48] sm:$0xf0] }
 0x106   : > { %2135 = vmatpush.bf16.msra.mxu0 %v3421_v57  ;;  %2149 = vmatpush.bf16.msra.mxu1 %v3485_v1  ;;  %v3397_v40 = vor.u32 %v3709_v22, %v3396_v31  ;;  %v3401_v43 = vor.u32 %v3708_v36, %v3398_v23  ;;  %v3720_v57 = vld [vmem:[#allocation8 + $0xa4] sm:$0xf]  ;;  %v3446_v1 = vld [vmem:[#allocation8 + $0xa8] sm:$0xf0]  ;;  %v3365_v36 = vor.u32 %v3701_v27, %v3364_v26 }
 0x107   : > { %2163 = vmatpush.bf16.msra.mxu2 %v3425_v6  ;;  %1917 = vmatmul.bf16.vlgmr.msrb.gmra.mxu3 %v4329_v39  ;;  %v3462_v39 = vld [vmem:[#allocation8 + $0xc8] sm:$0xf0]  ;;  %v4363_v6 = vpop.f32.mrf.mxu2  ;;  %v3449_v11 = vor.u32 %v3720_v57, %v3446_v1  ;;  %v3700_v31 = vld [vmem:[#allocation8 + $0x4] sm:$0xf] }
 0x108   : > { %2177 = vmatpush.bf16.msra.mxu3 %v3489_v5  ;;  %1903 = vmatmul.bf16.vlgmr.msrb.gmra.mxu2 %v4327_v35  ;;  %v3725_v35 = vld [vmem:[#allocation8 + $0xc4] sm:$0xf0]  ;;  %v3465_v48 = vor.u32 %v3724_v38, %v3462_v39  ;;  %v3385_v5 = vor.u32 %v3704_v63, %v3382_v0  ;;  %v3366_v22 = vld [vmem:[#allocation8 + $0x8] sm:$0xf0]  ;;  %v4378_v38 = vld [vmem:[%s4281_s17] sm:$0xff] }
 0x109   : > { %v3461_v42 = vor.u32 %v3725_v35, %v3460_v32  ;;  %v589_v32 = vperm.slane %v4372_v19, 0  ;;  %v3430_v35 = vld [vmem:[#allocation8 + $0x88] sm:$0xf0]  ;;  %v4381_v39 = vld [vmem:[%s4281_s17 + $0x10] sm:$0xff] }
 0x10a   : > { %2136 = vmatpush.bf16.msra.mxu0 %v3413_v14  ;;  %2150 = vmatpush.bf16.msra.mxu1 %v3477_v15  ;;  %v3702_v14 = vld [vmem:[#allocation8 + $0x14] sm:$0xf]  ;;  %v3374_v15 = vld [vmem:[#allocation8 + $0x18] sm:$0xf0]  ;;  %v1694_v45 = vpop.f32.mrf.mxu3  ;;  %v1935_v50 = vpack.c.bf16 %v4381_v39, %v4378_v38 }
 0x10b   : > { %2164 = vmatpush.bf16.msra.mxu2 %v3417_v16  ;;  %v4367_v16 = vpop.f32.mrf.mxu0  ;;  %v3377_v25 = vor.u32 %v3702_v14, %v3374_v15  ;;  %v1597_v49 = vadd.f32 %v4347_v10, %v589_v32  ;;  %v1599_v58 = vadd.f32 %v4359_v41, %v589_v32 }
 0x10c   : > { %2178 = vmatpush.bf16.msra.mxu3 %v3481_v20  ;;  %v4374_v20 = vpop.f32.mrf.mxu1 }
 0x10d   : > { %v1613_v0 = vadd.f32 %v4361_v47, %v1599_v58 }
 0x10e   : > { %2137 = vmatpush.bf16.msra.mxu0 %v3405_v28  ;;  %2151 = vmatpush.bf16.msra.mxu1 %v3469_v29  ;;  %v3428_v28 = vld [vmem:[#allocation8 + $0x80] sm:$0xf]  ;;  %v3441_v29 = vor.u32 %v3718_v17, %v3438_v18 }
 0x10f   : > { %2165 = vmatpush.bf16.msra.mxu2 %v3409_v30  ;;  %v3717_v30 = vld [vmem:[#allocation8 + $0x84] sm:$0xf0]  ;;  %v1680_v23 = vpop.f32.mrf.mxu2 }
 0x110   : > { %2179 = vmatpush.bf16.msra.mxu3 %v3473_v34  ;;  %v3716_v34 = vld [vmem:[#allocation8 + $0x84] sm:$0xf] }
 0x111   : > { %v3433_v46 = vor.u32 %v3716_v34, %v3430_v35 }
 0x112   : > { %2138 = vmatpush.bf16.msra.mxu0 %v3397_v40  ;;  %2152 = vmatpush.bf16.msra.mxu1 %v3461_v42  ;;  %v3429_v40 = vor.u32 %v3717_v30, %v3428_v28  ;;  %v3369_v42 = vor.u32 %v3700_v31, %v3366_v22  ;;  %v1696_v60 = vpop.f32.mrf.mxu3 }
 0x113   : > { %2166 = vmatpush.bf16.msra.mxu2 %v3401_v43  ;;  %v4384_v43 = vld [vmem:[%s4281_s17 + $0x8] sm:$0xff]  ;;  %v1654_v52 = vpop.f32.mrf.mxu0 }
 0x114   : > { %2180 = vmatpush.bf16.msra.mxu3 %v3465_v48  ;;  %v590_v48 = vperm.slane %v4372_v19, 1  ;;  %v1936_v51 = vpack.c.bf16 %v4387_v44, %v4384_v43  ;;  %v1668_v53 = vpop.f32.mrf.mxu1 }
 0x116   : > { %2139 = vmatpush.bf16.msra.mxu0 %v3389_v54  ;;  %2153 = vmatpush.bf16.msra.mxu1 %v3453_v55  ;;  %v1681_v54 = vadd.f32 %v1680_v23, %v590_v48  ;;  %v1611_v55 = vadd.f32 %v4349_v13, %v1597_v49 }
 0x117   : > { %2167 = vmatpush.bf16.msra.mxu2 %v3393_v56  ;;  %v1682_v56 = vpop.f32.mrf.mxu2 }
 0x118   : > { %2181 = vmatpush.bf16.msra.mxu3 %v3457_v61  ;;  %v1695_v10 = vadd.f32 %v1694_v45, %v1681_v54  ;;  %v1625_v59 = vadd.f32 %v4355_v33, %v1611_v55  ;;  %v1683_v1 = vadd.f32 %v1682_v56, %v590_v48  ;;  %v591_v48 = vperm.slane %v4372_v19, 2 }
 0x11a   : > { %2140 = vmatpush.bf16.msra.mxu0 %v3381_v2  ;;  %2154 = vmatpush.bf16.msra.mxu1 %v3445_v4  ;;  %v1639_v57 = vadd.f32 %v4357_v37, %v1625_v59  ;;  %v1627_v4 = vadd.f32 %v4363_v6, %v1613_v0 }
 0x11b   : > { %2168 = vmatpush.bf16.msra.mxu2 %v3385_v5  ;;  %v1697_v5 = vadd.f32 %v1696_v60, %v1683_v1 }
 0x11c   : > { %2182 = vmatpush.bf16.msra.mxu3 %v3449_v11  ;;  %v1653_v2 = vadd.f32 %v4367_v16, %v1639_v57  ;;  %v1641_v11 = vadd.f32 %v4365_v3, %v1627_v4 }
 0x11e   : > { %2141 = vmatpush.bf16.msra.mxu0 %v3373_v21  ;;  %2155 = vmatpush.bf16.msra.mxu1 %v3437_v24  ;;  %v1667_v33 = vadd.f32 %v4374_v20, %v1653_v2  ;;  %v1655_v37 = vadd.f32 %v1654_v52, %v1641_v11 }
 0x11f   : > { %2169 = vmatpush.bf16.msra.mxu2 %v3377_v25 }
 0x120   : > { %2183 = vmatpush.bf16.msra.mxu3 %v3441_v29  ;;  %v1669_v27 = vadd.f32 %v1668_v53, %v1655_v37 }
 0x122   : > { %2142 = vmatpush.bf16.msra.mxu0 %v3365_v36  ;;  %2156 = vmatpush.bf16.msra.mxu1 %v3429_v40  ;;  %v1708_v61 = vpop.f32.mrf.mxu0  ;;  %v1722_v63 = vpop.f32.mrf.mxu1 }
 0x123   : > { %2170 = vmatpush.bf16.msra.mxu2 %v3369_v42  ;;  %v1709_v62 = vadd.f32 %v1708_v61, %v1695_v10 }
 0x124   : > { %2184 = vmatpush.bf16.msra.mxu3 %v3433_v46 }
 0x125   : > { %2143 = vmatmul.bf16.vlgmr.msra.gmra.mxu0 %v1935_v50  ;;  %2157 = vmatmul.bf16.vlgmr.msra.gmra.mxu1 %v1936_v51  ;;  %v1723_v13 = vadd.f32 %v1722_v63, %v1709_v62 }
 0x126   : > { %2171 = vmatmul.bf16.vlgmr.msra.gmra.mxu2 %v1935_v50 }
 0x127   : > { %2185 = vmatmul.bf16.vlgmr.msra.gmra.mxu3 %v1936_v51  ;;  %v592_v51 = vperm.slane %v4372_v19, 3 }
 0x12a   : > { %v1710_v41 = vpop.f32.mrf.mxu0  ;;  %v1750_v9 = vpop.f32.mrf.mxu3 }
 0x12b   : > { %v1736_v7 = vpop.f32.mrf.mxu2  ;;  %v1711_v12 = vadd.f32 %v1710_v41, %v1697_v5  ;;  %v1724_v47 = vpop.f32.mrf.mxu1 }
 0x12c   : > { %v1737_v8 = vadd.f32 %v1736_v7, %v1723_v13 }
 0x12d   : > { %v1725_v21 = vadd.f32 %v1724_v47, %v1711_v12 }
 0x12e   : > { %v1751_v14 = vadd.f32 %v1750_v9, %v1737_v8 }
 0x130   : > { %v1923_v15 = vpack.c.bf16 %v1751_v14, %v1667_v33 }
 0x132   : > { %v2205_v17 = vunpack.c.l.b16 %v1923_v15  ;;  %v2206_v18 = vunpack.c.h.b16 %v1923_v15  ;;  %v1752_v26 = vpop.f32.mrf.mxu3 }
 0x133   : > { %v1738_v16 = vpop.f32.mrf.mxu2 }
 0x134   : > { %v2207_v24 = vpack.c.b16 %v2205_v17, %v2205_v17  ;;  %v2208_v6 = vpack.c.b16 %v2206_v18, %v2206_v18  ;;  %v1739_v25 = vadd.f32 %v1738_v16, %v1725_v21 }
 0x136   : > { %v1753_v28 = vadd.f32 %v1752_v26, %v1739_v25  ;;  %2218 = vmatpush.bf16.xpose.msrb.mxu0 %v2207_v24  ;;  %2231 = vmatpush.bf16.xpose.msrb.mxu1 %v2208_v6 }
 0x138   : > { %v1925_v20 = vpack.c.bf16 %v1753_v28, %v1669_v27 }
 0x13a   : > { %v2245_v29 = vunpack.c.l.b16 %v1925_v20  ;;  %v2246_v3 = vunpack.c.h.b16 %v1925_v20 }
 0x13c   : > { %v2247_v30 = vpack.c.b16 %v2245_v29, %v2245_v29  ;;  %v2248_v31 = vpack.c.b16 %v2246_v3, %v2246_v3 }
 0x13e   : > { %2258 = vmatpush.bf16.xpose.msrb.mxu2 %v2247_v30  ;;  %2271 = vmatpush.bf16.xpose.msrb.mxu3 %v2248_v31 }
 0x142   : > { %v1764_v22 = vpop.f32.mrf.mxu0  ;;  %v1778_v32 = vpop.f32.mrf.mxu1 }
 0x143   : > { %v1765_v52 = vadd.f32 %v1764_v22, %v591_v48 }
 0x145   : > { %v1779_v10 = vadd.f32 %v1778_v32, %v1765_v52 }
 0x14a   : > { %v1806_v35 = vpop.f32.mrf.mxu3  ;;  %v1766_v36 = vpop.f32.mrf.mxu0 }
 0x14b   : > { %v1792_v34 = vpop.f32.mrf.mxu2  ;;  %v1780_v23 = vpop.f32.mrf.mxu1  ;;  %v1767_v59 = vadd.f32 %v1766_v36, %v591_v48  ;;  %v1969_v36 = vld [vmem:[#allocation9] sm:$0x3] }
 0x14c   : > { %v1793_v60 = vadd.f32 %v1792_v34, %v1779_v10 }
 0x14d   : > { %v1781_v57 = vadd.f32 %v1780_v23, %v1767_v59  ;;  %v1971_v23 = vperm.slane %v1969_v36, 0 }
 0x14e   : > { %v1807_v1 = vadd.f32 %v1806_v35, %v1793_v60 }
 0x152   : > { %v1808_v42 = vpop.f32.mrf.mxu3 }
 0x153   : > { %v1794_v40 = vpop.f32.mrf.mxu2 }
 0x154   : > { %v1795_v5 = vadd.f32 %v1794_v40, %v1781_v57 }
 0x156   : > { %v1809_v11 = vadd.f32 %v1808_v42, %v1795_v5 }
 0x162   : > { %v1820_v45 = vpop.f32.mrf.mxu0  ;;  %v1834_v46 = vpop.f32.mrf.mxu1 }
 0x163   : > { %v1821_v4 = vadd.f32 %v1820_v45, %v1807_v1  ;;  %v1972_v45 = vperm.slane %v1969_v36, 1 }
 0x165   : > { %v1835_v33 = vadd.f32 %v1834_v46, %v1821_v4 }
 0x16a   : > { %v1862_v50 = vpop.f32.mrf.mxu3  ;;  %v1822_v53 = vpop.f32.mrf.mxu0 }
 0x16b   : > { %v1848_v49 = vpop.f32.mrf.mxu2  ;;  %v1836_v54 = vpop.f32.mrf.mxu1  ;;  %v1823_v37 = vadd.f32 %v1822_v53, %v1809_v11 }
 0x16c   : > { %v1849_v55 = vadd.f32 %v1848_v49, %v592_v51 }
 0x16d   : > { %v1837_v27 = vadd.f32 %v1836_v54, %v1823_v37 }
 0x16e   : > { %v1863_v56 = vadd.f32 %v1862_v50, %v1849_v55 }
 0x172   : > { %v1864_v61 = vpop.f32.mrf.mxu3 }
 0x173   : > { %v1850_v58 = vpop.f32.mrf.mxu2 }
 0x174   : > { %v1851_v13 = vadd.f32 %v1850_v58, %v592_v51 }
 0x176   : > { %v1865_v19 = vadd.f32 %v1864_v61, %v1851_v13 }
 0x182   : > { %v1876_v62 = vpop.f32.mrf.mxu0  ;;  %v1890_v0 = vpop.f32.mrf.mxu1 }
 0x183   : > { %v1877_v63 = vadd.f32 %v1876_v62, %v1863_v56 }
 0x185   : > { %v1891_v2 = vadd.f32 %v1890_v0, %v1877_v63 }
 0x18a   : > { %v1878_v41 = vpop.f32.mrf.mxu0  ;;  %v1918_v9 = vpop.f32.mrf.mxu3 }
 0x18b   : > { %v1904_v7 = vpop.f32.mrf.mxu2  ;;  %v1879_v12 = vadd.f32 %v1878_v41, %v1865_v19  ;;  %v1892_v47 = vpop.f32.mrf.mxu1 }
 0x18c   : > { %v1905_v8 = vadd.f32 %v1904_v7, %v1891_v2 }
 0x18d   : > { %v1893_v21 = vadd.f32 %v1892_v47, %v1879_v12 }
 0x18e   : > { %v1919_v14 = vadd.f32 %v1918_v9, %v1905_v8 }
 0x190   : > { %v1924_v15 = vpack.c.bf16 %v1919_v14, %v1835_v33 }
 0x192   : > { %v2299_v17 = vunpack.c.l.b16 %v1924_v15  ;;  %v2300_v18 = vunpack.c.h.b16 %v1924_v15  ;;  %v1920_v26 = vpop.f32.mrf.mxu3 }
 0x193   : > { %v1906_v16 = vpop.f32.mrf.mxu2 }
 0x194   : > { %v2301_v24 = vpack.c.b16 %v2299_v17, %v2299_v17  ;;  %v2302_v6 = vpack.c.b16 %v2300_v18, %v2300_v18  ;;  %v1907_v25 = vadd.f32 %v1906_v16, %v1893_v21 }
 0x196   : > { %v1921_v28 = vadd.f32 %v1920_v26, %v1907_v25  ;;  %v2308_v20 = vsel %vm2306_vm0, %v2301_v24, 0  ;;  %v2311_v29 = vsel %vm2306_vm0, %v2302_v6, 0 }
 0x197   : > { %2320 = vmatpush.bf16.msra.mxu0 %v2308_v20  ;;  %2333 = vmatpush.bf16.msra.mxu1 %v2311_v29 }
 0x198   : > { %v1926_v3 = vpack.c.bf16 %v1921_v28, %v1837_v27 }
 0x19a   : > { %v2340_v30 = vunpack.c.l.b16 %v1926_v3  ;;  %v2341_v31 = vunpack.c.h.b16 %v1926_v3 }
 0x19c   : > { %v2342_v22 = vpack.c.b16 %v2340_v30, %v2340_v30  ;;  %v2343_v32 = vpack.c.b16 %v2341_v31, %v2341_v31 }
 0x19e   : > { %v2348_v34 = vsel %vm2306_vm0, %v2342_v22, 0  ;;  %v2351_v35 = vsel %vm2306_vm0, %v2343_v32, 0 }
 0x19f   : > { %2360 = vmatpush.bf16.msra.mxu2 %v2348_v34  ;;  %2373 = vmatpush.bf16.msra.mxu3 %v2351_v35 }
 0x1a2   : > { %v2144_v40 = vpop.f32.mrf.mxu0  ;;  %v2158_v46 = vpop.f32.mrf.mxu1 }
 0x1a3   : > { %v2145_v42 = vadd.f32 %v2144_v40, %v1971_v23 }
 0x1a5   : > { %v2159_v49 = vadd.f32 %v2158_v46, %v2145_v42 }
 0x1a9   : > { %v2172_v48 = vpop.f32.mrf.mxu2 }
 0x1aa   : > { %v2173_v50 = vadd.f32 %v2172_v48, %v1972_v45  ;;  %v2186_v51 = vpop.f32.mrf.mxu3  ;;  %v2146_v53 = vpop.f32.mrf.mxu0 }
 0x1ab   : > { %v2147_v56 = vadd.f32 %v2146_v53, %v1971_v23  ;;  %v2160_v62 = vpop.f32.mrf.mxu1 }
 0x1ac   : > { %v2187_v52 = vadd.f32 %v2186_v51, %v2173_v50 }
 0x1ad   : > { %v2161_v0 = vadd.f32 %v2160_v62, %v2147_v56 }
 0x1ae   : > { %v2191_v54 = vpack.c.bf16 %v2187_v52, %v2159_v49 }
 0x1b0   : > { %v2198_v55 = vunpack.c.l.b16 %v2191_v54  ;;  %v2199_v10 = vunpack.c.h.b16 %v2191_v54 }
 0x1b1   : > { %v2174_v58 = vpop.f32.mrf.mxu2 }
 0x1b2   : > { %v2200_v59 = vpack.c.b16 %v2198_v55, %v2198_v55  ;;  %v2201_v60 = vpack.c.b16 %v2199_v10, %v2199_v10  ;;  %v2175_v61 = vadd.f32 %v2174_v58, %v1972_v45  ;;  %v2188_v63 = vpop.f32.mrf.mxu3 }
 0x1b4   : > { %v2189_v57 = vadd.f32 %v2188_v63, %v2175_v61  ;;  %2219 = vmatmul.bf16.vlgmr.msrb.gmra.mxu0 %v2200_v59  ;;  %2232 = vmatmul.bf16.vlgmr.msrb.gmra.mxu1 %v2201_v60 }
 0x1b6   : > { %v2192_v1 = vpack.c.bf16 %v2189_v57, %v2161_v0 }
 0x1b8   : > { %v2238_v13 = vunpack.c.l.b16 %v2192_v1  ;;  %v2239_v2 = vunpack.c.h.b16 %v2192_v1 }
 0x1ba   : > { %v2240_v4 = vpack.c.b16 %v2238_v13, %v2238_v13  ;;  %v2241_v5 = vpack.c.b16 %v2239_v2, %v2239_v2 }
 0x1bc   : > { %2259 = vmatmul.bf16.vlgmr.msrb.gmra.mxu2 %v2240_v4  ;;  %2272 = vmatmul.bf16.vlgmr.msrb.gmra.mxu3 %v2241_v5 }
 0x231   : > { %v2220_v19 = vpop.f32.mrf.mxu0  ;;  %v2233_v7 = vpop.f32.mrf.mxu1 }
 0x232   : > { %v2234_v14 = vadd.f32 %v2233_v7, %v2220_v19 }
 0x234   : > { %v2278_v37 = vsel %vm2277_vm1, %v2234_v14, -inf }
 0x239   : > { %v2222_v8 = vpop.f32.mrf.mxu0  ;;  %v2235_v41 = vpop.f32.mrf.mxu1 }
 0x23f   : > { %v2260_v9 = vpop.f32.mrf.mxu2  ;;  %v2273_v33 = vpop.f32.mrf.mxu3 }
 0x240   : > { %v2274_v11 = vadd.f32 %v2273_v33, %v2260_v9 }
 0x242   : > { %v2281_v12 = vsel %vm2277_vm1, %v2274_v11, -inf }
 0x243   : > { %2282 = vmax.xlane.f32.xlu0 %v2281_v12 }
 0x247   : > { %v2262_v47 = vpop.f32.mrf.mxu2  ;;  %v2275_v15 = vpop.f32.mrf.mxu3 }
 0x24b   : > { %2279 = vmax.xlane.f32.xlu0 %v2278_v37 }
 0x2b6   : > { %v2283_v17 = vpop.xlane.xlu0 %2282 }
 0x2b7   : > { %v2285_v18 = vsub.f32 %v2274_v11, %v2283_v17 }
 0x2b9   : > { %v2288_v21 = vmul.f32 1.442695, %v2285_v18 }
 0x2bb   : > { %3843 = vpow2.f32 %v2288_v21 }
 0x2be   : > { %v2280_v16 = vpop.xlane.xlu0 %2279 }
 0x2bf   : > { %v2284_v24 = vsub.f32 %v2234_v14, %v2280_v16 }
 0x2c1   : > { %v3844_v6 = vpop.eup %3843  ;;  %v2286_v25 = vmul.f32 1.442695, %v2284_v24 }
 0x2c2   : > { %v2297_v26 = vpack.c.bf16 %v3844_v6, %v3844_v6  ;;  %v2293_v29 = vsel %vm2277_vm1, %v3844_v6, 0.0 }
 0x2c3   : > { %3845 = vpow2.f32 %v2286_v25 }
 0x2c4   : > { %3492 = vmatmul.msk.bf16.vlgmr.msra.gmra.mxu2 %vm2277_vm1, %v2297_v26  ;;  %3493 = vmatmul.msk.bf16.vlgmr.msra.gmra.mxu3 %vm2277_vm1, %v2297_v26 }
 0x2c9   : > { %v3846_v27 = vpop.eup %3845 }
 0x2ca   : > { %v2296_v28 = vpack.c.bf16 %v3846_v27, %v3846_v27  ;;  %v2290_v20 = vsel %vm2277_vm1, %v3846_v27, 0.0 }
 0x2cb   : > { %2291 = vadd.xlane.f32.xlu1 %v2290_v20 }
 0x2cc   : > { %3490 = vmatmul.msk.bf16.vlgmr.msra.gmra.mxu0 %vm2277_vm1, %v2296_v28  ;;  %3491 = vmatmul.msk.bf16.vlgmr.msra.gmra.mxu1 %vm2277_vm1, %v2296_v28 }
 0x2d3   : > { %2294 = vadd.xlane.f32.xlu1 %v2293_v29 }
 0x33e   : > { %v2292_v3 = vpop.xlane.xlu1 %2291 }
 0x33f   : > { %3847 = vrcp.f32 %v2292_v3 }
 0x345   : > { %v3848_v32 = vpop.eup %3847 }
 0x346   : > { %v2295_v30 = vpop.xlane.xlu1 %2294 }
 0x347   : > { %3849 = vrcp.f32 %v2295_v30  ;;  %v2362_v31 = vpop.f32.mrf.mxu2  ;;  %v2375_v22 = vpop.f32.mrf.mxu3 }
 0x349   : > { %v2322_v34 = vpop.f32.mrf.mxu0  ;;  %v2335_v35 = vpop.f32.mrf.mxu1 }
 0x34a   : > { %v2381_v36 = vmul.f32 %v3848_v32, %v2322_v34  ;;  %v2382_v23 = vmul.f32 %v3848_v32, %v2335_v35 }
 0x34c   : > { %v2385_v40 = vadd.f32 %v2381_v36, %v4378_v38  ;;  %v2386_v42 = vadd.f32 %v2382_v23, %v4384_v43 }
 0x34d   : > { %v3850_v45 = vpop.eup %3849 }
 0x34e   : > { %v2383_v46 = vmul.f32 %v3850_v45, %v2362_v31  ;;  %v2384_v48 = vmul.f32 %v3850_v45, %v2375_v22  ;;  %2389 = vst [vmem:[%s380_s12] sm:$0xff] %v2385_v40 }
 0x34f   : > { %2390 = vst [vmem:[%s380_s12 + $0x8] sm:$0xff] %v2386_v42  ;;  %v2364_v49 = vpop.f32.mrf.mxu2  ;;  %v2377_v50 = vpop.f32.mrf.mxu3 }
 0x350   : > { %v2387_v51 = vadd.f32 %v2383_v46, %v4381_v39  ;;  %v2388_v52 = vadd.f32 %v2384_v48, %v4387_v44 }
 0x351   : > { %v2324_v38 = vpop.f32.mrf.mxu0  ;;  %v2337_v53 = vpop.f32.mrf.mxu1 }
 0x352   : > { %2391 = vst [vmem:[%s380_s12 + $0x10] sm:$0xff] %v2387_v51 }
 0x353   : > { %2392 = vst [vmem:[%s380_s12 + $0x18] sm:$0xff] %v2388_v52 }
 0x354   : > { %4028 = shalt.err (!%p4025_p0)
}
 0x355   : > { %s4106_s2 = smov 256   ;;  %s4107_s17 = smov 16  }
 0x356   : > { %3753 = dma.vmem_to_hbm [thread:$0]  (%p4231_p3), %s4426_s8, 512, %s2412_s15, %s2394_s24, %s4106_s2, %s4106_s2, %s4107_s17  }
 0x357 PF: > { %s4499_s0 = sld [smem:[#allocation19_spill]]  ;;  %s2426_s3 = sand.u32 1, %s4075_s21  }
 0x358   : > { %p3773_p5 = pnand %p2556_p11, %p4188_p6  ;;  %s2427_s23 = scalar_lea.sflag [#allocation5], %s2426_s3 }
 0x35a   : > { %p3774_p7 = pneg %p3773_p5 }
 0x35c   : > { %4070 = dma.done.wait (%p3774_p7), %s2427_s23, 512  }
 0x35d   : > { %4072 = vsyncadd (%p3774_p7), %s2427_s23, 4294966784  ;;  %s26_s26 = sadd.s32 1, %s4499_s0   ;;  %s4500_s27 = sld [smem:[#allocation18_spill]] }
 0x35e   : > { %p23_p9 = scmp.ge.s32.totalorder %s26_s26, 4   ;;  %s4501_s23 = sld [smem:[#allocation21_spill]] }
 0x35f   : > { %s4502_s16 = sld [smem:[#allocation20_spill]]  ;;  %s4503_s21 = smov %s4079_s22 }
 0x360   : > { %s4505_s24 = smov %s4091_s25 }
 0x361   :  { %25 = sbr.rel (!%p23_p9) target bundleno = 14 (0xe), region = 118 }
 0x363   : > { %s4504_s22 = smov %s4500_s27 }
 0x365   : > { %s4506_s25 = smov %s4502_s16 }
 0x366   :  { %2433 = vsyncpa [#allocation4], 1 }
 0x367   :  { %2435 = vsyncpa [#allocation4 + $0x1], 1 }
 0x368   :  { %2436 = vsyncpa [#allocation7], 1 }
 0x369   :  { %2438 = vsyncpa [#allocation7 + $0x1], 1 }
 0x36a   :  { %2439 = vsyncpa [#allocation10], 1 }
 0x36b   :  { %2440 = vsyncpa [#allocation5], 1 }
 0x36c   :  { %2442 = vsyncpa [#allocation5 + $0x1], 1 }

</bundles_post_ra>
